<compile_context>
chip_gen: v5e
topology: v5e:2x2
jax: 0.10.0
libtpu: 0.0.40
codegen_flags: <defaults>
</compile_context>

<pallas_src>
import math

import jax
import jax.numpy as jnp
from jax.experimental import pallas as pl
from jax.experimental.pallas import tpu as pltpu

D_MODEL = 32
N_HEADS = 4
D_HEAD = D_MODEL // N_HEADS
DIM_FF = 64
NUM_ENC = 2
NUM_DEC = 2
EPS = 1e-5

BIAS_LANES = 128  # every bias / LN vector is padded to one 128-lane row


# ----------------------- bias/LN slab layout (static) -------------------------

def _make_bias_layout():
    layout = []
    for i in range(NUM_ENC):
        layout += [(f"enc{i}_bqkv", 3 * D_MODEL), (f"enc{i}_bo", D_MODEL),
                   (f"enc{i}_bf1", DIM_FF), (f"enc{i}_bf2", D_MODEL),
                   (f"enc{i}_ln1g", D_MODEL), (f"enc{i}_ln1b", D_MODEL),
                   (f"enc{i}_ln2g", D_MODEL), (f"enc{i}_ln2b", D_MODEL)]
    for j in range(NUM_DEC):
        layout += [(f"dec{j}_sa_bqkv", 3 * D_MODEL), (f"dec{j}_sa_bo", D_MODEL),
                   (f"dec{j}_ca_bq", D_MODEL), (f"dec{j}_ca_bo", D_MODEL),
                   (f"dec{j}_bf1", DIM_FF), (f"dec{j}_bf2", D_MODEL),
                   (f"dec{j}_ln1g", D_MODEL), (f"dec{j}_ln1b", D_MODEL),
                   (f"dec{j}_ln2g", D_MODEL), (f"dec{j}_ln2b", D_MODEL),
                   (f"dec{j}_ln3g", D_MODEL), (f"dec{j}_ln3b", D_MODEL)]
    layout += [("cakv_bias", NUM_DEC * 2 * D_MODEL),
               ("final_lng", D_MODEL), ("final_lnb", D_MODEL)]
    return layout


BIAS_LAYOUT = _make_bias_layout()
BIAS_INDEX = {name: (row, width) for row, (name, width) in enumerate(BIAS_LAYOUT)}
BIAS_ROWS = len(BIAS_LAYOUT)


# ------------------------------ fused kernel ----------------------------------

def _detr_fused_kernel(x_ref, qe_ref, wqkv_ref, wo_ref, wf1_ref, wf2_ref,
                       wcakv_ref, bias_ref, out_ref):
    """One grid program = one batch element; everything resident in VMEM.

    x_ref   : (S, D)                 encoder tokens (batch dim squeezed by BlockSpec)
    qe_ref  : (Q, D)                 decoder queries
    wqkv_ref: (NUM_ENC+NUM_DEC, D, 3D)   fused QKV weights (enc, then dec self-attn)
    wo_ref  : (NUM_ENC+3*NUM_DEC, D, D)  [enc wo | dec sa_wo | dec ca_wo | dec ca_wq]
    wf1_ref : (NUM_ENC+NUM_DEC, D, FF)
    wf2_ref : (NUM_ENC+NUM_DEC, FF, D)
    wcakv_ref: (D, NUM_DEC*2D)        cross-attn K/V weights, all decoder layers
    bias_ref: (BIAS_ROWS, 128)        all biases / LN params, one per row
    out_ref : (NUM_DEC, Q, D)
    """
    bias = bias_ref[...]

    def b(name):
        row, w = BIAS_INDEX[name]
        return bias[row:row + 1, :w]                      # (1, w)

    def ln(y, name):
        g = b(name + "g")
        bb = b(name + "b")
        mu = jnp.mean(y, axis=-1, keepdims=True)
        var = jnp.mean(jnp.square(y - mu), axis=-1, keepdims=True)
        return (y - mu) * jax.lax.rsqrt(var + EPS) * g + bb

    def attend(q2, k2, v2, wo, bo):
        # q2: (Lq, D), k2/v2: (Lk, D)  ->  (Lq, D)
        lq, lk = q2.shape[0], k2.shape[0]
        q = q2.reshape(lq, N_HEADS, D_HEAD) * (1.0 / math.sqrt(D_HEAD))
        k = k2.reshape(lk, N_HEADS, D_HEAD)
        v = v2.reshape(lk, N_HEADS, D_HEAD)
        s = jnp.einsum("qhd,khd->hqk", q, k, preferred_element_type=jnp.float32)
        s = s - jnp.max(s, axis=-1, keepdims=True)
        p = jnp.exp(s)
        p = p * pl.reciprocal(jnp.sum(p, axis=-1, keepdims=True), approx=True)
        o = jnp.einsum("hqk,khd->qhd", p, v, preferred_element_type=jnp.float32)
        o = o.reshape(lq, D_MODEL)                        # merge heads, lane-dense
        return jnp.dot(o, wo, preferred_element_type=jnp.float32) + bo

    def ffn(y, w1, b1, w2, b2):
        h = jnp.maximum(jnp.dot(y, w1, preferred_element_type=jnp.float32) + b1, 0.0)
        return jnp.dot(h, w2, preferred_element_type=jnp.float32) + b2

    # ------------------------------ encoder ------------------------------
    src = x_ref[...].astype(jnp.float32)                  # (S, D)
    for i in range(NUM_ENC):
        qkv = jnp.dot(src, wqkv_ref[i], preferred_element_type=jnp.float32) \
              + b(f"enc{i}_bqkv")
        attn = attend(qkv[:, :D_MODEL], qkv[:, D_MODEL:2 * D_MODEL],
                      qkv[:, 2 * D_MODEL:], wo_ref[i], b(f"enc{i}_bo"))
        src = ln(src + attn, f"enc{i}_ln1")
        ff = ffn(src, wf1_ref[i], b(f"enc{i}_bf1"), wf2_ref[i], b(f"enc{i}_bf2"))
        src = ln(src + ff, f"enc{i}_ln2")
    memory = src                                          # (S, D)

    # Hoisted cross-attn K/V projection of memory for ALL decoder layers
    # (one lane-dense N=128 matmul instead of NUM_DEC N=64 ones).
    kv_all = jnp.dot(memory, wcakv_ref[...], preferred_element_type=jnp.float32) \
             + b("cakv_bias")                             # (S, NUM_DEC*2D)

    # ------------------------------ decoder ------------------------------
    sa_wo0 = NUM_ENC
    ca_wo0 = NUM_ENC + NUM_DEC
    ca_wq0 = NUM_ENC + 2 * NUM_DEC

    tgt = qe_ref[...].astype(jnp.float32)                 # (Q, D)
    for j in range(NUM_DEC):
        # --- self-attention (fused QKV matmul) ---
        qkv = jnp.dot(tgt, wqkv_ref[NUM_ENC + j],
                      preferred_element_type=jnp.float32) + b(f"dec{j}_sa_bqkv")
        sa = attend(qkv[:, :D_MODEL], qkv[:, D_MODEL:2 * D_MODEL],
                    qkv[:, 2 * D_MODEL:], wo_ref[sa_wo0 + j], b(f"dec{j}_sa_bo"))
        tgt = ln(tgt + sa, f"dec{j}_ln1")

        # --- cross-attention (K/V precomputed above) ---
        qc = jnp.dot(tgt, wo_ref[ca_wq0 + j],
                     preferred_element_type=jnp.float32) + b(f"dec{j}_ca_bq")
        off = j * 2 * D_MODEL
        kc = kv_all[:, off:off + D_MODEL]
        vc = kv_all[:, off + D_MODEL:off + 2 * D_MODEL]
        ca = attend(qc, kc, vc, wo_ref[ca_wo0 + j], b(f"dec{j}_ca_bo"))
        tgt = ln(tgt + ca, f"dec{j}_ln2")

        # --- FFN ---
        ff = ffn(tgt, wf1_ref[NUM_ENC + j], b(f"dec{j}_bf1"),
                 wf2_ref[NUM_ENC + j], b(f"dec{j}_bf2"))
        tgt = ln(tgt + ff, f"dec{j}_ln3")

        # return_intermediate: final decoder norm applied to each layer output
        out_ref[j] = ln(tgt, "final_ln").astype(out_ref.dtype)


# ------------------------------ host wrapper ----------------------------------

@jax.jit
def detr_transformer_forward(params, x, query_embed):
    B, S, D = x.shape
    Q = query_embed.shape[1]
    assert D == D_MODEL

    def full(a):
        return pl.BlockSpec(a.shape, lambda bb, _nd=a.ndim: (0,) * _nd)

    # vmem budget derived from actual buffer sizes (double-buffered) + scratch headroom.
    param_bytes = sum(int(a.size) * a.dtype.itemsize for a in params.values())
    io_bytes = 4 * (int(x.size) + int(query_embed.size) + B * NUM_DEC * Q * D)
    vmem_limit = 2 * (param_bytes + io_bytes) + (4 << 20)

    out = pl.pallas_call(
        _detr_fused_kernel,
        grid=(B,),
        in_specs=[
            pl.BlockSpec((None, S, D), lambda bb: (bb, 0, 0)),   # x, per-batch tile
            pl.BlockSpec((None, Q, D), lambda bb: (bb, 0, 0)),   # query_embed
            full(params["w_qkv"]), full(params["w_o"]),
            full(params["w_f1"]), full(params["w_f2"]),
            full(params["w_cakv"]), full(params["bias"]),
        ],
        out_specs=pl.BlockSpec((None, NUM_DEC, Q, D), lambda bb: (bb, 0, 0, 0)),
        out_shape=jax.ShapeDtypeStruct((B, NUM_DEC, Q, D), jnp.float32),
        compiler_params=pltpu.CompilerParams(
            dimension_semantics=("parallel",),    # batch elements -> separate TCs on v7x
            vmem_limit_bytes=int(vmem_limit)),
    )(x, query_embed, params["w_qkv"], params["w_o"], params["w_f1"],
      params["w_f2"], params["w_cakv"], params["bias"])

    return jnp.transpose(out, (1, 0, 2, 3))               # (NUM_DEC, B, Q, D)


# ---------------------------- parameter packing --------------------------------

def _init_linear(key, din, dout):
    kw, kb = jax.random.split(key)
    w = jax.random.normal(kw, (din, dout), jnp.float32) * (1.0 / math.sqrt(din))
    b = jax.random.normal(kb, (dout,), jnp.float32) * 0.01
    return w, b


def init_params(key):
    ones = lambda: jnp.ones((D_MODEL,), jnp.float32)
    zeros = lambda: jnp.zeros((D_MODEL,), jnp.float32)

    enc = []
    for i in range(NUM_ENC):
        ks = jax.random.split(jax.random.fold_in(key, 100 + i), 4)
        wqkv, bqkv = _init_linear(ks[0], D_MODEL, 3 * D_MODEL)
        wo, bo = _init_linear(ks[1], D_MODEL, D_MODEL)
        wf1, bf1 = _init_linear(ks[2], D_MODEL, DIM_FF)
        wf2, bf2 = _init_linear(ks[3], DIM_FF, D_MODEL)
        enc.append(dict(wqkv=wqkv, bqkv=bqkv, wo=wo, bo=bo, wf1=wf1, bf1=bf1,
                        wf2=wf2, bf2=bf2, ln1g=ones(), ln1b=zeros(),
                        ln2g=ones(), ln2b=zeros()))

    dec = []
    for j in range(NUM_DEC):
        ks = jax.random.split(jax.random.fold_in(key, 200 + j), 6)
        sa_wqkv, sa_bqkv = _init_linear(ks[0], D_MODEL, 3 * D_MODEL)
        sa_wo, sa_bo = _init_linear(ks[1], D_MODEL, D_MODEL)
        ca_wqkv, ca_bqkv = _init_linear(ks[2], D_MODEL, 3 * D_MODEL)
        ca_wo, ca_bo = _init_linear(ks[3], D_MODEL, D_MODEL)
        wf1, bf1 = _init_linear(ks[4], D_MODEL, DIM_FF)
        wf2, bf2 = _init_linear(ks[5], DIM_FF, D_MODEL)
        dec.append(dict(sa_wqkv=sa_wqkv, sa_bqkv=sa_bqkv, sa_wo=sa_wo, sa_bo=sa_bo,
                        ca_wq=ca_wqkv[:, :D_MODEL], ca_bq=ca_bqkv[:D_MODEL],
                        ca_wkv=ca_wqkv[:, D_MODEL:], ca_bkv=ca_bqkv[D_MODEL:],
                        ca_wo=ca_wo, ca_bo=ca_bo,
                        wf1=wf1, bf1=bf1, wf2=wf2, bf2=bf2,
                        ln1g=ones(), ln1b=zeros(), ln2g=ones(), ln2b=zeros(),
                        ln3g=ones(), ln3b=zeros()))

    fin_g, fin_b = ones(), zeros()
    return pack_params(enc, dec, fin_g, fin_b)


def pack_params(enc, dec, fin_g, fin_b):
    """Pack per-layer params into a handful of contiguous slabs (few, big DMAs)."""
    w_qkv = jnp.stack([l["wqkv"] for l in enc] + [l["sa_wqkv"] for l in dec])
    w_o = jnp.stack([l["wo"] for l in enc] + [l["sa_wo"] for l in dec]
                    + [l["ca_wo"] for l in dec] + [l["ca_wq"] for l in dec])
    w_f1 = jnp.stack([l["wf1"] for l in enc] + [l["wf1"] for l in dec])
    w_f2 = jnp.stack([l["wf2"] for l in enc] + [l["wf2"] for l in dec])
    w_cakv = jnp.concatenate([l["ca_wkv"] for l in dec], axis=-1)   # (D, NUM_DEC*2D)

    vals = {}
    for i, l in enumerate(enc):
        vals[f"enc{i}_bqkv"] = l["bqkv"]; vals[f"enc{i}_bo"] = l["bo"]
        vals[f"enc{i}_bf1"] = l["bf1"]; vals[f"enc{i}_bf2"] = l["bf2"]
        for n in ("ln1g", "ln1b", "ln2g", "ln2b"):
            vals[f"enc{i}_{n}"] = l[n]
    for j, l in enumerate(dec):
        vals[f"dec{j}_sa_bqkv"] = l["sa_bqkv"]; vals[f"dec{j}_sa_bo"] = l["sa_bo"]
        vals[f"dec{j}_ca_bq"] = l["ca_bq"]; vals[f"dec{j}_ca_bo"] = l["ca_bo"]
        vals[f"dec{j}_bf1"] = l["bf1"]; vals[f"dec{j}_bf2"] = l["bf2"]
        for n in ("ln1g", "ln1b", "ln2g", "ln2b", "ln3g", "ln3b"):
            vals[f"dec{j}_{n}"] = l[n]
    vals["cakv_bias"] = jnp.concatenate([l["ca_bkv"] for l in dec], axis=-1)
    vals["final_lng"] = fin_g
    vals["final_lnb"] = fin_b

    rows = []
    for name, w in BIAS_LAYOUT:
        v = jnp.reshape(vals[name], (-1,)).astype(jnp.float32)
        assert v.shape[0] == w, (name, v.shape, w)
        rows.append(jnp.pad(v, (0, BIAS_LANES - w)))
    bias = jnp.stack(rows)                                           # (BIAS_ROWS, 128)

    return dict(w_qkv=w_qkv, w_o=w_o, w_f1=w_f1, w_f2=w_f2,
                w_cakv=w_cakv, bias=bias)


# ----------------------------------- main --------------------------------------

if __name__ == "__main__":
    B, S, Q = 2, 16, 8

    key = jax.random.PRNGKey(0)
    kx, kq, kp = jax.random.split(key, 3)
    x = jax.random.normal(kx, (B, S, D_MODEL), jnp.float32)             # encoder tokens
    query_embed = jax.random.normal(kq, (B, Q, D_MODEL), jnp.float32)   # decoder queries

    params = init_params(kp)

    hs = detr_transformer_forward(params, x, query_embed)
    hs = jax.block_until_ready(hs)

    assert hs.shape == (NUM_DEC, B, Q, D_MODEL), hs.shape
    assert bool(jnp.all(jnp.isfinite(hs)))
    print("KERNEL_OK")
</pallas_src>

<mosaic_0001>
module attributes {stable_mosaic.version = 11 : i64} {
  func.func @_detr_fused_kernel(%arg0: i32, %arg1: memref<1x16x32xf32, #tpu.memory_space<vmem>>, %arg2: memref<1x8x32xf32, #tpu.memory_space<vmem>>, %arg3: memref<4x32x96xf32, #tpu.memory_space<vmem>>, %arg4: memref<8x32x32xf32, #tpu.memory_space<vmem>>, %arg5: memref<4x32x64xf32, #tpu.memory_space<vmem>>, %arg6: memref<4x64x32xf32, #tpu.memory_space<vmem>>, %arg7: memref<32x128xf32, #tpu.memory_space<vmem>>, %arg8: memref<43x128xf32, #tpu.memory_space<vmem>>, %arg9: memref<1x2x8x32xf32, #tpu.memory_space<vmem>>) attributes {dimension_semantics = [#tpu.dimension_semantics<parallel>], iteration_bounds = array<i64: 2>, scalar_prefetch = 0 : i64, scratch_operands = 0 : i64, tpu.core_type = #tpu.core_type<tc>, window_params = [{transform_indices = @transform_0, window_bounds = array<i64: 1, 16, 32>}, {transform_indices = @transform_1, window_bounds = array<i64: 1, 8, 32>}, {pipeline_mode = #tpu.pipeline_mode<synchronous>, transform_indices = @transform_2, window_bounds = array<i64: 4, 32, 96>}, {pipeline_mode = #tpu.pipeline_mode<synchronous>, transform_indices = @transform_3, window_bounds = array<i64: 8, 32, 32>}, {pipeline_mode = #tpu.pipeline_mode<synchronous>, transform_indices = @transform_4, window_bounds = array<i64: 4, 32, 64>}, {pipeline_mode = #tpu.pipeline_mode<synchronous>, transform_indices = @transform_5, window_bounds = array<i64: 4, 64, 32>}, {pipeline_mode = #tpu.pipeline_mode<synchronous>, transform_indices = @transform_6, window_bounds = array<i64: 32, 128>}, {pipeline_mode = #tpu.pipeline_mode<synchronous>, transform_indices = @transform_7, window_bounds = array<i64: 43, 128>}, {transform_indices = @transform_8, window_bounds = array<i64: 1, 2, 8, 32>}]} {
    %c0 = arith.constant 0 : index
    %c0_0 = arith.constant 0 : index
    %0 = vector.load %arg8[%c0, %c0_0] : memref<43x128xf32, #tpu.memory_space<vmem>>, vector<43x128xf32>
    %c0_1 = arith.constant 0 : index
    %c0_2 = arith.constant 0 : index
    %c0_3 = arith.constant 0 : index
    %1 = vector.load %arg1[%c0_1, %c0_2, %c0_3] : memref<1x16x32xf32, #tpu.memory_space<vmem>>, vector<1x16x32xf32>
    %2 = vector.shape_cast %1 : vector<1x16x32xf32> to vector<16x32xf32>
    %c0_4 = arith.constant 0 : index
    %c0_5 = arith.constant 0 : index
    %c0_6 = arith.constant 0 : index
    %3 = vector.load %arg3[%c0_4, %c0_5, %c0_6] : memref<4x32x96xf32, #tpu.memory_space<vmem>>, vector<1x32x96xf32>
    %4 = vector.shape_cast %3 : vector<1x32x96xf32> to vector<32x96xf32>
    %cst = arith.constant dense<0.000000e+00> : vector<16x96xf32>
    %5 = tpu.matmul %2, %4, %cst {dimension_numbers = #tpu.dot_dimension_numbers<[1], [0], [0], [1], [0, 0, 1, 1], [], []>} : vector<16x32xf32>, vector<32x96xf32>, vector<16x96xf32> -> vector<16x96xf32>
    %6 = vector.extract_strided_slice %0 {offsets = [0, 0], sizes = [1, 96], strides = [1, 1]} : vector<43x128xf32> to vector<1x96xf32>
    %7 = vector.broadcast %6 : vector<1x96xf32> to vector<16x96xf32>
    %8 = arith.addf %5, %7 : vector<16x96xf32>
    %9 = vector.extract_strided_slice %8 {offsets = [0, 0], sizes = [16, 32], strides = [1, 1]} : vector<16x96xf32> to vector<16x32xf32>
    %10 = vector.extract_strided_slice %8 {offsets = [0, 32], sizes = [16, 32], strides = [1, 1]} : vector<16x96xf32> to vector<16x32xf32>
    %11 = vector.extract_strided_slice %8 {offsets = [0, 64], sizes = [16, 32], strides = [1, 1]} : vector<16x96xf32> to vector<16x32xf32>
    %c0_7 = arith.constant 0 : index
    %c0_8 = arith.constant 0 : index
    %c0_9 = arith.constant 0 : index
    %12 = vector.load %arg4[%c0_7, %c0_8, %c0_9] : memref<8x32x32xf32, #tpu.memory_space<vmem>>, vector<1x32x32xf32>
    %13 = vector.shape_cast %12 : vector<1x32x32xf32> to vector<32x32xf32>
    %14 = vector.extract_strided_slice %0 {offsets = [1, 0], sizes = [1, 32], strides = [1, 1]} : vector<43x128xf32> to vector<1x32xf32>
    %15 = vector.shape_cast %9 : vector<16x32xf32> to vector<16x4x8xf32>
    %cst_10 = arith.constant 0.353553385 : f32
    %16 = vector.broadcast %cst_10 : f32 to vector<16x4x8xf32>
    %17 = arith.mulf %15, %16 : vector<16x4x8xf32>
    %18 = vector.shape_cast %10 : vector<16x32xf32> to vector<16x4x8xf32>
    %19 = vector.shape_cast %11 : vector<16x32xf32> to vector<16x4x8xf32>
    "tpu.trace_start"() <{level = 10 : i32, message = "qhd,khd->hqk"}> : () -> ()
    %cst_11 = arith.constant dense<0.000000e+00> : vector<4x16x16xf32>
    %20 = tpu.matmul %17, %18, %cst_11 {dimension_numbers = #tpu.dot_dimension_numbers<[2], [2], [0], [0], [0, 1, 0, 0, 1, 0], [1], [1]>} : vector<16x4x8xf32>, vector<16x4x8xf32>, vector<4x16x16xf32> -> vector<4x16x16xf32>
    "tpu.trace_stop"() : () -> ()
    %cst_12 = arith.constant dense<0xFF800000> : vector<4x16xf32>
    %21 = vector.multi_reduction <maximumf>, %20, %cst_12 [2] : vector<4x16x16xf32> to vector<4x16xf32>
    %22 = vector.shape_cast %21 : vector<4x16xf32> to vector<4x16x1xf32>
    %23 = vector.broadcast %22 : vector<4x16x1xf32> to vector<4x16x16xf32>
    %24 = arith.subf %20, %23 : vector<4x16x16xf32>
    %25 = math.exp %24 : vector<4x16x16xf32>
    %cst_13 = arith.constant dense<0.000000e+00> : vector<4x16xf32>
    %26 = vector.multi_reduction <add>, %25, %cst_13 [2] : vector<4x16x16xf32> to vector<4x16xf32>
    %27 = vector.shape_cast %26 : vector<4x16xf32> to vector<4x16x1xf32>
    %28 = tpu.reciprocal %27 {approx = true} : vector<4x16x1xf32> -> vector<4x16x1xf32>
    %29 = vector.broadcast %28 : vector<4x16x1xf32> to vector<4x16x16xf32>
    %30 = arith.mulf %25, %29 : vector<4x16x16xf32>
    "tpu.trace_start"() <{level = 10 : i32, message = "hqk,khd->qhd"}> : () -> ()
    %cst_14 = arith.constant dense<0.000000e+00> : vector<4x8x16xf32>
    %31 = tpu.matmul %19, %30, %cst_14 {dimension_numbers = #tpu.dot_dimension_numbers<[0], [2], [2], [1], [0, 1, 0, 2, 1, 1], [1], [0]>} : vector<16x4x8xf32>, vector<4x16x16xf32>, vector<4x8x16xf32> -> vector<4x8x16xf32>
    %32 = tpu.transpose %31, [2, 0, 1] : vector<4x8x16xf32> -> vector<16x4x8xf32>
    "tpu.trace_stop"() : () -> ()
    %33 = vector.shape_cast %32 : vector<16x4x8xf32> to vector<16x32xf32>
    %cst_15 = arith.constant dense<0.000000e+00> : vector<16x32xf32>
    %34 = tpu.matmul %33, %13, %cst_15 {dimension_numbers = #tpu.dot_dimension_numbers<[1], [0], [0], [1], [0, 0, 1, 1], [], []>} : vector<16x32xf32>, vector<32x32xf32>, vector<16x32xf32> -> vector<16x32xf32>
    %35 = vector.broadcast %14 : vector<1x32xf32> to vector<16x32xf32>
    %36 = arith.addf %34, %35 : vector<16x32xf32>
    %37 = arith.addf %2, %36 : vector<16x32xf32>
    %38 = vector.extract_strided_slice %0 {offsets = [4, 0], sizes = [1, 32], strides = [1, 1]} : vector<43x128xf32> to vector<1x32xf32>
    %39 = vector.extract_strided_slice %0 {offsets = [5, 0], sizes = [1, 32], strides = [1, 1]} : vector<43x128xf32> to vector<1x32xf32>
    %cst_16 = arith.constant dense<0.000000e+00> : vector<16xf32>
    %40 = vector.multi_reduction <add>, %37, %cst_16 [1] : vector<16x32xf32> to vector<16xf32>
    %41 = vector.shape_cast %40 : vector<16xf32> to vector<16x1xf32>
    %cst_17 = arith.constant 3.200000e+01 : f32
    %42 = vector.broadcast %cst_17 : f32 to vector<16x1xf32>
    %43 = arith.divf %41, %42 : vector<16x1xf32>
    %44 = vector.broadcast %43 : vector<16x1xf32> to vector<16x32xf32>
    %45 = arith.subf %37, %44 : vector<16x32xf32>
    %46 = arith.mulf %45, %45 : vector<16x32xf32>
    %cst_18 = arith.constant dense<0.000000e+00> : vector<16xf32>
    %47 = vector.multi_reduction <add>, %46, %cst_18 [1] : vector<16x32xf32> to vector<16xf32>
    %48 = vector.shape_cast %47 : vector<16xf32> to vector<16x1xf32>
    %cst_19 = arith.constant 3.200000e+01 : f32
    %49 = vector.broadcast %cst_19 : f32 to vector<16x1xf32>
    %50 = arith.divf %48, %49 : vector<16x1xf32>
    %51 = vector.broadcast %43 : vector<16x1xf32> to vector<16x32xf32>
    %52 = arith.subf %37, %51 : vector<16x32xf32>
    %cst_20 = arith.constant 9.99999974E-6 : f32
    %53 = vector.broadcast %cst_20 : f32 to vector<16x1xf32>
    %54 = arith.addf %50, %53 : vector<16x1xf32>
    %55 = math.rsqrt %54 : vector<16x1xf32>
    %56 = vector.broadcast %55 : vector<16x1xf32> to vector<16x32xf32>
    %57 = arith.mulf %52, %56 : vector<16x32xf32>
    %58 = vector.broadcast %38 : vector<1x32xf32> to vector<16x32xf32>
    %59 = arith.mulf %57, %58 : vector<16x32xf32>
    %60 = vector.broadcast %39 : vector<1x32xf32> to vector<16x32xf32>
    %61 = arith.addf %59, %60 : vector<16x32xf32>
    %c0_21 = arith.constant 0 : index
    %c0_22 = arith.constant 0 : index
    %c0_23 = arith.constant 0 : index
    %62 = vector.load %arg5[%c0_21, %c0_22, %c0_23] : memref<4x32x64xf32, #tpu.memory_space<vmem>>, vector<1x32x64xf32>
    %63 = vector.shape_cast %62 : vector<1x32x64xf32> to vector<32x64xf32>
    %64 = vector.extract_strided_slice %0 {offsets = [2, 0], sizes = [1, 64], strides = [1, 1]} : vector<43x128xf32> to vector<1x64xf32>
    %c0_24 = arith.constant 0 : index
    %c0_25 = arith.constant 0 : index
    %c0_26 = arith.constant 0 : index
    %65 = vector.load %arg6[%c0_24, %c0_25, %c0_26] : memref<4x64x32xf32, #tpu.memory_space<vmem>>, vector<1x64x32xf32>
    %66 = vector.shape_cast %65 : vector<1x64x32xf32> to vector<64x32xf32>
    %67 = vector.extract_strided_slice %0 {offsets = [3, 0], sizes = [1, 32], strides = [1, 1]} : vector<43x128xf32> to vector<1x32xf32>
    %cst_27 = arith.constant dense<0.000000e+00> : vector<16x64xf32>
    %68 = tpu.matmul %61, %63, %cst_27 {dimension_numbers = #tpu.dot_dimension_numbers<[1], [0], [0], [1], [0, 0, 1, 1], [], []>} : vector<16x32xf32>, vector<32x64xf32>, vector<16x64xf32> -> vector<16x64xf32>
    %69 = vector.broadcast %64 : vector<1x64xf32> to vector<16x64xf32>
    %70 = arith.addf %68, %69 : vector<16x64xf32>
    %cst_28 = arith.constant 0.000000e+00 : f32
    %71 = vector.broadcast %cst_28 : f32 to vector<16x64xf32>
    %72 = arith.maximumf %70, %71 : vector<16x64xf32>
    %cst_29 = arith.constant dense<0.000000e+00> : vector<16x32xf32>
    %73 = tpu.matmul %72, %66, %cst_29 {dimension_numbers = #tpu.dot_dimension_numbers<[1], [0], [0], [1], [0, 0, 1, 1], [], []>} : vector<16x64xf32>, vector<64x32xf32>, vector<16x32xf32> -> vector<16x32xf32>
    %74 = vector.broadcast %67 : vector<1x32xf32> to vector<16x32xf32>
    %75 = arith.addf %73, %74 : vector<16x32xf32>
    %76 = arith.addf %61, %75 : vector<16x32xf32>
    %77 = vector.extract_strided_slice %0 {offsets = [6, 0], sizes = [1, 32], strides = [1, 1]} : vector<43x128xf32> to vector<1x32xf32>
    %78 = vector.extract_strided_slice %0 {offsets = [7, 0], sizes = [1, 32], strides = [1, 1]} : vector<43x128xf32> to vector<1x32xf32>
    %cst_30 = arith.constant dense<0.000000e+00> : vector<16xf32>
    %79 = vector.multi_reduction <add>, %76, %cst_30 [1] : vector<16x32xf32> to vector<16xf32>
    %80 = vector.shape_cast %79 : vector<16xf32> to vector<16x1xf32>
    %cst_31 = arith.constant 3.200000e+01 : f32
    %81 = vector.broadcast %cst_31 : f32 to vector<16x1xf32>
    %82 = arith.divf %80, %81 : vector<16x1xf32>
    %83 = vector.broadcast %82 : vector<16x1xf32> to vector<16x32xf32>
    %84 = arith.subf %76, %83 : vector<16x32xf32>
    %85 = arith.mulf %84, %84 : vector<16x32xf32>
    %cst_32 = arith.constant dense<0.000000e+00> : vector<16xf32>
    %86 = vector.multi_reduction <add>, %85, %cst_32 [1] : vector<16x32xf32> to vector<16xf32>
    %87 = vector.shape_cast %86 : vector<16xf32> to vector<16x1xf32>
    %cst_33 = arith.constant 3.200000e+01 : f32
    %88 = vector.broadcast %cst_33 : f32 to vector<16x1xf32>
    %89 = arith.divf %87, %88 : vector<16x1xf32>
    %90 = vector.broadcast %82 : vector<16x1xf32> to vector<16x32xf32>
    %91 = arith.subf %76, %90 : vector<16x32xf32>
    %cst_34 = arith.constant 9.99999974E-6 : f32
    %92 = vector.broadcast %cst_34 : f32 to vector<16x1xf32>
    %93 = arith.addf %89, %92 : vector<16x1xf32>
    %94 = math.rsqrt %93 : vector<16x1xf32>
    %95 = vector.broadcast %94 : vector<16x1xf32> to vector<16x32xf32>
    %96 = arith.mulf %91, %95 : vector<16x32xf32>
    %97 = vector.broadcast %77 : vector<1x32xf32> to vector<16x32xf32>
    %98 = arith.mulf %96, %97 : vector<16x32xf32>
    %99 = vector.broadcast %78 : vector<1x32xf32> to vector<16x32xf32>
    %100 = arith.addf %98, %99 : vector<16x32xf32>
    %c1 = arith.constant 1 : index
    %c0_35 = arith.constant 0 : index
    %c0_36 = arith.constant 0 : index
    %101 = vector.load %arg3[%c1, %c0_35, %c0_36] : memref<4x32x96xf32, #tpu.memory_space<vmem>>, vector<1x32x96xf32>
    %102 = vector.shape_cast %101 : vector<1x32x96xf32> to vector<32x96xf32>
    %cst_37 = arith.constant dense<0.000000e+00> : vector<16x96xf32>
    %103 = tpu.matmul %100, %102, %cst_37 {dimension_numbers = #tpu.dot_dimension_numbers<[1], [0], [0], [1], [0, 0, 1, 1], [], []>} : vector<16x32xf32>, vector<32x96xf32>, vector<16x96xf32> -> vector<16x96xf32>
    %104 = vector.extract_strided_slice %0 {offsets = [8, 0], sizes = [1, 96], strides = [1, 1]} : vector<43x128xf32> to vector<1x96xf32>
    %105 = vector.broadcast %104 : vector<1x96xf32> to vector<16x96xf32>
    %106 = arith.addf %103, %105 : vector<16x96xf32>
    %107 = vector.extract_strided_slice %106 {offsets = [0, 0], sizes = [16, 32], strides = [1, 1]} : vector<16x96xf32> to vector<16x32xf32>
    %108 = vector.extract_strided_slice %106 {offsets = [0, 32], sizes = [16, 32], strides = [1, 1]} : vector<16x96xf32> to vector<16x32xf32>
    %109 = vector.extract_strided_slice %106 {offsets = [0, 64], sizes = [16, 32], strides = [1, 1]} : vector<16x96xf32> to vector<16x32xf32>
    %c1_38 = arith.constant 1 : index
    %c0_39 = arith.constant 0 : index
    %c0_40 = arith.constant 0 : index
    %110 = vector.load %arg4[%c1_38, %c0_39, %c0_40] : memref<8x32x32xf32, #tpu.memory_space<vmem>>, vector<1x32x32xf32>
    %111 = vector.shape_cast %110 : vector<1x32x32xf32> to vector<32x32xf32>
    %112 = vector.extract_strided_slice %0 {offsets = [9, 0], sizes = [1, 32], strides = [1, 1]} : vector<43x128xf32> to vector<1x32xf32>
    %113 = vector.shape_cast %107 : vector<16x32xf32> to vector<16x4x8xf32>
    %cst_41 = arith.constant 0.353553385 : f32
    %114 = vector.broadcast %cst_41 : f32 to vector<16x4x8xf32>
    %115 = arith.mulf %113, %114 : vector<16x4x8xf32>
    %116 = vector.shape_cast %108 : vector<16x32xf32> to vector<16x4x8xf32>
    %117 = vector.shape_cast %109 : vector<16x32xf32> to vector<16x4x8xf32>
    "tpu.trace_start"() <{level = 10 : i32, message = "qhd,khd->hqk"}> : () -> ()
    %cst_42 = arith.constant dense<0.000000e+00> : vector<4x16x16xf32>
    %118 = tpu.matmul %115, %116, %cst_42 {dimension_numbers = #tpu.dot_dimension_numbers<[2], [2], [0], [0], [0, 1, 0, 0, 1, 0], [1], [1]>} : vector<16x4x8xf32>, vector<16x4x8xf32>, vector<4x16x16xf32> -> vector<4x16x16xf32>
    "tpu.trace_stop"() : () -> ()
    %cst_43 = arith.constant dense<0xFF800000> : vector<4x16xf32>
    %119 = vector.multi_reduction <maximumf>, %118, %cst_43 [2] : vector<4x16x16xf32> to vector<4x16xf32>
    %120 = vector.shape_cast %119 : vector<4x16xf32> to vector<4x16x1xf32>
    %121 = vector.broadcast %120 : vector<4x16x1xf32> to vector<4x16x16xf32>
    %122 = arith.subf %118, %121 : vector<4x16x16xf32>
    %123 = math.exp %122 : vector<4x16x16xf32>
    %cst_44 = arith.constant dense<0.000000e+00> : vector<4x16xf32>
    %124 = vector.multi_reduction <add>, %123, %cst_44 [2] : vector<4x16x16xf32> to vector<4x16xf32>
    %125 = vector.shape_cast %124 : vector<4x16xf32> to vector<4x16x1xf32>
    %126 = tpu.reciprocal %125 {approx = true} : vector<4x16x1xf32> -> vector<4x16x1xf32>
    %127 = vector.broadcast %126 : vector<4x16x1xf32> to vector<4x16x16xf32>
    %128 = arith.mulf %123, %127 : vector<4x16x16xf32>
    "tpu.trace_start"() <{level = 10 : i32, message = "hqk,khd->qhd"}> : () -> ()
    %cst_45 = arith.constant dense<0.000000e+00> : vector<4x8x16xf32>
    %129 = tpu.matmul %117, %128, %cst_45 {dimension_numbers = #tpu.dot_dimension_numbers<[0], [2], [2], [1], [0, 1, 0, 2, 1, 1], [1], [0]>} : vector<16x4x8xf32>, vector<4x16x16xf32>, vector<4x8x16xf32> -> vector<4x8x16xf32>
    %130 = tpu.transpose %129, [2, 0, 1] : vector<4x8x16xf32> -> vector<16x4x8xf32>
    "tpu.trace_stop"() : () -> ()
    %131 = vector.shape_cast %130 : vector<16x4x8xf32> to vector<16x32xf32>
    %cst_46 = arith.constant dense<0.000000e+00> : vector<16x32xf32>
    %132 = tpu.matmul %131, %111, %cst_46 {dimension_numbers = #tpu.dot_dimension_numbers<[1], [0], [0], [1], [0, 0, 1, 1], [], []>} : vector<16x32xf32>, vector<32x32xf32>, vector<16x32xf32> -> vector<16x32xf32>
    %133 = vector.broadcast %112 : vector<1x32xf32> to vector<16x32xf32>
    %134 = arith.addf %132, %133 : vector<16x32xf32>
    %135 = arith.addf %100, %134 : vector<16x32xf32>
    %136 = vector.extract_strided_slice %0 {offsets = [12, 0], sizes = [1, 32], strides = [1, 1]} : vector<43x128xf32> to vector<1x32xf32>
    %137 = vector.extract_strided_slice %0 {offsets = [13, 0], sizes = [1, 32], strides = [1, 1]} : vector<43x128xf32> to vector<1x32xf32>
    %cst_47 = arith.constant dense<0.000000e+00> : vector<16xf32>
    %138 = vector.multi_reduction <add>, %135, %cst_47 [1] : vector<16x32xf32> to vector<16xf32>
    %139 = vector.shape_cast %138 : vector<16xf32> to vector<16x1xf32>
    %cst_48 = arith.constant 3.200000e+01 : f32
    %140 = vector.broadcast %cst_48 : f32 to vector<16x1xf32>
    %141 = arith.divf %139, %140 : vector<16x1xf32>
    %142 = vector.broadcast %141 : vector<16x1xf32> to vector<16x32xf32>
    %143 = arith.subf %135, %142 : vector<16x32xf32>
    %144 = arith.mulf %143, %143 : vector<16x32xf32>
    %cst_49 = arith.constant dense<0.000000e+00> : vector<16xf32>
    %145 = vector.multi_reduction <add>, %144, %cst_49 [1] : vector<16x32xf32> to vector<16xf32>
    %146 = vector.shape_cast %145 : vector<16xf32> to vector<16x1xf32>
    %cst_50 = arith.constant 3.200000e+01 : f32
    %147 = vector.broadcast %cst_50 : f32 to vector<16x1xf32>
    %148 = arith.divf %146, %147 : vector<16x1xf32>
    %149 = vector.broadcast %141 : vector<16x1xf32> to vector<16x32xf32>
    %150 = arith.subf %135, %149 : vector<16x32xf32>
    %cst_51 = arith.constant 9.99999974E-6 : f32
    %151 = vector.broadcast %cst_51 : f32 to vector<16x1xf32>
    %152 = arith.addf %148, %151 : vector<16x1xf32>
    %153 = math.rsqrt %152 : vector<16x1xf32>
    %154 = vector.broadcast %153 : vector<16x1xf32> to vector<16x32xf32>
    %155 = arith.mulf %150, %154 : vector<16x32xf32>
    %156 = vector.broadcast %136 : vector<1x32xf32> to vector<16x32xf32>
    %157 = arith.mulf %155, %156 : vector<16x32xf32>
    %158 = vector.broadcast %137 : vector<1x32xf32> to vector<16x32xf32>
    %159 = arith.addf %157, %158 : vector<16x32xf32>
    %c1_52 = arith.constant 1 : index
    %c0_53 = arith.constant 0 : index
    %c0_54 = arith.constant 0 : index
    %160 = vector.load %arg5[%c1_52, %c0_53, %c0_54] : memref<4x32x64xf32, #tpu.memory_space<vmem>>, vector<1x32x64xf32>
    %161 = vector.shape_cast %160 : vector<1x32x64xf32> to vector<32x64xf32>
    %162 = vector.extract_strided_slice %0 {offsets = [10, 0], sizes = [1, 64], strides = [1, 1]} : vector<43x128xf32> to vector<1x64xf32>
    %c1_55 = arith.constant 1 : index
    %c0_56 = arith.constant 0 : index
    %c0_57 = arith.constant 0 : index
    %163 = vector.load %arg6[%c1_55, %c0_56, %c0_57] : memref<4x64x32xf32, #tpu.memory_space<vmem>>, vector<1x64x32xf32>
    %164 = vector.shape_cast %163 : vector<1x64x32xf32> to vector<64x32xf32>
    %165 = vector.extract_strided_slice %0 {offsets = [11, 0], sizes = [1, 32], strides = [1, 1]} : vector<43x128xf32> to vector<1x32xf32>
    %cst_58 = arith.constant dense<0.000000e+00> : vector<16x64xf32>
    %166 = tpu.matmul %159, %161, %cst_58 {dimension_numbers = #tpu.dot_dimension_numbers<[1], [0], [0], [1], [0, 0, 1, 1], [], []>} : vector<16x32xf32>, vector<32x64xf32>, vector<16x64xf32> -> vector<16x64xf32>
    %167 = vector.broadcast %162 : vector<1x64xf32> to vector<16x64xf32>
    %168 = arith.addf %166, %167 : vector<16x64xf32>
    %cst_59 = arith.constant 0.000000e+00 : f32
    %169 = vector.broadcast %cst_59 : f32 to vector<16x64xf32>
    %170 = arith.maximumf %168, %169 : vector<16x64xf32>
    %cst_60 = arith.constant dense<0.000000e+00> : vector<16x32xf32>
    %171 = tpu.matmul %170, %164, %cst_60 {dimension_numbers = #tpu.dot_dimension_numbers<[1], [0], [0], [1], [0, 0, 1, 1], [], []>} : vector<16x64xf32>, vector<64x32xf32>, vector<16x32xf32> -> vector<16x32xf32>
    %172 = vector.broadcast %165 : vector<1x32xf32> to vector<16x32xf32>
    %173 = arith.addf %171, %172 : vector<16x32xf32>
    %174 = arith.addf %159, %173 : vector<16x32xf32>
    %175 = vector.extract_strided_slice %0 {offsets = [14, 0], sizes = [1, 32], strides = [1, 1]} : vector<43x128xf32> to vector<1x32xf32>
    %176 = vector.extract_strided_slice %0 {offsets = [15, 0], sizes = [1, 32], strides = [1, 1]} : vector<43x128xf32> to vector<1x32xf32>
    %cst_61 = arith.constant dense<0.000000e+00> : vector<16xf32>
    %177 = vector.multi_reduction <add>, %174, %cst_61 [1] : vector<16x32xf32> to vector<16xf32>
    %178 = vector.shape_cast %177 : vector<16xf32> to vector<16x1xf32>
    %cst_62 = arith.constant 3.200000e+01 : f32
    %179 = vector.broadcast %cst_62 : f32 to vector<16x1xf32>
    %180 = arith.divf %178, %179 : vector<16x1xf32>
    %181 = vector.broadcast %180 : vector<16x1xf32> to vector<16x32xf32>
    %182 = arith.subf %174, %181 : vector<16x32xf32>
    %183 = arith.mulf %182, %182 : vector<16x32xf32>
    %cst_63 = arith.constant dense<0.000000e+00> : vector<16xf32>
    %184 = vector.multi_reduction <add>, %183, %cst_63 [1] : vector<16x32xf32> to vector<16xf32>
    %185 = vector.shape_cast %184 : vector<16xf32> to vector<16x1xf32>
    %cst_64 = arith.constant 3.200000e+01 : f32
    %186 = vector.broadcast %cst_64 : f32 to vector<16x1xf32>
    %187 = arith.divf %185, %186 : vector<16x1xf32>
    %188 = vector.broadcast %180 : vector<16x1xf32> to vector<16x32xf32>
    %189 = arith.subf %174, %188 : vector<16x32xf32>
    %cst_65 = arith.constant 9.99999974E-6 : f32
    %190 = vector.broadcast %cst_65 : f32 to vector<16x1xf32>
    %191 = arith.addf %187, %190 : vector<16x1xf32>
    %192 = math.rsqrt %191 : vector<16x1xf32>
    %193 = vector.broadcast %192 : vector<16x1xf32> to vector<16x32xf32>
    %194 = arith.mulf %189, %193 : vector<16x32xf32>
    %195 = vector.broadcast %175 : vector<1x32xf32> to vector<16x32xf32>
    %196 = arith.mulf %194, %195 : vector<16x32xf32>
    %197 = vector.broadcast %176 : vector<1x32xf32> to vector<16x32xf32>
    %198 = arith.addf %196, %197 : vector<16x32xf32>
    %c0_66 = arith.constant 0 : index
    %c0_67 = arith.constant 0 : index
    %199 = vector.load %arg7[%c0_66, %c0_67] : memref<32x128xf32, #tpu.memory_space<vmem>>, vector<32x128xf32>
    %cst_68 = arith.constant dense<0.000000e+00> : vector<16x128xf32>
    %200 = tpu.matmul %198, %199, %cst_68 {dimension_numbers = #tpu.dot_dimension_numbers<[1], [0], [0], [1], [0, 0, 1, 1], [], []>} : vector<16x32xf32>, vector<32x128xf32>, vector<16x128xf32> -> vector<16x128xf32>
    %201 = vector.extract_strided_slice %0 {offsets = [40, 0], sizes = [1, 128], strides = [1, 1]} : vector<43x128xf32> to vector<1x128xf32>
    %202 = vector.broadcast %201 : vector<1x128xf32> to vector<16x128xf32>
    %203 = arith.addf %200, %202 : vector<16x128xf32>
    %c0_69 = arith.constant 0 : index
    %c0_70 = arith.constant 0 : index
    %c0_71 = arith.constant 0 : index
    %204 = vector.load %arg2[%c0_69, %c0_70, %c0_71] : memref<1x8x32xf32, #tpu.memory_space<vmem>>, vector<1x8x32xf32>
    %205 = vector.shape_cast %204 : vector<1x8x32xf32> to vector<8x32xf32>
    %c2 = arith.constant 2 : index
    %c0_72 = arith.constant 0 : index
    %c0_73 = arith.constant 0 : index
    %206 = vector.load %arg3[%c2, %c0_72, %c0_73] : memref<4x32x96xf32, #tpu.memory_space<vmem>>, vector<1x32x96xf32>
    %207 = vector.shape_cast %206 : vector<1x32x96xf32> to vector<32x96xf32>
    %cst_74 = arith.constant dense<0.000000e+00> : vector<8x96xf32>
    %208 = tpu.matmul %205, %207, %cst_74 {dimension_numbers = #tpu.dot_dimension_numbers<[1], [0], [0], [1], [0, 0, 1, 1], [], []>} : vector<8x32xf32>, vector<32x96xf32>, vector<8x96xf32> -> vector<8x96xf32>
    %209 = vector.extract_strided_slice %0 {offsets = [16, 0], sizes = [1, 96], strides = [1, 1]} : vector<43x128xf32> to vector<1x96xf32>
    %210 = vector.broadcast %209 : vector<1x96xf32> to vector<8x96xf32>
    %211 = arith.addf %208, %210 : vector<8x96xf32>
    %212 = vector.extract_strided_slice %211 {offsets = [0, 0], sizes = [8, 32], strides = [1, 1]} : vector<8x96xf32> to vector<8x32xf32>
    %213 = vector.extract_strided_slice %211 {offsets = [0, 32], sizes = [8, 32], strides = [1, 1]} : vector<8x96xf32> to vector<8x32xf32>
    %214 = vector.extract_strided_slice %211 {offsets = [0, 64], sizes = [8, 32], strides = [1, 1]} : vector<8x96xf32> to vector<8x32xf32>
    %c2_75 = arith.constant 2 : index
    %c0_76 = arith.constant 0 : index
    %c0_77 = arith.constant 0 : index
    %215 = vector.load %arg4[%c2_75, %c0_76, %c0_77] : memref<8x32x32xf32, #tpu.memory_space<vmem>>, vector<1x32x32xf32>
    %216 = vector.shape_cast %215 : vector<1x32x32xf32> to vector<32x32xf32>
    %217 = vector.extract_strided_slice %0 {offsets = [17, 0], sizes = [1, 32], strides = [1, 1]} : vector<43x128xf32> to vector<1x32xf32>
    %218 = vector.shape_cast %212 : vector<8x32xf32> to vector<8x4x8xf32>
    %cst_78 = arith.constant 0.353553385 : f32
    %219 = vector.broadcast %cst_78 : f32 to vector<8x4x8xf32>
    %220 = arith.mulf %218, %219 : vector<8x4x8xf32>
    %221 = vector.shape_cast %213 : vector<8x32xf32> to vector<8x4x8xf32>
    %222 = vector.shape_cast %214 : vector<8x32xf32> to vector<8x4x8xf32>
    "tpu.trace_start"() <{level = 10 : i32, message = "qhd,khd->hqk"}> : () -> ()
    %cst_79 = arith.constant dense<0.000000e+00> : vector<4x8x8xf32>
    %223 = tpu.matmul %220, %221, %cst_79 {dimension_numbers = #tpu.dot_dimension_numbers<[2], [2], [0], [0], [0, 1, 0, 0, 1, 0], [1], [1]>} : vector<8x4x8xf32>, vector<8x4x8xf32>, vector<4x8x8xf32> -> vector<4x8x8xf32>
    "tpu.trace_stop"() : () -> ()
    %cst_80 = arith.constant dense<0xFF800000> : vector<4x8xf32>
    %224 = vector.multi_reduction <maximumf>, %223, %cst_80 [2] : vector<4x8x8xf32> to vector<4x8xf32>
    %225 = vector.shape_cast %224 : vector<4x8xf32> to vector<4x8x1xf32>
    %226 = vector.broadcast %225 : vector<4x8x1xf32> to vector<4x8x8xf32>
    %227 = arith.subf %223, %226 : vector<4x8x8xf32>
    %228 = math.exp %227 : vector<4x8x8xf32>
    %cst_81 = arith.constant dense<0.000000e+00> : vector<4x8xf32>
    %229 = vector.multi_reduction <add>, %228, %cst_81 [2] : vector<4x8x8xf32> to vector<4x8xf32>
    %230 = vector.shape_cast %229 : vector<4x8xf32> to vector<4x8x1xf32>
    %231 = tpu.reciprocal %230 {approx = true} : vector<4x8x1xf32> -> vector<4x8x1xf32>
    %232 = vector.broadcast %231 : vector<4x8x1xf32> to vector<4x8x8xf32>
    %233 = arith.mulf %228, %232 : vector<4x8x8xf32>
    "tpu.trace_start"() <{level = 10 : i32, message = "hqk,khd->qhd"}> : () -> ()
    %cst_82 = arith.constant dense<0.000000e+00> : vector<4x8x8xf32>
    %234 = tpu.matmul %222, %233, %cst_82 {dimension_numbers = #tpu.dot_dimension_numbers<[0], [2], [2], [1], [0, 1, 0, 2, 1, 1], [1], [0]>} : vector<8x4x8xf32>, vector<4x8x8xf32>, vector<4x8x8xf32> -> vector<4x8x8xf32>
    %235 = tpu.transpose %234, [2, 0, 1] : vector<4x8x8xf32> -> vector<8x4x8xf32>
    "tpu.trace_stop"() : () -> ()
    %236 = vector.shape_cast %235 : vector<8x4x8xf32> to vector<8x32xf32>
    %cst_83 = arith.constant dense<0.000000e+00> : vector<8x32xf32>
    %237 = tpu.matmul %236, %216, %cst_83 {dimension_numbers = #tpu.dot_dimension_numbers<[1], [0], [0], [1], [0, 0, 1, 1], [], []>} : vector<8x32xf32>, vector<32x32xf32>, vector<8x32xf32> -> vector<8x32xf32>
    %238 = vector.broadcast %217 : vector<1x32xf32> to vector<8x32xf32>
    %239 = arith.addf %237, %238 : vector<8x32xf32>
    %240 = arith.addf %205, %239 : vector<8x32xf32>
    %241 = vector.extract_strided_slice %0 {offsets = [22, 0], sizes = [1, 32], strides = [1, 1]} : vector<43x128xf32> to vector<1x32xf32>
    %242 = vector.extract_strided_slice %0 {offsets = [23, 0], sizes = [1, 32], strides = [1, 1]} : vector<43x128xf32> to vector<1x32xf32>
    %cst_84 = arith.constant dense<0.000000e+00> : vector<8xf32>
    %243 = vector.multi_reduction <add>, %240, %cst_84 [1] : vector<8x32xf32> to vector<8xf32>
    %244 = vector.shape_cast %243 : vector<8xf32> to vector<8x1xf32>
    %cst_85 = arith.constant 3.200000e+01 : f32
    %245 = vector.broadcast %cst_85 : f32 to vector<8x1xf32>
    %246 = arith.divf %244, %245 : vector<8x1xf32>
    %247 = vector.broadcast %246 : vector<8x1xf32> to vector<8x32xf32>
    %248 = arith.subf %240, %247 : vector<8x32xf32>
    %249 = arith.mulf %248, %248 : vector<8x32xf32>
    %cst_86 = arith.constant dense<0.000000e+00> : vector<8xf32>
    %250 = vector.multi_reduction <add>, %249, %cst_86 [1] : vector<8x32xf32> to vector<8xf32>
    %251 = vector.shape_cast %250 : vector<8xf32> to vector<8x1xf32>
    %cst_87 = arith.constant 3.200000e+01 : f32
    %252 = vector.broadcast %cst_87 : f32 to vector<8x1xf32>
    %253 = arith.divf %251, %252 : vector<8x1xf32>
    %254 = vector.broadcast %246 : vector<8x1xf32> to vector<8x32xf32>
    %255 = arith.subf %240, %254 : vector<8x32xf32>
    %cst_88 = arith.constant 9.99999974E-6 : f32
    %256 = vector.broadcast %cst_88 : f32 to vector<8x1xf32>
    %257 = arith.addf %253, %256 : vector<8x1xf32>
    %258 = math.rsqrt %257 : vector<8x1xf32>
    %259 = vector.broadcast %258 : vector<8x1xf32> to vector<8x32xf32>
    %260 = arith.mulf %255, %259 : vector<8x32xf32>
    %261 = vector.broadcast %241 : vector<1x32xf32> to vector<8x32xf32>
    %262 = arith.mulf %260, %261 : vector<8x32xf32>
    %263 = vector.broadcast %242 : vector<1x32xf32> to vector<8x32xf32>
    %264 = arith.addf %262, %263 : vector<8x32xf32>
    %c6 = arith.constant 6 : index
    %c0_89 = arith.constant 0 : index
    %c0_90 = arith.constant 0 : index
    %265 = vector.load %arg4[%c6, %c0_89, %c0_90] : memref<8x32x32xf32, #tpu.memory_space<vmem>>, vector<1x32x32xf32>
    %266 = vector.shape_cast %265 : vector<1x32x32xf32> to vector<32x32xf32>
    %cst_91 = arith.constant dense<0.000000e+00> : vector<8x32xf32>
    %267 = tpu.matmul %264, %266, %cst_91 {dimension_numbers = #tpu.dot_dimension_numbers<[1], [0], [0], [1], [0, 0, 1, 1], [], []>} : vector<8x32xf32>, vector<32x32xf32>, vector<8x32xf32> -> vector<8x32xf32>
    %268 = vector.extract_strided_slice %0 {offsets = [18, 0], sizes = [1, 32], strides = [1, 1]} : vector<43x128xf32> to vector<1x32xf32>
    %269 = vector.broadcast %268 : vector<1x32xf32> to vector<8x32xf32>
    %270 = arith.addf %267, %269 : vector<8x32xf32>
    %271 = vector.extract_strided_slice %203 {offsets = [0, 0], sizes = [16, 32], strides = [1, 1]} : vector<16x128xf32> to vector<16x32xf32>
    %272 = vector.extract_strided_slice %203 {offsets = [0, 32], sizes = [16, 32], strides = [1, 1]} : vector<16x128xf32> to vector<16x32xf32>
    %c4 = arith.constant 4 : index
    %c0_92 = arith.constant 0 : index
    %c0_93 = arith.constant 0 : index
    %273 = vector.load %arg4[%c4, %c0_92, %c0_93] : memref<8x32x32xf32, #tpu.memory_space<vmem>>, vector<1x32x32xf32>
    %274 = vector.shape_cast %273 : vector<1x32x32xf32> to vector<32x32xf32>
    %275 = vector.extract_strided_slice %0 {offsets = [19, 0], sizes = [1, 32], strides = [1, 1]} : vector<43x128xf32> to vector<1x32xf32>
    %276 = vector.shape_cast %270 : vector<8x32xf32> to vector<8x4x8xf32>
    %cst_94 = arith.constant 0.353553385 : f32
    %277 = vector.broadcast %cst_94 : f32 to vector<8x4x8xf32>
    %278 = arith.mulf %276, %277 : vector<8x4x8xf32>
    %279 = vector.shape_cast %271 : vector<16x32xf32> to vector<16x4x8xf32>
    %280 = vector.shape_cast %272 : vector<16x32xf32> to vector<16x4x8xf32>
    "tpu.trace_start"() <{level = 10 : i32, message = "qhd,khd->hqk"}> : () -> ()
    %cst_95 = arith.constant dense<0.000000e+00> : vector<4x8x16xf32>
    %281 = tpu.matmul %278, %279, %cst_95 {dimension_numbers = #tpu.dot_dimension_numbers<[2], [2], [0], [0], [0, 1, 0, 0, 1, 0], [1], [1]>} : vector<8x4x8xf32>, vector<16x4x8xf32>, vector<4x8x16xf32> -> vector<4x8x16xf32>
    "tpu.trace_stop"() : () -> ()
    %cst_96 = arith.constant dense<0xFF800000> : vector<4x8xf32>
    %282 = vector.multi_reduction <maximumf>, %281, %cst_96 [2] : vector<4x8x16xf32> to vector<4x8xf32>
    %283 = vector.shape_cast %282 : vector<4x8xf32> to vector<4x8x1xf32>
    %284 = vector.broadcast %283 : vector<4x8x1xf32> to vector<4x8x16xf32>
    %285 = arith.subf %281, %284 : vector<4x8x16xf32>
    %286 = math.exp %285 : vector<4x8x16xf32>
    %cst_97 = arith.constant dense<0.000000e+00> : vector<4x8xf32>
    %287 = vector.multi_reduction <add>, %286, %cst_97 [2] : vector<4x8x16xf32> to vector<4x8xf32>
    %288 = vector.shape_cast %287 : vector<4x8xf32> to vector<4x8x1xf32>
    %289 = tpu.reciprocal %288 {approx = true} : vector<4x8x1xf32> -> vector<4x8x1xf32>
    %290 = vector.broadcast %289 : vector<4x8x1xf32> to vector<4x8x16xf32>
    %291 = arith.mulf %286, %290 : vector<4x8x16xf32>
    "tpu.trace_start"() <{level = 10 : i32, message = "hqk,khd->qhd"}> : () -> ()
    %cst_98 = arith.constant dense<0.000000e+00> : vector<4x8x8xf32>
    %292 = tpu.matmul %280, %291, %cst_98 {dimension_numbers = #tpu.dot_dimension_numbers<[0], [2], [2], [1], [0, 1, 0, 2, 1, 1], [1], [0]>} : vector<16x4x8xf32>, vector<4x8x16xf32>, vector<4x8x8xf32> -> vector<4x8x8xf32>
    %293 = tpu.transpose %292, [2, 0, 1] : vector<4x8x8xf32> -> vector<8x4x8xf32>
    "tpu.trace_stop"() : () -> ()
    %294 = vector.shape_cast %293 : vector<8x4x8xf32> to vector<8x32xf32>
    %cst_99 = arith.constant dense<0.000000e+00> : vector<8x32xf32>
    %295 = tpu.matmul %294, %274, %cst_99 {dimension_numbers = #tpu.dot_dimension_numbers<[1], [0], [0], [1], [0, 0, 1, 1], [], []>} : vector<8x32xf32>, vector<32x32xf32>, vector<8x32xf32> -> vector<8x32xf32>
    %296 = vector.broadcast %275 : vector<1x32xf32> to vector<8x32xf32>
    %297 = arith.addf %295, %296 : vector<8x32xf32>
    %298 = arith.addf %264, %297 : vector<8x32xf32>
    %299 = vector.extract_strided_slice %0 {offsets = [24, 0], sizes = [1, 32], strides = [1, 1]} : vector<43x128xf32> to vector<1x32xf32>
    %300 = vector.extract_strided_slice %0 {offsets = [25, 0], sizes = [1, 32], strides = [1, 1]} : vector<43x128xf32> to vector<1x32xf32>
    %cst_100 = arith.constant dense<0.000000e+00> : vector<8xf32>
    %301 = vector.multi_reduction <add>, %298, %cst_100 [1] : vector<8x32xf32> to vector<8xf32>
    %302 = vector.shape_cast %301 : vector<8xf32> to vector<8x1xf32>
    %cst_101 = arith.constant 3.200000e+01 : f32
    %303 = vector.broadcast %cst_101 : f32 to vector<8x1xf32>
    %304 = arith.divf %302, %303 : vector<8x1xf32>
    %305 = vector.broadcast %304 : vector<8x1xf32> to vector<8x32xf32>
    %306 = arith.subf %298, %305 : vector<8x32xf32>
    %307 = arith.mulf %306, %306 : vector<8x32xf32>
    %cst_102 = arith.constant dense<0.000000e+00> : vector<8xf32>
    %308 = vector.multi_reduction <add>, %307, %cst_102 [1] : vector<8x32xf32> to vector<8xf32>
    %309 = vector.shape_cast %308 : vector<8xf32> to vector<8x1xf32>
    %cst_103 = arith.constant 3.200000e+01 : f32
    %310 = vector.broadcast %cst_103 : f32 to vector<8x1xf32>
    %311 = arith.divf %309, %310 : vector<8x1xf32>
    %312 = vector.broadcast %304 : vector<8x1xf32> to vector<8x32xf32>
    %313 = arith.subf %298, %312 : vector<8x32xf32>
    %cst_104 = arith.constant 9.99999974E-6 : f32
    %314 = vector.broadcast %cst_104 : f32 to vector<8x1xf32>
    %315 = arith.addf %311, %314 : vector<8x1xf32>
    %316 = math.rsqrt %315 : vector<8x1xf32>
    %317 = vector.broadcast %316 : vector<8x1xf32> to vector<8x32xf32>
    %318 = arith.mulf %313, %317 : vector<8x32xf32>
    %319 = vector.broadcast %299 : vector<1x32xf32> to vector<8x32xf32>
    %320 = arith.mulf %318, %319 : vector<8x32xf32>
    %321 = vector.broadcast %300 : vector<1x32xf32> to vector<8x32xf32>
    %322 = arith.addf %320, %321 : vector<8x32xf32>
    %c2_105 = arith.constant 2 : index
    %c0_106 = arith.constant 0 : index
    %c0_107 = arith.constant 0 : index
    %323 = vector.load %arg5[%c2_105, %c0_106, %c0_107] : memref<4x32x64xf32, #tpu.memory_space<vmem>>, vector<1x32x64xf32>
    %324 = vector.shape_cast %323 : vector<1x32x64xf32> to vector<32x64xf32>
    %325 = vector.extract_strided_slice %0 {offsets = [20, 0], sizes = [1, 64], strides = [1, 1]} : vector<43x128xf32> to vector<1x64xf32>
    %c2_108 = arith.constant 2 : index
    %c0_109 = arith.constant 0 : index
    %c0_110 = arith.constant 0 : index
    %326 = vector.load %arg6[%c2_108, %c0_109, %c0_110] : memref<4x64x32xf32, #tpu.memory_space<vmem>>, vector<1x64x32xf32>
    %327 = vector.shape_cast %326 : vector<1x64x32xf32> to vector<64x32xf32>
    %328 = vector.extract_strided_slice %0 {offsets = [21, 0], sizes = [1, 32], strides = [1, 1]} : vector<43x128xf32> to vector<1x32xf32>
    %cst_111 = arith.constant dense<0.000000e+00> : vector<8x64xf32>
    %329 = tpu.matmul %322, %324, %cst_111 {dimension_numbers = #tpu.dot_dimension_numbers<[1], [0], [0], [1], [0, 0, 1, 1], [], []>} : vector<8x32xf32>, vector<32x64xf32>, vector<8x64xf32> -> vector<8x64xf32>
    %330 = vector.broadcast %325 : vector<1x64xf32> to vector<8x64xf32>
    %331 = arith.addf %329, %330 : vector<8x64xf32>
    %cst_112 = arith.constant 0.000000e+00 : f32
    %332 = vector.broadcast %cst_112 : f32 to vector<8x64xf32>
    %333 = arith.maximumf %331, %332 : vector<8x64xf32>
    %cst_113 = arith.constant dense<0.000000e+00> : vector<8x32xf32>
    %334 = tpu.matmul %333, %327, %cst_113 {dimension_numbers = #tpu.dot_dimension_numbers<[1], [0], [0], [1], [0, 0, 1, 1], [], []>} : vector<8x64xf32>, vector<64x32xf32>, vector<8x32xf32> -> vector<8x32xf32>
    %335 = vector.broadcast %328 : vector<1x32xf32> to vector<8x32xf32>
    %336 = arith.addf %334, %335 : vector<8x32xf32>
    %337 = arith.addf %322, %336 : vector<8x32xf32>
    %338 = vector.extract_strided_slice %0 {offsets = [26, 0], sizes = [1, 32], strides = [1, 1]} : vector<43x128xf32> to vector<1x32xf32>
    %339 = vector.extract_strided_slice %0 {offsets = [27, 0], sizes = [1, 32], strides = [1, 1]} : vector<43x128xf32> to vector<1x32xf32>
    %cst_114 = arith.constant dense<0.000000e+00> : vector<8xf32>
    %340 = vector.multi_reduction <add>, %337, %cst_114 [1] : vector<8x32xf32> to vector<8xf32>
    %341 = vector.shape_cast %340 : vector<8xf32> to vector<8x1xf32>
    %cst_115 = arith.constant 3.200000e+01 : f32
    %342 = vector.broadcast %cst_115 : f32 to vector<8x1xf32>
    %343 = arith.divf %341, %342 : vector<8x1xf32>
    %344 = vector.broadcast %343 : vector<8x1xf32> to vector<8x32xf32>
    %345 = arith.subf %337, %344 : vector<8x32xf32>
    %346 = arith.mulf %345, %345 : vector<8x32xf32>
    %cst_116 = arith.constant dense<0.000000e+00> : vector<8xf32>
    %347 = vector.multi_reduction <add>, %346, %cst_116 [1] : vector<8x32xf32> to vector<8xf32>
    %348 = vector.shape_cast %347 : vector<8xf32> to vector<8x1xf32>
    %cst_117 = arith.constant 3.200000e+01 : f32
    %349 = vector.broadcast %cst_117 : f32 to vector<8x1xf32>
    %350 = arith.divf %348, %349 : vector<8x1xf32>
    %351 = vector.broadcast %343 : vector<8x1xf32> to vector<8x32xf32>
    %352 = arith.subf %337, %351 : vector<8x32xf32>
    %cst_118 = arith.constant 9.99999974E-6 : f32
    %353 = vector.broadcast %cst_118 : f32 to vector<8x1xf32>
    %354 = arith.addf %350, %353 : vector<8x1xf32>
    %355 = math.rsqrt %354 : vector<8x1xf32>
    %356 = vector.broadcast %355 : vector<8x1xf32> to vector<8x32xf32>
    %357 = arith.mulf %352, %356 : vector<8x32xf32>
    %358 = vector.broadcast %338 : vector<1x32xf32> to vector<8x32xf32>
    %359 = arith.mulf %357, %358 : vector<8x32xf32>
    %360 = vector.broadcast %339 : vector<1x32xf32> to vector<8x32xf32>
    %361 = arith.addf %359, %360 : vector<8x32xf32>
    %362 = vector.extract_strided_slice %0 {offsets = [41, 0], sizes = [1, 32], strides = [1, 1]} : vector<43x128xf32> to vector<1x32xf32>
    %363 = vector.extract_strided_slice %0 {offsets = [42, 0], sizes = [1, 32], strides = [1, 1]} : vector<43x128xf32> to vector<1x32xf32>
    %cst_119 = arith.constant dense<0.000000e+00> : vector<8xf32>
    %364 = vector.multi_reduction <add>, %361, %cst_119 [1] : vector<8x32xf32> to vector<8xf32>
    %365 = vector.shape_cast %364 : vector<8xf32> to vector<8x1xf32>
    %cst_120 = arith.constant 3.200000e+01 : f32
    %366 = vector.broadcast %cst_120 : f32 to vector<8x1xf32>
    %367 = arith.divf %365, %366 : vector<8x1xf32>
    %368 = vector.broadcast %367 : vector<8x1xf32> to vector<8x32xf32>
    %369 = arith.subf %361, %368 : vector<8x32xf32>
    %370 = arith.mulf %369, %369 : vector<8x32xf32>
    %cst_121 = arith.constant dense<0.000000e+00> : vector<8xf32>
    %371 = vector.multi_reduction <add>, %370, %cst_121 [1] : vector<8x32xf32> to vector<8xf32>
    %372 = vector.shape_cast %371 : vector<8xf32> to vector<8x1xf32>
    %cst_122 = arith.constant 3.200000e+01 : f32
    %373 = vector.broadcast %cst_122 : f32 to vector<8x1xf32>
    %374 = arith.divf %372, %373 : vector<8x1xf32>
    %375 = vector.broadcast %367 : vector<8x1xf32> to vector<8x32xf32>
    %376 = arith.subf %361, %375 : vector<8x32xf32>
    %cst_123 = arith.constant 9.99999974E-6 : f32
    %377 = vector.broadcast %cst_123 : f32 to vector<8x1xf32>
    %378 = arith.addf %374, %377 : vector<8x1xf32>
    %379 = math.rsqrt %378 : vector<8x1xf32>
    %380 = vector.broadcast %379 : vector<8x1xf32> to vector<8x32xf32>
    %381 = arith.mulf %376, %380 : vector<8x32xf32>
    %382 = vector.broadcast %362 : vector<1x32xf32> to vector<8x32xf32>
    %383 = arith.mulf %381, %382 : vector<8x32xf32>
    %384 = vector.broadcast %363 : vector<1x32xf32> to vector<8x32xf32>
    %385 = arith.addf %383, %384 : vector<8x32xf32>
    %c0_124 = arith.constant 0 : index
    %c0_125 = arith.constant 0 : index
    %c0_126 = arith.constant 0 : index
    %c0_127 = arith.constant 0 : index
    %386 = vector.load %arg9[%c0_124, %c0_125, %c0_126, %c0_127] : memref<1x2x8x32xf32, #tpu.memory_space<vmem>>, vector<1x1x8x32xf32>
    %387 = vector.shape_cast %386 : vector<1x1x8x32xf32> to vector<8x32xf32>
    %388 = vector.shape_cast %385 : vector<8x32xf32> to vector<1x1x8x32xf32>
    tpu.vector_store %arg9[%c0_124, %c0_125, %c0_126, %c0_127], %388 {strides = array<i32>} : memref<1x2x8x32xf32, #tpu.memory_space<vmem>>, vector<1x1x8x32xf32>,
    %c3 = arith.constant 3 : index
    %c0_128 = arith.constant 0 : index
    %c0_129 = arith.constant 0 : index
    %389 = vector.load %arg3[%c3, %c0_128, %c0_129] : memref<4x32x96xf32, #tpu.memory_space<vmem>>, vector<1x32x96xf32>
    %390 = vector.shape_cast %389 : vector<1x32x96xf32> to vector<32x96xf32>
    %cst_130 = arith.constant dense<0.000000e+00> : vector<8x96xf32>
    %391 = tpu.matmul %361, %390, %cst_130 {dimension_numbers = #tpu.dot_dimension_numbers<[1], [0], [0], [1], [0, 0, 1, 1], [], []>} : vector<8x32xf32>, vector<32x96xf32>, vector<8x96xf32> -> vector<8x96xf32>
    %392 = vector.extract_strided_slice %0 {offsets = [28, 0], sizes = [1, 96], strides = [1, 1]} : vector<43x128xf32> to vector<1x96xf32>
    %393 = vector.broadcast %392 : vector<1x96xf32> to vector<8x96xf32>
    %394 = arith.addf %391, %393 : vector<8x96xf32>
    %395 = vector.extract_strided_slice %394 {offsets = [0, 0], sizes = [8, 32], strides = [1, 1]} : vector<8x96xf32> to vector<8x32xf32>
    %396 = vector.extract_strided_slice %394 {offsets = [0, 32], sizes = [8, 32], strides = [1, 1]} : vector<8x96xf32> to vector<8x32xf32>
    %397 = vector.extract_strided_slice %394 {offsets = [0, 64], sizes = [8, 32], strides = [1, 1]} : vector<8x96xf32> to vector<8x32xf32>
    %c3_131 = arith.constant 3 : index
    %c0_132 = arith.constant 0 : index
    %c0_133 = arith.constant 0 : index
    %398 = vector.load %arg4[%c3_131, %c0_132, %c0_133] : memref<8x32x32xf32, #tpu.memory_space<vmem>>, vector<1x32x32xf32>
    %399 = vector.shape_cast %398 : vector<1x32x32xf32> to vector<32x32xf32>
    %400 = vector.extract_strided_slice %0 {offsets = [29, 0], sizes = [1, 32], strides = [1, 1]} : vector<43x128xf32> to vector<1x32xf32>
    %401 = vector.shape_cast %395 : vector<8x32xf32> to vector<8x4x8xf32>
    %cst_134 = arith.constant 0.353553385 : f32
    %402 = vector.broadcast %cst_134 : f32 to vector<8x4x8xf32>
    %403 = arith.mulf %401, %402 : vector<8x4x8xf32>
    %404 = vector.shape_cast %396 : vector<8x32xf32> to vector<8x4x8xf32>
    %405 = vector.shape_cast %397 : vector<8x32xf32> to vector<8x4x8xf32>
    "tpu.trace_start"() <{level = 10 : i32, message = "qhd,khd->hqk"}> : () -> ()
    %cst_135 = arith.constant dense<0.000000e+00> : vector<4x8x8xf32>
    %406 = tpu.matmul %403, %404, %cst_135 {dimension_numbers = #tpu.dot_dimension_numbers<[2], [2], [0], [0], [0, 1, 0, 0, 1, 0], [1], [1]>} : vector<8x4x8xf32>, vector<8x4x8xf32>, vector<4x8x8xf32> -> vector<4x8x8xf32>
    "tpu.trace_stop"() : () -> ()
    %cst_136 = arith.constant dense<0xFF800000> : vector<4x8xf32>
    %407 = vector.multi_reduction <maximumf>, %406, %cst_136 [2] : vector<4x8x8xf32> to vector<4x8xf32>
    %408 = vector.shape_cast %407 : vector<4x8xf32> to vector<4x8x1xf32>
    %409 = vector.broadcast %408 : vector<4x8x1xf32> to vector<4x8x8xf32>
    %410 = arith.subf %406, %409 : vector<4x8x8xf32>
    %411 = math.exp %410 : vector<4x8x8xf32>
    %cst_137 = arith.constant dense<0.000000e+00> : vector<4x8xf32>
    %412 = vector.multi_reduction <add>, %411, %cst_137 [2] : vector<4x8x8xf32> to vector<4x8xf32>
    %413 = vector.shape_cast %412 : vector<4x8xf32> to vector<4x8x1xf32>
    %414 = tpu.reciprocal %413 {approx = true} : vector<4x8x1xf32> -> vector<4x8x1xf32>
    %415 = vector.broadcast %414 : vector<4x8x1xf32> to vector<4x8x8xf32>
    %416 = arith.mulf %411, %415 : vector<4x8x8xf32>
    "tpu.trace_start"() <{level = 10 : i32, message = "hqk,khd->qhd"}> : () -> ()
    %cst_138 = arith.constant dense<0.000000e+00> : vector<4x8x8xf32>
    %417 = tpu.matmul %405, %416, %cst_138 {dimension_numbers = #tpu.dot_dimension_numbers<[0], [2], [2], [1], [0, 1, 0, 2, 1, 1], [1], [0]>} : vector<8x4x8xf32>, vector<4x8x8xf32>, vector<4x8x8xf32> -> vector<4x8x8xf32>
    %418 = tpu.transpose %417, [2, 0, 1] : vector<4x8x8xf32> -> vector<8x4x8xf32>
    "tpu.trace_stop"() : () -> ()
    %419 = vector.shape_cast %418 : vector<8x4x8xf32> to vector<8x32xf32>
    %cst_139 = arith.constant dense<0.000000e+00> : vector<8x32xf32>
    %420 = tpu.matmul %419, %399, %cst_139 {dimension_numbers = #tpu.dot_dimension_numbers<[1], [0], [0], [1], [0, 0, 1, 1], [], []>} : vector<8x32xf32>, vector<32x32xf32>, vector<8x32xf32> -> vector<8x32xf32>
    %421 = vector.broadcast %400 : vector<1x32xf32> to vector<8x32xf32>
    %422 = arith.addf %420, %421 : vector<8x32xf32>
    %423 = arith.addf %361, %422 : vector<8x32xf32>
    %424 = vector.extract_strided_slice %0 {offsets = [34, 0], sizes = [1, 32], strides = [1, 1]} : vector<43x128xf32> to vector<1x32xf32>
    %425 = vector.extract_strided_slice %0 {offsets = [35, 0], sizes = [1, 32], strides = [1, 1]} : vector<43x128xf32> to vector<1x32xf32>
    %cst_140 = arith.constant dense<0.000000e+00> : vector<8xf32>
    %426 = vector.multi_reduction <add>, %423, %cst_140 [1] : vector<8x32xf32> to vector<8xf32>
    %427 = vector.shape_cast %426 : vector<8xf32> to vector<8x1xf32>
    %cst_141 = arith.constant 3.200000e+01 : f32
    %428 = vector.broadcast %cst_141 : f32 to vector<8x1xf32>
    %429 = arith.divf %427, %428 : vector<8x1xf32>
    %430 = vector.broadcast %429 : vector<8x1xf32> to vector<8x32xf32>
    %431 = arith.subf %423, %430 : vector<8x32xf32>
    %432 = arith.mulf %431, %431 : vector<8x32xf32>
    %cst_142 = arith.constant dense<0.000000e+00> : vector<8xf32>
    %433 = vector.multi_reduction <add>, %432, %cst_142 [1] : vector<8x32xf32> to vector<8xf32>
    %434 = vector.shape_cast %433 : vector<8xf32> to vector<8x1xf32>
    %cst_143 = arith.constant 3.200000e+01 : f32
    %435 = vector.broadcast %cst_143 : f32 to vector<8x1xf32>
    %436 = arith.divf %434, %435 : vector<8x1xf32>
    %437 = vector.broadcast %429 : vector<8x1xf32> to vector<8x32xf32>
    %438 = arith.subf %423, %437 : vector<8x32xf32>
    %cst_144 = arith.constant 9.99999974E-6 : f32
    %439 = vector.broadcast %cst_144 : f32 to vector<8x1xf32>
    %440 = arith.addf %436, %439 : vector<8x1xf32>
    %441 = math.rsqrt %440 : vector<8x1xf32>
    %442 = vector.broadcast %441 : vector<8x1xf32> to vector<8x32xf32>
    %443 = arith.mulf %438, %442 : vector<8x32xf32>
    %444 = vector.broadcast %424 : vector<1x32xf32> to vector<8x32xf32>
    %445 = arith.mulf %443, %444 : vector<8x32xf32>
    %446 = vector.broadcast %425 : vector<1x32xf32> to vector<8x32xf32>
    %447 = arith.addf %445, %446 : vector<8x32xf32>
    %c7 = arith.constant 7 : index
    %c0_145 = arith.constant 0 : index
    %c0_146 = arith.constant 0 : index
    %448 = vector.load %arg4[%c7, %c0_145, %c0_146] : memref<8x32x32xf32, #tpu.memory_space<vmem>>, vector<1x32x32xf32>
    %449 = vector.shape_cast %448 : vector<1x32x32xf32> to vector<32x32xf32>
    %cst_147 = arith.constant dense<0.000000e+00> : vector<8x32xf32>
    %450 = tpu.matmul %447, %449, %cst_147 {dimension_numbers = #tpu.dot_dimension_numbers<[1], [0], [0], [1], [0, 0, 1, 1], [], []>} : vector<8x32xf32>, vector<32x32xf32>, vector<8x32xf32> -> vector<8x32xf32>
    %451 = vector.extract_strided_slice %0 {offsets = [30, 0], sizes = [1, 32], strides = [1, 1]} : vector<43x128xf32> to vector<1x32xf32>
    %452 = vector.broadcast %451 : vector<1x32xf32> to vector<8x32xf32>
    %453 = arith.addf %450, %452 : vector<8x32xf32>
    %454 = vector.extract_strided_slice %203 {offsets = [0, 64], sizes = [16, 32], strides = [1, 1]} : vector<16x128xf32> to vector<16x32xf32>
    %455 = vector.extract_strided_slice %203 {offsets = [0, 96], sizes = [16, 32], strides = [1, 1]} : vector<16x128xf32> to vector<16x32xf32>
    %c5 = arith.constant 5 : index
    %c0_148 = arith.constant 0 : index
    %c0_149 = arith.constant 0 : index
    %456 = vector.load %arg4[%c5, %c0_148, %c0_149] : memref<8x32x32xf32, #tpu.memory_space<vmem>>, vector<1x32x32xf32>
    %457 = vector.shape_cast %456 : vector<1x32x32xf32> to vector<32x32xf32>
    %458 = vector.extract_strided_slice %0 {offsets = [31, 0], sizes = [1, 32], strides = [1, 1]} : vector<43x128xf32> to vector<1x32xf32>
    %459 = vector.shape_cast %453 : vector<8x32xf32> to vector<8x4x8xf32>
    %cst_150 = arith.constant 0.353553385 : f32
    %460 = vector.broadcast %cst_150 : f32 to vector<8x4x8xf32>
    %461 = arith.mulf %459, %460 : vector<8x4x8xf32>
    %462 = vector.shape_cast %454 : vector<16x32xf32> to vector<16x4x8xf32>
    %463 = vector.shape_cast %455 : vector<16x32xf32> to vector<16x4x8xf32>
    "tpu.trace_start"() <{level = 10 : i32, message = "qhd,khd->hqk"}> : () -> ()
    %cst_151 = arith.constant dense<0.000000e+00> : vector<4x8x16xf32>
    %464 = tpu.matmul %461, %462, %cst_151 {dimension_numbers = #tpu.dot_dimension_numbers<[2], [2], [0], [0], [0, 1, 0, 0, 1, 0], [1], [1]>} : vector<8x4x8xf32>, vector<16x4x8xf32>, vector<4x8x16xf32> -> vector<4x8x16xf32>
    "tpu.trace_stop"() : () -> ()
    %cst_152 = arith.constant dense<0xFF800000> : vector<4x8xf32>
    %465 = vector.multi_reduction <maximumf>, %464, %cst_152 [2] : vector<4x8x16xf32> to vector<4x8xf32>
    %466 = vector.shape_cast %465 : vector<4x8xf32> to vector<4x8x1xf32>
    %467 = vector.broadcast %466 : vector<4x8x1xf32> to vector<4x8x16xf32>
    %468 = arith.subf %464, %467 : vector<4x8x16xf32>
    %469 = math.exp %468 : vector<4x8x16xf32>
    %cst_153 = arith.constant dense<0.000000e+00> : vector<4x8xf32>
    %470 = vector.multi_reduction <add>, %469, %cst_153 [2] : vector<4x8x16xf32> to vector<4x8xf32>
    %471 = vector.shape_cast %470 : vector<4x8xf32> to vector<4x8x1xf32>
    %472 = tpu.reciprocal %471 {approx = true} : vector<4x8x1xf32> -> vector<4x8x1xf32>
    %473 = vector.broadcast %472 : vector<4x8x1xf32> to vector<4x8x16xf32>
    %474 = arith.mulf %469, %473 : vector<4x8x16xf32>
    "tpu.trace_start"() <{level = 10 : i32, message = "hqk,khd->qhd"}> : () -> ()
    %cst_154 = arith.constant dense<0.000000e+00> : vector<4x8x8xf32>
    %475 = tpu.matmul %463, %474, %cst_154 {dimension_numbers = #tpu.dot_dimension_numbers<[0], [2], [2], [1], [0, 1, 0, 2, 1, 1], [1], [0]>} : vector<16x4x8xf32>, vector<4x8x16xf32>, vector<4x8x8xf32> -> vector<4x8x8xf32>
    %476 = tpu.transpose %475, [2, 0, 1] : vector<4x8x8xf32> -> vector<8x4x8xf32>
    "tpu.trace_stop"() : () -> ()
    %477 = vector.shape_cast %476 : vector<8x4x8xf32> to vector<8x32xf32>
    %cst_155 = arith.constant dense<0.000000e+00> : vector<8x32xf32>
    %478 = tpu.matmul %477, %457, %cst_155 {dimension_numbers = #tpu.dot_dimension_numbers<[1], [0], [0], [1], [0, 0, 1, 1], [], []>} : vector<8x32xf32>, vector<32x32xf32>, vector<8x32xf32> -> vector<8x32xf32>
    %479 = vector.broadcast %458 : vector<1x32xf32> to vector<8x32xf32>
    %480 = arith.addf %478, %479 : vector<8x32xf32>
    %481 = arith.addf %447, %480 : vector<8x32xf32>
    %482 = vector.extract_strided_slice %0 {offsets = [36, 0], sizes = [1, 32], strides = [1, 1]} : vector<43x128xf32> to vector<1x32xf32>
    %483 = vector.extract_strided_slice %0 {offsets = [37, 0], sizes = [1, 32], strides = [1, 1]} : vector<43x128xf32> to vector<1x32xf32>
    %cst_156 = arith.constant dense<0.000000e+00> : vector<8xf32>
    %484 = vector.multi_reduction <add>, %481, %cst_156 [1] : vector<8x32xf32> to vector<8xf32>
    %485 = vector.shape_cast %484 : vector<8xf32> to vector<8x1xf32>
    %cst_157 = arith.constant 3.200000e+01 : f32
    %486 = vector.broadcast %cst_157 : f32 to vector<8x1xf32>
    %487 = arith.divf %485, %486 : vector<8x1xf32>
    %488 = vector.broadcast %487 : vector<8x1xf32> to vector<8x32xf32>
    %489 = arith.subf %481, %488 : vector<8x32xf32>
    %490 = arith.mulf %489, %489 : vector<8x32xf32>
    %cst_158 = arith.constant dense<0.000000e+00> : vector<8xf32>
    %491 = vector.multi_reduction <add>, %490, %cst_158 [1] : vector<8x32xf32> to vector<8xf32>
    %492 = vector.shape_cast %491 : vector<8xf32> to vector<8x1xf32>
    %cst_159 = arith.constant 3.200000e+01 : f32
    %493 = vector.broadcast %cst_159 : f32 to vector<8x1xf32>
    %494 = arith.divf %492, %493 : vector<8x1xf32>
    %495 = vector.broadcast %487 : vector<8x1xf32> to vector<8x32xf32>
    %496 = arith.subf %481, %495 : vector<8x32xf32>
    %cst_160 = arith.constant 9.99999974E-6 : f32
    %497 = vector.broadcast %cst_160 : f32 to vector<8x1xf32>
    %498 = arith.addf %494, %497 : vector<8x1xf32>
    %499 = math.rsqrt %498 : vector<8x1xf32>
    %500 = vector.broadcast %499 : vector<8x1xf32> to vector<8x32xf32>
    %501 = arith.mulf %496, %500 : vector<8x32xf32>
    %502 = vector.broadcast %482 : vector<1x32xf32> to vector<8x32xf32>
    %503 = arith.mulf %501, %502 : vector<8x32xf32>
    %504 = vector.broadcast %483 : vector<1x32xf32> to vector<8x32xf32>
    %505 = arith.addf %503, %504 : vector<8x32xf32>
    %c3_161 = arith.constant 3 : index
    %c0_162 = arith.constant 0 : index
    %c0_163 = arith.constant 0 : index
    %506 = vector.load %arg5[%c3_161, %c0_162, %c0_163] : memref<4x32x64xf32, #tpu.memory_space<vmem>>, vector<1x32x64xf32>
    %507 = vector.shape_cast %506 : vector<1x32x64xf32> to vector<32x64xf32>
    %508 = vector.extract_strided_slice %0 {offsets = [32, 0], sizes = [1, 64], strides = [1, 1]} : vector<43x128xf32> to vector<1x64xf32>
    %c3_164 = arith.constant 3 : index
    %c0_165 = arith.constant 0 : index
    %c0_166 = arith.constant 0 : index
    %509 = vector.load %arg6[%c3_164, %c0_165, %c0_166] : memref<4x64x32xf32, #tpu.memory_space<vmem>>, vector<1x64x32xf32>
    %510 = vector.shape_cast %509 : vector<1x64x32xf32> to vector<64x32xf32>
    %511 = vector.extract_strided_slice %0 {offsets = [33, 0], sizes = [1, 32], strides = [1, 1]} : vector<43x128xf32> to vector<1x32xf32>
    %cst_167 = arith.constant dense<0.000000e+00> : vector<8x64xf32>
    %512 = tpu.matmul %505, %507, %cst_167 {dimension_numbers = #tpu.dot_dimension_numbers<[1], [0], [0], [1], [0, 0, 1, 1], [], []>} : vector<8x32xf32>, vector<32x64xf32>, vector<8x64xf32> -> vector<8x64xf32>
    %513 = vector.broadcast %508 : vector<1x64xf32> to vector<8x64xf32>
    %514 = arith.addf %512, %513 : vector<8x64xf32>
    %cst_168 = arith.constant 0.000000e+00 : f32
    %515 = vector.broadcast %cst_168 : f32 to vector<8x64xf32>
    %516 = arith.maximumf %514, %515 : vector<8x64xf32>
    %cst_169 = arith.constant dense<0.000000e+00> : vector<8x32xf32>
    %517 = tpu.matmul %516, %510, %cst_169 {dimension_numbers = #tpu.dot_dimension_numbers<[1], [0], [0], [1], [0, 0, 1, 1], [], []>} : vector<8x64xf32>, vector<64x32xf32>, vector<8x32xf32> -> vector<8x32xf32>
    %518 = vector.broadcast %511 : vector<1x32xf32> to vector<8x32xf32>
    %519 = arith.addf %517, %518 : vector<8x32xf32>
    %520 = arith.addf %505, %519 : vector<8x32xf32>
    %521 = vector.extract_strided_slice %0 {offsets = [38, 0], sizes = [1, 32], strides = [1, 1]} : vector<43x128xf32> to vector<1x32xf32>
    %522 = vector.extract_strided_slice %0 {offsets = [39, 0], sizes = [1, 32], strides = [1, 1]} : vector<43x128xf32> to vector<1x32xf32>
    %cst_170 = arith.constant dense<0.000000e+00> : vector<8xf32>
    %523 = vector.multi_reduction <add>, %520, %cst_170 [1] : vector<8x32xf32> to vector<8xf32>
    %524 = vector.shape_cast %523 : vector<8xf32> to vector<8x1xf32>
    %cst_171 = arith.constant 3.200000e+01 : f32
    %525 = vector.broadcast %cst_171 : f32 to vector<8x1xf32>
    %526 = arith.divf %524, %525 : vector<8x1xf32>
    %527 = vector.broadcast %526 : vector<8x1xf32> to vector<8x32xf32>
    %528 = arith.subf %520, %527 : vector<8x32xf32>
    %529 = arith.mulf %528, %528 : vector<8x32xf32>
    %cst_172 = arith.constant dense<0.000000e+00> : vector<8xf32>
    %530 = vector.multi_reduction <add>, %529, %cst_172 [1] : vector<8x32xf32> to vector<8xf32>
    %531 = vector.shape_cast %530 : vector<8xf32> to vector<8x1xf32>
    %cst_173 = arith.constant 3.200000e+01 : f32
    %532 = vector.broadcast %cst_173 : f32 to vector<8x1xf32>
    %533 = arith.divf %531, %532 : vector<8x1xf32>
    %534 = vector.broadcast %526 : vector<8x1xf32> to vector<8x32xf32>
    %535 = arith.subf %520, %534 : vector<8x32xf32>
    %cst_174 = arith.constant 9.99999974E-6 : f32
    %536 = vector.broadcast %cst_174 : f32 to vector<8x1xf32>
    %537 = arith.addf %533, %536 : vector<8x1xf32>
    %538 = math.rsqrt %537 : vector<8x1xf32>
    %539 = vector.broadcast %538 : vector<8x1xf32> to vector<8x32xf32>
    %540 = arith.mulf %535, %539 : vector<8x32xf32>
    %541 = vector.broadcast %521 : vector<1x32xf32> to vector<8x32xf32>
    %542 = arith.mulf %540, %541 : vector<8x32xf32>
    %543 = vector.broadcast %522 : vector<1x32xf32> to vector<8x32xf32>
    %544 = arith.addf %542, %543 : vector<8x32xf32>
    %545 = vector.extract_strided_slice %0 {offsets = [41, 0], sizes = [1, 32], strides = [1, 1]} : vector<43x128xf32> to vector<1x32xf32>
    %546 = vector.extract_strided_slice %0 {offsets = [42, 0], sizes = [1, 32], strides = [1, 1]} : vector<43x128xf32> to vector<1x32xf32>
    %cst_175 = arith.constant dense<0.000000e+00> : vector<8xf32>
    %547 = vector.multi_reduction <add>, %544, %cst_175 [1] : vector<8x32xf32> to vector<8xf32>
    %548 = vector.shape_cast %547 : vector<8xf32> to vector<8x1xf32>
    %cst_176 = arith.constant 3.200000e+01 : f32
    %549 = vector.broadcast %cst_176 : f32 to vector<8x1xf32>
    %550 = arith.divf %548, %549 : vector<8x1xf32>
    %551 = vector.broadcast %550 : vector<8x1xf32> to vector<8x32xf32>
    %552 = arith.subf %544, %551 : vector<8x32xf32>
    %553 = arith.mulf %552, %552 : vector<8x32xf32>
    %cst_177 = arith.constant dense<0.000000e+00> : vector<8xf32>
    %554 = vector.multi_reduction <add>, %553, %cst_177 [1] : vector<8x32xf32> to vector<8xf32>
    %555 = vector.shape_cast %554 : vector<8xf32> to vector<8x1xf32>
    %cst_178 = arith.constant 3.200000e+01 : f32
    %556 = vector.broadcast %cst_178 : f32 to vector<8x1xf32>
    %557 = arith.divf %555, %556 : vector<8x1xf32>
    %558 = vector.broadcast %550 : vector<8x1xf32> to vector<8x32xf32>
    %559 = arith.subf %544, %558 : vector<8x32xf32>
    %cst_179 = arith.constant 9.99999974E-6 : f32
    %560 = vector.broadcast %cst_179 : f32 to vector<8x1xf32>
    %561 = arith.addf %557, %560 : vector<8x1xf32>
    %562 = math.rsqrt %561 : vector<8x1xf32>
    %563 = vector.broadcast %562 : vector<8x1xf32> to vector<8x32xf32>
    %564 = arith.mulf %559, %563 : vector<8x32xf32>
    %565 = vector.broadcast %545 : vector<1x32xf32> to vector<8x32xf32>
    %566 = arith.mulf %564, %565 : vector<8x32xf32>
    %567 = vector.broadcast %546 : vector<1x32xf32> to vector<8x32xf32>
    %568 = arith.addf %566, %567 : vector<8x32xf32>
    %c0_180 = arith.constant 0 : index
    %c1_181 = arith.constant 1 : index
    %c0_182 = arith.constant 0 : index
    %c0_183 = arith.constant 0 : index
    %569 = vector.load %arg9[%c0_180, %c1_181, %c0_182, %c0_183] : memref<1x2x8x32xf32, #tpu.memory_space<vmem>>, vector<1x1x8x32xf32>
    %570 = vector.shape_cast %569 : vector<1x1x8x32xf32> to vector<8x32xf32>
    %571 = vector.shape_cast %568 : vector<8x32xf32> to vector<1x1x8x32xf32>
    tpu.vector_store %arg9[%c0_180, %c1_181, %c0_182, %c0_183], %571 {strides = array<i32>} : memref<1x2x8x32xf32, #tpu.memory_space<vmem>>, vector<1x1x8x32xf32>,
    return
  }
  func.func @transform_0(%arg0: i32) -> (i32, i32, i32) {
    %c0_i32 = arith.constant 0 : i32
    %c0_i32_0 = arith.constant 0 : i32
    %c0_i32_1 = arith.constant 0 : i32
    return %arg0, %c0_i32, %c0_i32_0 : i32, i32, i32
  }
  func.func @transform_1(%arg0: i32) -> (i32, i32, i32) {
    %c0_i32 = arith.constant 0 : i32
    %c0_i32_0 = arith.constant 0 : i32
    %c0_i32_1 = arith.constant 0 : i32
    return %arg0, %c0_i32, %c0_i32_0 : i32, i32, i32
  }
  func.func @transform_2(%arg0: i32) -> (i32, i32, i32) {
    %c0_i32 = arith.constant 0 : i32
    %c0_i32_0 = arith.constant 0 : i32
    %c0_i32_1 = arith.constant 0 : i32
    %c0_i32_2 = arith.constant 0 : i32
    return %c0_i32, %c0_i32_0, %c0_i32_1 : i32, i32, i32
  }
  func.func @transform_3(%arg0: i32) -> (i32, i32, i32) {
    %c0_i32 = arith.constant 0 : i32
    %c0_i32_0 = arith.constant 0 : i32
    %c0_i32_1 = arith.constant 0 : i32
    %c0_i32_2 = arith.constant 0 : i32
    return %c0_i32, %c0_i32_0, %c0_i32_1 : i32, i32, i32
  }
  func.func @transform_4(%arg0: i32) -> (i32, i32, i32) {
    %c0_i32 = arith.constant 0 : i32
    %c0_i32_0 = arith.constant 0 : i32
    %c0_i32_1 = arith.constant 0 : i32
    %c0_i32_2 = arith.constant 0 : i32
    return %c0_i32, %c0_i32_0, %c0_i32_1 : i32, i32, i32
  }
  func.func @transform_5(%arg0: i32) -> (i32, i32, i32) {
    %c0_i32 = arith.constant 0 : i32
    %c0_i32_0 = arith.constant 0 : i32
    %c0_i32_1 = arith.constant 0 : i32
    %c0_i32_2 = arith.constant 0 : i32
    return %c0_i32, %c0_i32_0, %c0_i32_1 : i32, i32, i32
  }
  func.func @transform_6(%arg0: i32) -> (i32, i32) {
    %c0_i32 = arith.constant 0 : i32
    %c0_i32_0 = arith.constant 0 : i32
    %c0_i32_1 = arith.constant 0 : i32
    return %c0_i32, %c0_i32_0 : i32, i32
  }
  func.func @transform_7(%arg0: i32) -> (i32, i32) {
    %c0_i32 = arith.constant 0 : i32
    %c0_i32_0 = arith.constant 0 : i32
    %c0_i32_1 = arith.constant 0 : i32
    return %c0_i32, %c0_i32_0 : i32, i32
  }
  func.func @transform_8(%arg0: i32) -> (i32, i32, i32, i32) {
    %c0_i32 = arith.constant 0 : i32
    %c0_i32_0 = arith.constant 0 : i32
    %c0_i32_1 = arith.constant 0 : i32
    %c0_i32_2 = arith.constant 0 : i32
    return %arg0, %c0_i32, %c0_i32_0, %c0_i32_1 : i32, i32, i32, i32
  }
}

</mosaic_0001>

<bundles_post_ra>
// kernel: detr_transformer_forward.1
= control target key start
LH: loop header
LB: loop body
LE: loop exit
PB: predicated region body
PF: predicated region fallthrough
CT: control target
= control target key end

     0   :  { %s10480_s0 = inlined_call_operand.hbm [shape: f32[2,16,32], index: 0, kind: input, shape index: {}]   ;;  %s10481_s1 = inlined_call_operand.hbm [shape: f32[2,8,32], index: 1, kind: input, shape index: {}]   ;;  %s10482_s2 = inlined_call_operand.vmem [shape: f32[4,32,96], index: 2, kind: input, shape index: {}]   ;;  %s10483_s3 = inlined_call_operand.vmem [shape: f32[8,32,32], index: 3, kind: input, shape index: {}]   ;;  %s10484_s4 = inlined_call_operand.hbm [shape: f32[4,32,64], index: 4, kind: input, shape index: {}]   ;;  %s10485_s5 = inlined_call_operand.vmem [shape: f32[4,64,32], index: 5, kind: input, shape index: {}]   ;;  %s10486_s6 = inlined_call_operand.hbm [shape: f32[32,128], index: 6, kind: input, shape index: {}]   ;;  %s10487_s7 = inlined_call_operand.hbm [shape: f32[43,128], index: 7, kind: input, shape index: {}]   ;;  %s10488_s8 = inlined_call_operand.vmem [shape: f32[2,2,8,32], index: 8, kind: output, shape index: {}]  }
   0x1   :  { %10491 = sst [smem:[#allocation15_spill]] %s10484_s4 }
   0x2   :  { %10492 = sst [smem:[#allocation16_spill]] %s10486_s6 }
   0x3   :  { %10493 = sst [smem:[#allocation17_spill]] %s10487_s7 }
   0x4   :  { %13 = vsyncpa [#allocation3], 0 }
   0x5   :  { %15 = vsyncpa [#allocation3 + $0x1], 0 }
   0x6   :  { %16 = vsyncpa [#allocation5], 0 }
   0x7   :  { %18 = vsyncpa [#allocation5 + $0x1], 0 }
   0x8   :  { %19 = vsyncpa [#allocation8], 0  ;;  %s8707_s27 = smov 0   ;;  %s8709_s28 = smov 0  }
   0x9   :  { %s8711_s29 = smov 0   ;;  %s8713_s30 = smov 0  }
   0xa LB: > { %s8726_s9 = sadd.s32 4294967295, %s8643_s30   ;;  %p45_p0 = scmp.ne.s32.totalorder %s8635_s28, %s8631_s27  ;;  %s8643_s30 = sphi %s8713_s30, %s10508_s30   ;;  %s8639_s29 = sphi %s8711_s29, %s10507_s29   ;;  %s8635_s28 = sphi %s8709_s28, %s10506_s28   ;;  %s8631_s27 = sphi %s8707_s27, %s10505_s27  }
   0xb   : > { %p46_p1 = scmp.eq.s32.totalorder %s8726_s9, 0  ;;  %p7840_p2 = scmp.ge.s32.totalorder %s8643_s30, 1 }
   0xc   : > { %p234_p3 = scmp.lt.s32.totalorder %s8643_s30, 3  ;;  %s10495_s4 = sld [smem:[#allocation15_spill]] }
   0xd   : > { %p8734_p4 = por %p46_p1, %p45_p0  ;;  %s8645_s15 = smov [#allocation6]  }
   0xe   : > { %p8741_p5 = pnand %p7840_p2, %p234_p3  ;;  %s253_s16 = sshll.u32 %s8645_s15, 4  ;;  %s254_s16 = int_to_ptr.vmem [resolvable:$true] %s253_s16 }
   0xf   : > { %s10498_s6 = sld [smem:[#allocation16_spill]]  ;;  %s10489_s21 = smov 128  }
  0x10   : > { %p8062_p6 = pneg %p8741_p5  ;;  %s10490_s22 = smov 8  }
  0x11   : > { %s8648_s23 = smov [#allocation7]   ;;  %s10499_s7 = sld [smem:[#allocation17_spill]] }
  0x12   : > { %s251_s13 = sshll.u32 %s10495_s4, 4  ;;  %p8749_p7 = pnand %p8062_p6, %p46_p1  ;;  %s252_s13 = int_to_ptr.hbm [resolvable:$true] %s251_s13 }
  0x13   : > { %s270_s24 = sshll.u32 %s8648_s23, 4  ;;  %s8649_s11 = smov [#allocation9]   ;;  %s271_s24 = int_to_ptr.vmem [resolvable:$true] %s270_s24 }
  0x14   : > { %8065 = dma.hbm_to_vmem [thread:$0]  (!%p8749_p7), %s252_s13, 2048, %s254_s16, [#allocation5], %s10489_s21, %s10489_s21, %s10490_s22  }
  0x15   : > { %s268_s20 = sshll.u32 %s10498_s6, 4  ;;  %s284_s12 = sshll.u32 %s8649_s11, 4  ;;  %s269_s20 = int_to_ptr.hbm [resolvable:$true] %s268_s20  ;;  %s285_s12 = int_to_ptr.vmem [resolvable:$true] %s284_s12 }
  0x16   : > { %8068 = dma.hbm_to_vmem [thread:$0]  (!%p8749_p7), %s269_s20, 512, %s271_s24, [#allocation8], %s10489_s21, %s10489_s21, %s10490_s22  }
  0x17   : > { %s282_s27 = sshll.u32 %s10499_s7, 4  ;;  %s8770_s13 = sadd.s32 1, %s8643_s30   ;;  %s283_s27 = int_to_ptr.hbm [resolvable:$true] %s282_s27 }
  0x18   : > { %8071 = dma.hbm_to_vmem [thread:$0]  (!%p8749_p7), %s283_s27, 768, %s285_s12, [#allocation8], %s10489_s21, %s10489_s21, %s10490_s22  }
  0x19   : > { %s29_s15 = ssub.s32 %s8643_s30, %s8770_s13  ;;  %s32_s16 = sadd.s32 1, %s8639_s29 }
  0x1a   : > { %p30_p8 = scmp.eq.s32.totalorder %s29_s15, 0  ;;  %p39_p9 = scmp.ne.s32.totalorder %s8639_s29, %s8635_s28 }
  0x1b   : > { %p40_p10 = scmp.eq.s32.totalorder %s8643_s30, 0  ;;  %p8082_p11 = scmp.lt.s32.totalorder %s8643_s30, 2 }
  0x1c   : > { %s8785_s18 = scalar_select %p30_p8, %s8639_s29, %s32_s16  }
  0x1d   : > { %p41_p12 = por %p40_p10, %p39_p9  ;;  %s8788_s19 = sand.u32 1, %s8639_s29  }
  0x1e   : > { %10500 = sst [smem:[#allocation14_spill]] %s8785_s18  ;;  %s7845_s17 = sshll.u32 %s8788_s19, 4 }
  0x1f   : > { %s8043_s20 = sshll.u32 %s8643_s30, 4  ;;  %s302_s26 = scalar_lea.vmem [#allocation2], %s7845_s17 }
  0x20   : > { %s307_s25 = scalar_lea.hbm %s10480_s0, %s8043_s20  ;;  %s310_s27 = sshll.u32 %s302_s26, 4  ;;  %s311_s27 = int_to_ptr.vmem [resolvable:$true] %s310_s27 }
  0x21   : > { %s308_s11 = sshll.u32 %s307_s25, 4  ;;  %p8795_p13 = pnand %p8082_p11, %p41_p12  ;;  %s309_s11 = int_to_ptr.hbm [resolvable:$true] %s308_s11 }
  0x22   : > { %s320_s15 = sand.u32 1, %s8643_s30   ;;  %s7848_s16 = sshll.u32 %s8788_s19, 3 }
  0x23   : > { %s299_s21 = scalar_lea.sflag [#allocation3], %s8788_s19  ;;  %s8537_s22 = sshra.s32 %s309_s11, 4  ;;  %s8538_s22 = int_to_ptr.hbm [resolvable:$true] %s8537_s22 }
  0x24   : > { %s8539_s4 = scalar_lea.hbm %s8538_s22, 16  ;;  %p8541_p2 = pneg %p8795_p13 }
  0x25   : > { %p8540_p0 = scmp.ne.s32.totalorder %s8538_s22, %s8539_s4  ;;  %s8544_s23 = scalar_lea.hbm %s10480_s0, 32 }
  0x26   : > { %p8545_p7 = scmp.lt.s32.totalorder %s8538_s22, %s10480_s0  ;;  %p8546_p8 = scmp.lt.s32.totalorder %s8544_s23, %s8539_s4 }
  0x27   : > { %p8542_p3 = pnand %p8541_p2, %p8540_p0 }
  0x28   : > { %p8547_p9 = por %p8546_p8, %p8545_p7 }
  0x29   : > { %p8543_p6 = pneg %p8542_p3 }
  0x2b   : > { %p8548_p10 = pnand %p8547_p9, %p8543_p6 }
  0x2d   : > { %8551 = shalt.err (!%p8548_p10)
}
  0x2e   : > { %s10502_s19 = smov 8   ;;  %s10503_s26 = smov 128  }
  0x2f   : > { %8075 = dma.hbm_to_vmem [thread:$0]  (!%p8795_p13), %s309_s11, 256, %s311_s27, %s299_s21, %s10503_s26, %s10503_s26, %s10502_s19  }
  0x30   : > { %s7849_s6 = sshll.u32 %s8643_s30, 3  ;;  %s324_s18 = scalar_lea.vmem [#allocation4], %s7848_s16 }
  0x31   : > { %s328_s20 = scalar_lea.hbm %s10481_s1, %s7849_s6  ;;  %s332_s24 = sshll.u32 %s324_s18, 4  ;;  %s333_s24 = int_to_ptr.vmem [resolvable:$true] %s332_s24 }
  0x32   : > { %s330_s22 = sshll.u32 %s328_s20, 4  ;;  %s321_s4 = scalar_lea.sflag [#allocation5], %s320_s15  ;;  %s331_s22 = int_to_ptr.hbm [resolvable:$true] %s330_s22 }
  0x33   : > { %s8567_s23 = sshra.s32 %s331_s22, 4  ;;  %s8574_s27 = scalar_lea.hbm %s10481_s1, 16  ;;  %s8568_s23 = int_to_ptr.hbm [resolvable:$true] %s8567_s23 }
  0x34   : > { %s8569_s25 = scalar_lea.hbm %s8568_s23, 8  ;;  %p8575_p3 = scmp.lt.s32.totalorder %s8568_s23, %s10481_s1 }
  0x35   : > { %p8570_p11 = scmp.ne.s32.totalorder %s8568_s23, %s8569_s25  ;;  %p8576_p6 = scmp.lt.s32.totalorder %s8574_s27, %s8569_s25 }
  0x37   : > { %p8572_p12 = pnand %p8570_p11, %p8541_p2  ;;  %p8577_p7 = por %p8576_p6, %p8575_p3 }
  0x39   : > { %p8573_p0 = pneg %p8572_p12 }
  0x3b   : > { %p8578_p8 = pnand %p8577_p7, %p8573_p0 }
  0x3d   : > { %8581 = shalt.err (!%p8578_p8)
}
  0x3e   : > { %8078 = dma.hbm_to_vmem [thread:$0]  (!%p8795_p13), %s331_s22, 128, %s333_s24, %s321_s4  }
  0x3f   : > { %341 = sbr.rel (%p8741_p5) target bundleno = 13472 (0x34a0), region = 52  ;;  %s343_s18 = sand.u32 (!%p8741_p5), 1, %s8635_s28  }
  0x40   : > { %s7851_s11 = sshll.u32 (!%p8741_p5), %s343_s18, 4  ;;  %s344_s15 = scalar_lea.sflag (!%p8741_p5), [#allocation3], %s343_s18 }
  0x41   : > { %s8836_s16 = scalar_lea.vmem (!%p8741_p5), [#allocation2], %s7851_s11 }
  0x44   : > { %8614 = dma.done.wait (%p8734_p4), %s344_s15, 256  }
  0x45   : > { %8616 = vsyncadd (%p8734_p4), %s344_s15, 4294967040  ;;  %s353_s19 = sand.u32 1, %s8726_s9   ;;  %s7852_s12 = sshll.u32 %s343_s18, 3 }
  0x46   : > { %s354_s26 = scalar_lea.sflag [#allocation5], %s353_s19  ;;  %s8843_s17 = scalar_lea.vmem [#allocation4], %s7852_s12 }
  0x47   : > { %8618 = dma.done.wait (%p8734_p4), %s354_s26, 128  }
  0x48   : > { %8620 = vsyncadd (%p8734_p4), %s354_s26, 4294967168 }
  0x49   : > { %8622 = dma.done.wait (%p46_p1), [#allocation5], 2048  }
  0x4a   : > { %8624 = vsyncadd (%p46_p1), [#allocation5], 4294965248 }
  0x4b   : > { %8626 = dma.done.wait (%p46_p1), [#allocation8], 1280  }
  0x4c   : > { %8628 = vsyncadd (%p46_p1), [#allocation8], 4294966016  ;;  %v427_v0 = vld [vmem:[%s10482_s2 + $0x18] sm:$0xff]  ;;  %v426_v1 = vld [vmem:[%s10482_s2 + $0x10] sm:$0xff]  ;;  %vm429_vm0 = vcmask 261120   ;;  %s8650_s21 = smov 104  }
  0x4d   : > { %448 = vmatpush.msra.mxu0 %v427_v0  ;;  %v425_v2 = vld [vmem:[%s10482_s2 + $0x8] sm:$0xff]  ;;  %v424_v3 = vld [vmem:[%s10482_s2] sm:$0xff]  ;;  %v416_v6 = vld [vmem:[#allocation9] sm:$0xff]  ;;  %s8651_s30 = smov 120   ;;  %s8652_s27 = smov 112   ;;  %vm484_vm1 = vcmask 1047556  }
  0x4e   : > { %v422_v4 = vld [vmem:[%s8836_s16] sm:$0xff]  ;;  %v423_v5 = vld [vmem:[%s8836_s16 + $0x8] sm:$0xff]  ;;  %v428_v7 = vperm.slane %v416_v6, 0  ;;  %s8653_s7 = smov 96   ;;  %s8654_s6 = smov 64   ;;  %vm876_vm2 = vcmask 64512  }
  0x4f   : > { %449 = vmatpush.msra.mxu0 %v426_v1  ;;  %v8655_v37 = vmov 1983009808   ;;  %v8656_v51 = vmov 1934713408   ;;  %vm993_vm3 = vcmask 130048   ;;  %s8657_s18 = smov 24  }
  0x50   : > { %v489_v38 = vunpack.c.l.s4 %v8655_v37  ;;  %v513_v52 = vunpack.c.l.s4 %v8656_v51  ;;  %s8658_s11 = smov 16   ;;  %s8659_s15 = smov 8   ;;  %vm1726_vm4 = vcmask 195584   ;;  %vm1863_vm12 = vcmask 523264  }
  0x51   : > { %450 = vmatpush.msra.mxu0 %v425_v2  ;;  %p411_p1 = scmp.lt.s32.totalorder %s8726_s9, 1 }
  0x52   : > { %v8914_v42 = vunpack.c.0.s8 %v489_v38  ;;  %v8931_v61 = vunpack.c.0.s8 %v513_v52 }
  0x53   : > { %451 = vmatpush.msra.mxu0 %v424_v3  ;;  %s10510_s9 = smov (!%p411_p1, %s8726_s9), 1 }
  0x54   : > { %7858 = vmatmul.msk.f32.vlgmr.msra.gmra.mxu0 %vm429_vm0, %v422_v4 }
  0x5c   : > { %7859 = vmatmul.msk.f32.gmra.mxu0 %vm429_vm0, %v423_v5 }
  0xd1   : > { %v453_v8 = vpop.f32.mrf.mxu0 }
  0xd2   : > { %v8873_v9 = vadd.f32 %v453_v8, %v428_v7 }
  0xd4   : > { %477 = vrot.lane.b32.xlu1 %v8873_v9, %s8650_s21  ;;  %465 = vrot.lane.b32.xlu0 %v8873_v9, %s8651_s30  ;;  %v486_v39 = vrot.slane %v8873_v9, 4 }
  0xd9   : > { %v456_v10 = vpop.f32.mrf.mxu0 }
  0xda   : > { %v8879_v11 = vadd.f32 %v456_v10, %v428_v7 }
  0xdc   : > { %473 = vrot.lane.b32.xlu2 %v8879_v11, %s8652_s27  ;;  %467 = vrot.lane.b32.xlu1 %v8879_v11, %s8651_s30  ;;  %v8136_v12 = vpack.i.bf16 %v8879_v11, %v8873_v9  ;;  %v542_v50 = vrot.slane %v8879_v11, 4 }
  0xdd   : > { %471 = vrot.lane.b32.xlu0 %v8873_v9, %s8652_s27 }
  0xe4   : > { %479 = vrot.lane.b32.xlu2 %v8879_v11, %s8650_s21 }
  0xe5   : > { %8137 = vrot.lane.b32.xlu0 %v8136_v12, %s8653_s7 }
 0x136   : > { %v8892_v13 = vpop.permute.xlu2 %473 }
 0x137   : > { %v543_v56 = vsel %vm484_vm1, %v8892_v13, %v542_v50  ;;  %v540_v58 = vrot.slane %v8892_v13, 4 }
 0x138   : > { %v551_v63 = vperm.slane %v543_v56, %v8914_v42 }
 0x139   : > { %v541_v3 = vsel %vm484_vm1, %v540_v58, %v8879_v11 }
 0x13a   : > { %v578_v6 = vrot.slane %v551_v63, 4  ;;  %v547_v10 = vperm.slane %v541_v3, %v8914_v42 }
 0x13e   : > { %v8894_v14 = vpop.permute.xlu2 %479 }
 0x13f   : > { %v8151_v15 = vpack.i.bf16 %v8894_v14, %v8892_v13  ;;  %v552_v0 = vrot.slane %v8894_v14, 4 }
 0x141   : > { %8152 = vrot.lane.b32.xlu0 %v8151_v15, %s8653_s7 }
 0x146   : > { %v478_v16 = vpop.permute.xlu1 %477  ;;  %v466_v17 = vpop.permute.xlu0 %465 }
 0x147   : > { %v498_v43 = vrot.slane %v466_v17, 4  ;;  %v496_v46 = vrot.slane %v478_v16, 4 }
 0x149   : > { %1082 = vrot.lane.b32.xlu0 %v8873_v9, %s8654_s6  ;;  %v499_v47 = vsel %vm484_vm1, %v478_v16, %v498_v43  ;;  %v497_v54 = vsel %vm484_vm1, %v496_v46, %v466_v17 }
 0x14a   : > { %v507_v55 = vperm.slane %v499_v47, %v8914_v42  ;;  %v503_v60 = vperm.slane %v497_v54, %v8914_v42 }
 0x14c   : > { %v520_v4 = vrot.slane %v507_v55, 4  ;;  %v508_v12 = vrot.slane %v503_v60, 4 }
 0x14e   : > { %v8901_v18 = vpop.permute.xlu1 %467 }
 0x14f   : > { %v472_v19 = vpop.permute.xlu0 %471  ;;  %v8146_v20 = vpack.i.bf16 %v478_v16, %v8901_v18  ;;  %v554_v53 = vrot.slane %v8901_v18, 4  ;;  %v553_v7 = vsel %vm484_vm1, %v552_v0, %v8901_v18 }
 0x150   : > { %v8141_v21 = vpack.i.bf16 %v472_v19, %v466_v17  ;;  %v483_v40 = vrot.slane %v472_v19, 4  ;;  %v487_v41 = vsel %vm484_vm1, %v472_v19, %v486_v39 }
 0x151   : > { %8147 = vrot.lane.b32.xlu2 %v8146_v20, %s8653_s7  ;;  %1084 = vrot.lane.b32.xlu0 %v8879_v11, %s8654_s6  ;;  %v495_v45 = vperm.slane %v487_v41, %v8914_v42  ;;  %v555_v62 = vsel %vm484_vm1, %v8894_v14, %v554_v53  ;;  %v559_v11 = vperm.slane %v553_v7, %v8914_v42 }
 0x152   : > { %8142 = vrot.lane.b32.xlu1 %v8141_v21, %s8653_s7  ;;  %v485_v44 = vsel %vm484_vm1, %v483_v40, %v8873_v9  ;;  %v563_v5 = vperm.slane %v555_v62, %v8914_v42 }
 0x153   : > { %v491_v48 = vperm.slane %v485_v44, %v8914_v42  ;;  %v522_v49 = vrot.slane %v495_v45, 4  ;;  %v521_v9 = vsel %vm484_vm1, %v520_v4, %v495_v45 }
 0x154   : > { %v576_v15 = vrot.slane %v563_v5, 4 }
 0x155   : > { %v510_v57 = vrot.slane %v491_v48, 4  ;;  %v523_v59 = vsel %vm484_vm1, %v507_v55, %v522_v49 }
 0x156   : > { %v531_v2 = vperm.slane %v523_v59, %v8931_v61 }
 0x157   : > { %v8138_v22 = vpop.permute.xlu0 %8137  ;;  %v511_v1 = vsel %vm484_vm1, %v503_v60, %v510_v57 }
 0x158   : > { %v8139_v31 = vunpack.i.l.bf16 %v8138_v22  ;;  %v8140_v35 = vunpack.i.h.bf16 %v8138_v22  ;;  %v519_v8 = vperm.slane %v511_v1, %v8931_v61  ;;  %v602_v20 = vmul.f32 0.35355338, %v531_v2 }
 0x159   : > { %1094 = vrot.lane.b32.xlu2 %v478_v16, %s8654_s6  ;;  %v579_v16 = vsel %vm484_vm1, %v563_v5, %v578_v6  ;;  %v566_v22 = vrot.slane %v547_v10, 4 }
 0x15a   : > { %v534_v21 = vrot.slane %v519_v8, 4 }
 0x1ab   : > { %v8148_v25 = vpop.permute.xlu2 %8147 }
 0x1ac   : > { %v8150_v28 = vunpack.i.h.bf16 %v8148_v25  ;;  %v8149_v34 = vunpack.i.l.bf16 %v8148_v25  ;;  %v577_v25 = vsel %vm484_vm1, %v576_v15, %v551_v63 }
 0x1ae   : > { %v8158_v36 = vpack.i.bf16 %v8149_v34, %v8140_v35  ;;  %v583_v34 = vperm.slane %v577_v25, %v8931_v61 }
 0x1b0   : > { %v608_v58 = vmul.f32 0.35355338, %v583_v34 }
 0x1b3   : > { %v8153_v23 = vpop.permute.xlu0 %8152 }
 0x1bb   : > { %v1083_v24 = vpop.permute.xlu0 %1082 }
 0x1bc   : > { %1106 = vxpose.xlu0.b32.start [1/2] (short) (narrow) %v1083_v24, 8 }
 0x1c3   : > { %v1085_v26 = vpop.permute.xlu0 %1084 }
 0x1c4   : > { %v8143_v27 = vpop.permute.xlu1 %8142  ;;  %1107 = vxpose.xlu0.b32.end [2/2] (short) (narrow) %v1085_v26, 8 }
 0x1c5   : > { %v8145_v29 = vunpack.i.h.bf16 %v8143_v27  ;;  %v8144_v30 = vunpack.i.l.bf16 %v8143_v27  ;;  %v564_v27 = vrot.slane %v559_v11, 4 }
 0x1c7   : > { %v8165_v32 = vpack.i.bf16 %v8150_v28, %v8145_v29  ;;  %v8156_v33 = vpack.i.bf16 %v8144_v30, %v8139_v31  ;;  %v567_v28 = vsel %vm484_vm1, %v559_v11, %v566_v22  ;;  %v598_v30 = vmul.f32 0.35355338, %v519_v8 }
 0x1c8   : > { %v624_v31 = vrot.slane %v602_v20, 4  ;;  %v565_v39 = vsel %vm484_vm1, %v564_v27, %v547_v10 }
 0x1c9   : > { %8166 = vxpose.xlu2.b32.start [1/2] (short) (narrow) %v8165_v32, 8  ;;  %8157 = vxpose.xlu1.b32.start [1/2] (short) (narrow) %v8156_v33, 8  ;;  %v535_v32 = vsel %vm484_vm1, 0.0, %v534_v21  ;;  %v612_v43 = vrot.slane %v598_v30, 4  ;;  %v571_v50 = vperm.slane %v565_v39, %v8931_v61 }
 0x1ca   : > { %v599_v41 = vmul.f32 0.35355338, %v535_v32 }
 0x1cb   : > { %v588_v1 = vrot.slane %v571_v50, 4  ;;  %v604_v10 = vmul.f32 0.35355338, %v571_v50 }
 0x1cc   : > { %v618_v55 = vrot.slane %v599_v41, 4 }
 0x1d1   : > { %8168 = vxpose.xlu2.b32.end [2/2] (short) (narrow) %v8153_v23, 8  ;;  %8159 = vxpose.xlu1.b32.end [2/2] (short) (narrow) %v8158_v36, 8  ;;  %v587_v23 = vperm.slane %v579_v16, %v8931_v61  ;;  %v575_v36 = vperm.slane %v567_v28, %v8931_v61  ;;  %v589_v16 = vsel %vm484_vm1, 0.0, %v588_v1 }
 0x1d2   : > { %v605_v22 = vmul.f32 0.35355338, %v589_v16 }
 0x1d3   : > { %v594_v35 = vrot.slane %v587_v23, 4  ;;  %v610_v44 = vmul.f32 0.35355338, %v587_v23  ;;  %v590_v53 = vrot.slane %v575_v36, 4  ;;  %v606_v62 = vmul.f32 0.35355338, %v575_v36 }
 0x1d5   : > { %v595_v49 = vsel %vm484_vm1, 0.0, %v594_v35  ;;  %v680_v60 = vrot.slane %v610_v44, 4  ;;  %v591_v6 = vsel %vm484_vm1, 0.0, %v590_v53 }
 0x1d6   : > { %v611_v59 = vmul.f32 0.35355338, %v595_v49  ;;  %v607_v11 = vmul.f32 0.35355338, %v591_v6 }
 0x1d7   : > { %v681_v8 = vsel %vm484_vm1, %v680_v60, %v608_v58 }
 0x1d8   : > { %v685_v20 = vperm.slane %v681_v8, %v8914_v42 }
 0x1da   : > { %v706_v28 = vrot.slane %v685_v20, 4 }
 0x22b   : > { %1096 = vrot.lane.b32.xlu1 %v8894_v14, %s8654_s6  ;;  %v538_v14 = vrot.slane %v531_v2, 4 }
 0x22d   : > { %v539_v24 = vsel %vm484_vm1, 0.0, %v538_v14 }
 0x22e   : > { %v603_v33 = vmul.f32 0.35355338, %v539_v24 }
 0x230   : > { %v630_v46 = vrot.slane %v603_v33, 4 }
 0x232   : > { %1086 = vrot.lane.b32.xlu0 %v466_v17, %s8654_s6  ;;  %v509_v17 = vsel %vm484_vm1, %v508_v12, %v491_v48  ;;  %v592_v48 = vrot.slane %v583_v34, 4  ;;  %v668_v12 = vrot.slane %v606_v62, 4 }
 0x233   : > { %v515_v26 = vperm.slane %v509_v17, %v8931_v61  ;;  %v8976_v17 = vpop.permute.xlu2 %1094 }
 0x234   : > { %v593_v0 = vsel %vm484_vm1, 0.0, %v592_v48  ;;  %v669_v25 = vsel %vm484_vm1, %v668_v12, %v604_v10 }
 0x235   : > { %v532_v38 = vrot.slane %v515_v26, 4  ;;  %v596_v47 = vmul.f32 0.35355338, %v515_v26  ;;  %v609_v7 = vmul.f32 0.35355338, %v593_v0  ;;  %v674_v26 = vrot.slane %v607_v11, 4 }
 0x236   : > { %v673_v30 = vperm.slane %v669_v25, %v8914_v42 }
 0x237   : > { %v533_v51 = vsel %vm484_vm1, 0.0, %v532_v38  ;;  %v613_v54 = vsel %vm484_vm1, %v612_v43, %v596_v47  ;;  %v675_v32 = vsel %vm484_vm1, %v674_v26, %v605_v22 }
 0x238   : > { %v597_v63 = vmul.f32 0.35355338, %v533_v51  ;;  %v617_v2 = vperm.slane %v613_v54, %v8914_v42  ;;  %v679_v38 = vperm.slane %v675_v32, %v8914_v42  ;;  %v694_v39 = vrot.slane %v673_v30, 4 }
 0x23a   : > { %1090 = vrot.lane.b32.xlu2 %v472_v19, %s8654_s6  ;;  %v527_v19 = vperm.slane %v521_v9, %v8931_v61  ;;  %v619_v3 = vsel %vm484_vm1, %v618_v55, %v597_v63  ;;  %v686_v9 = vrot.slane %v611_v59, 4  ;;  %v638_v15 = vrot.slane %v617_v2, 4 }
 0x23b   : > { %v623_v14 = vperm.slane %v619_v3, %v8914_v42  ;;  %v692_v48 = vrot.slane %v679_v38, 4 }
 0x23c   : > { %v536_v29 = vrot.slane %v527_v19, 4  ;;  %v600_v37 = vmul.f32 0.35355338, %v527_v19  ;;  %v687_v21 = vsel %vm484_vm1, %v686_v9, %v609_v7 }
 0x23d   : > { %v639_v23 = vsel %vm484_vm1, %v623_v14, %v638_v15  ;;  %v691_v27 = vperm.slane %v687_v21, %v8914_v42  ;;  %v636_v33 = vrot.slane %v623_v14, 4  ;;  %v693_v54 = vsel %vm484_vm1, %v692_v48, %v673_v30 }
 0x23e   : > { %v537_v40 = vsel %vm484_vm1, 0.0, %v536_v29  ;;  %v625_v45 = vsel %vm484_vm1, %v624_v31, %v600_v37  ;;  %v647_v29 = vperm.slane %v639_v23, %v8931_v61  ;;  %v699_v62 = vperm.slane %v693_v54, %v8931_v61 }
 0x23f   : > { %v601_v52 = vmul.f32 0.35355338, %v537_v40  ;;  %v629_v56 = vperm.slane %v625_v45, %v8914_v42  ;;  %v707_v36 = vsel %vm484_vm1, %v691_v27, %v706_v28  ;;  %v637_v43 = vsel %vm484_vm1, %v636_v33, %v617_v2 }
 0x240   : > { %v715_v41 = vperm.slane %v707_v36, %v8931_v61  ;;  %v695_v45 = vsel %vm484_vm1, %v679_v38, %v694_v39  ;;  %v704_v50 = vrot.slane %v691_v27, 4  ;;  %v718_v3 = vrot.slane %v699_v62, 4 }
 0x241   : > { %v631_v57 = vsel %vm484_vm1, %v630_v46, %v601_v52  ;;  %v650_v5 = vrot.slane %v629_v56, 4  ;;  %v643_v46 = vperm.slane %v637_v43, %v8931_v61  ;;  %v703_v51 = vperm.slane %v695_v45, %v8931_v61 }
 0x242   : > { %v635_v4 = vperm.slane %v631_v57, %v8914_v42  ;;  %v720_v49 = vrot.slane %v715_v41, 4  ;;  %v705_v57 = vsel %vm484_vm1, %v704_v50, %v685_v20  ;;  %v666_v6 = vrot.slane %v647_v29, 4 }
 0x243   : > { %v662_v53 = vrot.slane %v643_v46, 4  ;;  %v711_v1 = vperm.slane %v705_v57, %v8931_v61  ;;  %v722_v8 = vrot.slane %v703_v51, 4 }
 0x244   : > { %v651_v19 = vsel %vm484_vm1, %v635_v4, %v650_v5  ;;  %v648_v34 = vrot.slane %v635_v4, 4 }
 0x245   : > { %v659_v24 = vperm.slane %v651_v19, %v8931_v61  ;;  %v716_v2 = vrot.slane %v711_v1, 4  ;;  %v719_v5 = vsel %vm484_vm1, %v711_v1, %v718_v3  ;;  %v723_v9 = vsel %vm484_vm1, %v715_v41, %v722_v8 }
 0x246   : > { %v649_v44 = vsel %vm484_vm1, %v648_v34, %v629_v56  ;;  %v721_v56 = vsel %vm484_vm1, %v720_v49, %v703_v51 }
 0x247   : > { %v664_v31 = vrot.slane %v659_v24, 4  ;;  %v655_v47 = vperm.slane %v649_v44, %v8931_v61  ;;  %v717_v4 = vsel %vm484_vm1, %v716_v2, %v699_v62  ;;  %v667_v7 = vsel %vm484_vm1, %v659_v24, %v666_v6 }
 0x249   : > { %v665_v40 = vsel %vm484_vm1, %v664_v31, %v647_v29  ;;  %v660_v52 = vrot.slane %v655_v47, 4  ;;  %v663_v0 = vsel %vm484_vm1, %v655_v47, %v662_v53 }
 0x24b   : > { %v661_v63 = vsel %vm484_vm1, %v660_v52, %v643_v46 }
 0x260   : > { %v9028_v27 = vpop.trf.xlu0 }
 0x262   : > { %v8169_v35 = vpop.trf.xlu2 }
 0x263   : > { %v8170_v37 = vunpack.i.l.bf16 %v8169_v35  ;;  %v8173_v58 = vunpack.i.h.bf16 %v8169_v35 }
 0x265   : > { %956 = vmatpush.msra.mxu3 %v8170_v37 }
 0x266   : > { %7864 = vmatmul.msk.f32.vlgmr.msra.gmra.mxu3 %vm876_vm2, %v665_v40 }
 0x26d   : > { %v8160_v55 = vpop.trf.xlu1 }
 0x26e   : > { %7865 = vmatmul.msk.f32.gmra.mxu3 %vm876_vm2, %v721_v56  ;;  %v8161_v59 = vunpack.i.l.bf16 %v8160_v55  ;;  %v8164_v60 = vunpack.i.h.bf16 %v8160_v55 }
 0x270   : > { %898 = vmatpush.msra.mxu1 %v8161_v59  ;;  %927 = vmatpush.msra.mxu2 %v8164_v60 }
 0x271   : > { %7860 = vmatmul.msk.f32.vlgmr.msra.gmra.mxu1 %vm876_vm2, %v661_v63  ;;  %7862 = vmatmul.msk.f32.vlgmr.msra.gmra.mxu2 %vm876_vm2, %v663_v0 }
 0x272   : > { %985 = vmatpush.msrb.mxu1 %v8173_v58 }
 0x279   : > { %7861 = vmatmul.msk.f32.gmra.mxu1 %vm876_vm2, %v717_v4  ;;  %7863 = vmatmul.msk.f32.gmra.mxu2 %vm876_vm2, %v719_v5 }
 0x281   : > { %7866 = vmatmul.msk.f32.vlgmr.msrb.gmra.mxu1 %vm876_vm2, %v667_v7 }
 0x289   : > { %7867 = vmatmul.msk.f32.gmra.mxu1 %vm876_vm2, %v723_v9 }
 0x294   : > { %v1091_v28 = vpop.permute.xlu2 %1090 }
 0x29d   : > { %v1097_v5 = vpop.permute.xlu1 %1096 }
 0x2e9   : > { %v958_v21 = vpop.f32.mrf.mxu3 }
 0x2ea   : > { %v1006_v22 = vsel %vm993_vm3, %v958_v21, -inf }
 0x2ee   : > { %v900_v10 = vpop.f32.mrf.mxu1 }
 0x2ef   : > { %v994_v12 = vsel %vm993_vm3, %v900_v10, -inf }
 0x2f0   : > { %995 = vmax.xlane.f32.xlu2 %v994_v12 }
 0x2f4   : > { %v929_v19 = vpop.f32.mrf.mxu2 }
 0x2f5   : > { %v1000_v20 = vsel %vm993_vm3, %v929_v19, -inf }
 0x2f6   : > { %v903_v14 = vpop.f32.mrf.mxu1 }
 0x2f7   : > { %v997_v15 = vsel %vm993_vm3, %v903_v14, -inf }
 0x2f8   : > { %998 = vmax.xlane.f32.xlu0 %v997_v15 }
 0x2fc   : > { %v932_v25 = vpop.f32.mrf.mxu2 }
 0x2fd   : > { %v1003_v26 = vsel %vm993_vm3, %v932_v25, -inf }
 0x2fe   : > { %v987_v16 = vpop.f32.mrf.mxu1 }
 0x2ff   : > { %v1012_v11 = vsel %vm993_vm3, %v987_v16, -inf }
 0x300   : > { %1013 = vmax.xlane.f32.xlu0 %v1012_v11 }
 0x306   : > { %v990_v23 = vpop.f32.mrf.mxu1 }
 0x307   : > { %v1015_v24 = vsel %vm993_vm3, %v990_v23, -inf }
 0x308   : > { %1088 = vrot.lane.b32.xlu2 %v8901_v18, %s8654_s6  ;;  %1001 = vmax.xlane.f32.xlu0 %v1000_v20  ;;  %v1087_v18 = vpop.permute.xlu0 %1086 }
 0x310   : > { %1007 = vmax.xlane.f32.xlu0 %v1006_v22 }
 0x318   : > { %1016 = vmax.xlane.f32.xlu0 %v1015_v24 }
 0x320   : > { %1004 = vmax.xlane.f32.xlu0 %v1003_v26 }
 0x334   : > { %1092 = vrot.lane.b32.xlu0 %v8892_v13, %s8654_s6  ;;  %v961_v13 = vpop.f32.mrf.mxu3 }
 0x335   : > { %v1009_v41 = vsel %vm993_vm3, %v961_v13, -inf }
 0x363   : > { %v996_v29 = vpop.xlane.xlu2 %995 }
 0x364   : > { %v1018_v30 = vsub.f32 %v900_v10, %v996_v29 }
 0x366   : > { %v1026_v31 = vmul.f32 1.442695, %v1018_v30 }
 0x368   : > { %8278 = vpow2.f32 %v1026_v31 }
 0x36b   : > { %v999_v32 = vpop.xlane.xlu0 %998  ;;  %v1089_v3 = vpop.permute.xlu2 %1088 }
 0x36c   : > { %v1019_v33 = vsub.f32 %v903_v14, %v999_v32 }
 0x36e   : > { %v9030_v34 = vpop.eup %8278  ;;  %v1028_v35 = vmul.f32 1.442695, %v1019_v33 }
 0x36f   : > { %v1042_v36 = vsel %vm993_vm3, %v9030_v34, 0.0 }
 0x370   : > { %8280 = vpow2.f32 %v1028_v35  ;;  %1043 = vadd.xlane.f32.xlu1 %v1042_v36 }
 0x373   : > { %v1014_v37 = vpop.xlane.xlu0 %1013 }
 0x374   : > { %v1024_v38 = vsub.f32 %v987_v16, %v1014_v37 }
 0x376   : > { %v8281_v39 = vpop.eup %8280  ;;  %v1038_v40 = vmul.f32 1.442695, %v1024_v38 }
 0x377   : > { %v1045_v43 = vsel %vm993_vm3, %v8281_v39, 0.0 }
 0x378   : > { %8282 = vpow2.f32 %v1038_v40  ;;  %1010 = vmax.xlane.f32.xlu1 %v1009_v41  ;;  %1046 = vadd.xlane.f32.xlu0 %v1045_v43 }
 0x37b   : > { %v1002_v44 = vpop.xlane.xlu0 %1001 }
 0x37c   : > { %v1020_v45 = vsub.f32 %v929_v19, %v1002_v44 }
 0x37e   : > { %v9036_v46 = vpop.eup %8282  ;;  %v1030_v47 = vmul.f32 1.442695, %v1020_v45 }
 0x37f   : > { %v1060_v48 = vsel %vm993_vm3, %v9036_v46, 0.0 }
 0x380   : > { %8284 = vpow2.f32 %v1030_v47  ;;  %1061 = vadd.xlane.f32.xlu2 %v1060_v48 }
 0x383   : > { %v1008_v49 = vpop.xlane.xlu0 %1007 }
 0x384   : > { %v1022_v50 = vsub.f32 %v958_v21, %v1008_v49 }
 0x386   : > { %v9040_v51 = vpop.eup %8284  ;;  %v1034_v52 = vmul.f32 1.442695, %v1022_v50 }
 0x387   : > { %v1048_v53 = vsel %vm993_vm3, %v9040_v51, 0.0 }
 0x388   : > { %8286 = vpow2.f32 %v1034_v52  ;;  %1049 = vadd.xlane.f32.xlu1 %v1048_v53 }
 0x38b   : > { %v1017_v54 = vpop.xlane.xlu0 %1016 }
 0x38c   : > { %v1025_v55 = vsub.f32 %v990_v23, %v1017_v54 }
 0x38e   : > { %v9044_v56 = vpop.eup %8286  ;;  %v1040_v57 = vmul.f32 1.442695, %v1025_v55 }
 0x38f   : > { %v1054_v58 = vsel %vm993_vm3, %v9044_v56, 0.0 }
 0x390   : > { %8288 = vpow2.f32 %v1040_v57  ;;  %1055 = vadd.xlane.f32.xlu2 %v1054_v58 }
 0x393   : > { %v1005_v59 = vpop.xlane.xlu0 %1004 }
 0x394   : > { %v1021_v60 = vsub.f32 %v932_v25, %v1005_v59 }
 0x396   : > { %v8289_v62 = vpop.eup %8288  ;;  %v1032_v63 = vmul.f32 1.442695, %v1021_v60 }
 0x397   : > { %v1063_v0 = vsel %vm993_vm3, %v8289_v62, 0.0 }
 0x398   : > { %8290 = vpow2.f32 %v1032_v63  ;;  %1064 = vadd.xlane.f32.xlu1 %v1063_v0 }
 0x39e   : > { %v8291_v1 = vpop.eup %8290 }
 0x39f   : > { %v1051_v2 = vsel %vm993_vm3, %v8291_v1, 0.0 }
 0x3a0   : > { %1052 = vadd.xlane.f32.xlu0 %v1051_v2 }
 0x3a6   : > { %v1093_v4 = vpop.permute.xlu0 %1092 }
 0x3b9   : > { %1138 = vxpose.xlu2.b32.start [1/2] (short) (narrow) %v1087_v18, 8 }
 0x3c1   : > { %1139 = vxpose.xlu2.b32.end [2/2] (short) (narrow) %v1089_v3, 8 }
 0x3c9   : > { %1170 = vxpose.xlu0.b32.start [1/2] (short) (narrow) %v1091_v28, 8 }
 0x3d1   : > { %1171 = vxpose.xlu0.b32.end [2/2] (short) (narrow) %v1093_v4, 8 }
 0x3e3   : > { %v1044_v6 = vpop.xlane.xlu1 %1043 }
 0x3eb   : > { %v1011_v7 = vpop.xlane.xlu1 %1010  ;;  %v1047_v8 = vpop.xlane.xlu0 %1046 }
 0x3ec   : > { %v1023_v9 = vsub.f32 %v961_v13, %v1011_v7  ;;  %8292 = vrcp.f32 %v1047_v8 }
 0x3ed   : > { %8294 = vrcp.f32 %v1044_v6 }
 0x3ee   : > { %v1036_v10 = vmul.f32 1.442695, %v1023_v9 }
 0x3f0   : > { %8296 = vpow2.f32 %v1036_v10 }
 0x3f2   : > { %v8293_v12 = vpop.eup %8292 }
 0x3f3   : > { %v1075_v14 = vmul.f32 %v8293_v12, %v8281_v39  ;;  %v8295_v15 = vpop.eup %8294  ;;  %v1062_v21 = vpop.xlane.xlu2 %1061 }
 0x3f4   : > { %v1074_v19 = vmul.f32 %v8295_v15, %v9030_v34 }
 0x3f5   : > { %7868 = vmatpush.xpose.msk.msrb.mxu2 %vm993_vm3, %v1075_v14 }
 0x3f6   : > { %v8297_v16 = vpop.eup %8296 }
 0x3f7   : > { %v1057_v11 = vsel %vm993_vm3, %v8297_v16, 0.0 }
 0x3f8   : > { %1058 = vadd.xlane.f32.xlu1 %v1057_v11 }
 0x3f9   : > { %7869 = vmatpush.xpose.msk.msrb.mxu2 %vm993_vm3, %v1074_v19 }
 0x3fb   : > { %v1050_v20 = vpop.xlane.xlu1 %1049 }
 0x3fc   : > { %7870 = vmatmul.msk.f32.vlgmr.msrb.gmra.mxu2 %vm993_vm3, %v9028_v27 }
 0x403   : > { %v1056_v31 = vpop.xlane.xlu2 %1055 }
 0x40b   : > { %v1065_v22 = vpop.xlane.xlu1 %1064 }
 0x40c   : > { %8298 = vrcp.f32 %v1065_v22 }
 0x40d   : > { %8300 = vrcp.f32 %v1062_v21 }
 0x412   : > { %v8299_v23 = vpop.eup %8298 }
 0x413   : > { %v1081_v24 = vmul.f32 %v8299_v23, %v8289_v62  ;;  %v1053_v25 = vpop.xlane.xlu0 %1052  ;;  %v8301_v26 = vpop.eup %8300 }
 0x414   : > { %8302 = vrcp.f32 %v1053_v25  ;;  %v1080_v28 = vmul.f32 %v8301_v26, %v9036_v46 }
 0x415   : > { %7877 = vmatpush.xpose.msk.msra.mxu2 %vm993_vm3, %v1081_v24  ;;  %8304 = vrcp.f32 %v1050_v20 }
 0x419   : > { %7878 = vmatpush.xpose.msk.msra.mxu2 %vm993_vm3, %v1080_v28 }
 0x41a   : > { %v8303_v18 = vpop.eup %8302 }
 0x41b   : > { %v1077_v29 = vmul.f32 %v8303_v18, %v8291_v1  ;;  %v8305_v27 = vpop.eup %8304 }
 0x41c   : > { %v1076_v30 = vmul.f32 %v8305_v27, %v9040_v51 }
 0x41d   : > { %7871 = vmatpush.xpose.msk.msrb.mxu3 %vm993_vm3, %v1077_v29 }
 0x421   : > { %7872 = vmatpush.xpose.msk.msrb.mxu3 %vm993_vm3, %v1076_v30 }
 0x432   : > { %1202 = vxpose.xlu1.b32.start [1/2] (short) (narrow) %v8976_v17, 8 }
 0x43a   : > { %1203 = vxpose.xlu1.b32.end [2/2] (short) (narrow) %v1097_v5, 8 }
 0x452   : > { %v1154_v32 = vpop.trf.xlu2 }
 0x453   : > { %7873 = vmatmul.msk.f32.vlgmr.msrb.gmra.mxu3 %vm993_vm3, %v1154_v32 }
 0x46b   : > { %v1059_v33 = vpop.xlane.xlu1 %1058 }
 0x46c   : > { %8306 = vrcp.f32 %v1059_v33 }
 0x46d   : > { %8308 = vrcp.f32 %v1056_v31  ;;  %v1186_v13 = vpop.trf.xlu0 }
 0x472   : > { %v8307_v34 = vpop.eup %8306 }
 0x473   : > { %v1079_v35 = vmul.f32 %v8307_v34, %v8297_v16  ;;  %v8309_v36 = vpop.eup %8308 }
 0x474   : > { %v1078_v37 = vmul.f32 %v8309_v36, %v9044_v56 }
 0x475   : > { %7874 = vmatpush.xpose.msk.msrb.mxu0 %vm993_vm3, %v1079_v35 }
 0x479   : > { %7875 = vmatpush.xpose.msk.msrb.mxu0 %vm993_vm3, %v1078_v37 }
 0x47c   : > { %7876 = vmatmul.msk.f32.vlgmr.msrb.gmra.mxu0 %vm993_vm3, %v1186_v13 }
 0x47f   : > { %v1260_v17 = vpop.f32.mrf.mxu2 }
 0x480   : > { %1350 = vxpose.xlu0.b32.start.end [1/1] (short) (narrow) %v1260_v17, 16 }
 0x4d6   : > { %v1218_v38 = vpop.trf.xlu1  ;;  %v1289_v39 = vpop.f32.mrf.mxu3 }
 0x4d7   : > { %7879 = vmatmul.msk.f32.vlgmr.msra.gmra.mxu2 %vm993_vm3, %v1218_v38  ;;  %1382 = vxpose.xlu0.b32.start.end [1/1] (short) (narrow) %v1289_v39, 16 }
 0x4f9   : > { %v1318_v40 = vpop.f32.mrf.mxu0 }
 0x4fa   : > { %1414 = vxpose.xlu2.b32.start.end [1/1] (short) (narrow) %v1318_v40, 16 }
 0x524   : > { %v1366_v43 = vpop.trf.xlu0 }
 0x525   : > { %v1480_v47 = vrot.slane %v1366_v43, 4 }
 0x52c   : > { %v1367_v45 = vpop.trf.xlu0 }
 0x52d   : > { %v1536_v52 = vrot.slane %v1367_v45, 4 }
 0x55a   : > { %v1347_v41 = vpop.f32.mrf.mxu2 }
 0x55b   : > { %1446 = vxpose.xlu2.b32.start.end [1/1] (short) (narrow) %v1347_v41, 16 }
 0x57b   : > { %v1398_v49 = vpop.trf.xlu0 }
 0x57c   : > { %v1492_v54 = vrot.slane %v1398_v49, 4 }
 0x583   : > { %v1399_v4 = vpop.trf.xlu0 }
 0x584   : > { %v1548_v15 = vrot.slane %v1399_v4, 4 }
 0x593   : > { %v1430_v44 = vpop.trf.xlu2 }
 0x594   : > { %v1478_v48 = vrot.slane %v1430_v44, 4  ;;  %v1481_v50 = vsel %vm484_vm1, %v1430_v44, %v1480_v47 }
 0x595   : > { %v1489_v55 = vperm.slane %v1481_v50, %v8914_v42 }
 0x596   : > { %v1479_v51 = vsel %vm484_vm1, %v1478_v48, %v1366_v43 }
 0x597   : > { %v1485_v56 = vperm.slane %v1479_v51, %v8914_v42  ;;  %v1516_v63 = vrot.slane %v1489_v55, 4 }
 0x599   : > { %v1504_v1 = vrot.slane %v1485_v56, 4 }
 0x59b   : > { %v1431_v46 = vpop.trf.xlu2 }
 0x59c   : > { %v1534_v53 = vrot.slane %v1431_v46, 4  ;;  %v1537_v57 = vsel %vm484_vm1, %v1431_v46, %v1536_v52 }
 0x59d   : > { %v1545_v2 = vperm.slane %v1537_v57, %v8914_v42 }
 0x59e   : > { %v1535_v59 = vsel %vm484_vm1, %v1534_v53, %v1367_v45 }
 0x59f   : > { %v1541_v5 = vperm.slane %v1535_v59, %v8914_v42  ;;  %v1572_v21 = vrot.slane %v1545_v2, 4 }
 0x5a1   : > { %v1560_v20 = vrot.slane %v1541_v5, 4 }
 0x5f4   : > { %v1462_v58 = vpop.trf.xlu2 }
 0x5f5   : > { %v1490_v60 = vrot.slane %v1462_v58, 4  ;;  %v1493_v62 = vsel %vm484_vm1, %v1462_v58, %v1492_v54 }
 0x5f6   : > { %v1501_v0 = vperm.slane %v1493_v62, %v8914_v42 }
 0x5f7   : > { %v1491_v3 = vsel %vm484_vm1, %v1490_v60, %v1398_v49 }
 0x5f8   : > { %v1497_v6 = vperm.slane %v1491_v3, %v8914_v42  ;;  %v1514_v7 = vrot.slane %v1501_v0, 4  ;;  %v1517_v8 = vsel %vm484_vm1, %v1501_v0, %v1516_v63 }
 0x5f9   : > { %v1525_v9 = vperm.slane %v1517_v8, %v8931_v61 }
 0x5fa   : > { %v1502_v10 = vrot.slane %v1497_v6, 4  ;;  %v1505_v12 = vsel %vm484_vm1, %v1497_v6, %v1504_v1  ;;  %v1515_v14 = vsel %vm484_vm1, %v1514_v7, %v1489_v55 }
 0x5fb   : > { %v1513_v16 = vperm.slane %v1505_v12, %v8931_v61  ;;  %v1521_v11 = vperm.slane %v1515_v14, %v8931_v61  ;;  %v1532_v19 = vrot.slane %v1525_v9, 4 }
 0x5fc   : > { %v1503_v22 = vsel %vm484_vm1, %v1502_v10, %v1485_v56  ;;  %v1463_v23 = vpop.trf.xlu2 }
 0x5fd   : > { %v1509_v24 = vperm.slane %v1503_v22, %v8931_v61  ;;  %v1528_v25 = vrot.slane %v1513_v16, 4  ;;  %v1530_v26 = vrot.slane %v1521_v11, 4  ;;  %v1533_v28 = vsel %vm484_vm1, 0.0, %v1532_v19 }
 0x5fe   : > { %v1601_v18 = vsel %vm484_vm1, %v1532_v19, %v1521_v11  ;;  %v1606_v29 = vrot.slane %v1533_v28, 4  ;;  %v1546_v27 = vrot.slane %v1463_v23, 4  ;;  %v1549_v30 = vsel %vm484_vm1, %v1463_v23, %v1548_v15 }
 0x5ff   : > { %v1529_v31 = vsel %vm484_vm1, 0.0, %v1528_v25  ;;  %v1531_v32 = vsel %vm484_vm1, 0.0, %v1530_v26  ;;  %v1557_v33 = vperm.slane %v1549_v30, %v8914_v42  ;;  %v1526_v34 = vrot.slane %v1509_v24, 4 }
 0x600   : > { %v1547_v35 = vsel %vm484_vm1, %v1546_v27, %v1399_v4  ;;  %v1590_v36 = vsel %vm484_vm1, %v1528_v25, %v1509_v24  ;;  %v1595_v37 = vrot.slane %v1529_v31, 4  ;;  %v1605_v13 = vperm.slane %v1601_v18, %v8914_v42 }
 0x601   : > { %v1553_v17 = vperm.slane %v1547_v35, %v8914_v42  ;;  %v1570_v38 = vrot.slane %v1557_v33, 4  ;;  %v1573_v39 = vsel %vm484_vm1, %v1557_v33, %v1572_v21  ;;  %v1527_v40 = vsel %vm484_vm1, 0.0, %v1526_v34 }
 0x602   : > { %v1581_v41 = vperm.slane %v1573_v39, %v8931_v61  ;;  %v1594_v43 = vperm.slane %v1590_v36, %v8914_v42  ;;  %v1596_v44 = vsel %vm484_vm1, %v1595_v37, %v1527_v40  ;;  %v1607_v45 = vsel %vm484_vm1, %v1606_v29, %v1531_v32 }
 0x603   : > { %v1558_v46 = vrot.slane %v1553_v17, 4  ;;  %v1561_v47 = vsel %vm484_vm1, %v1553_v17, %v1560_v20  ;;  %v1571_v48 = vsel %vm484_vm1, %v1570_v38, %v1545_v2  ;;  %v1600_v49 = vperm.slane %v1596_v44, %v8914_v42 }
 0x604   : > { %v1569_v50 = vperm.slane %v1561_v47, %v8931_v61  ;;  %v1577_v51 = vperm.slane %v1571_v48, %v8931_v61  ;;  %v1588_v52 = vrot.slane %v1581_v41, 4  ;;  %v1611_v53 = vperm.slane %v1607_v45, %v8914_v42 }
 0x605   : > { %v1559_v54 = vsel %vm484_vm1, %v1558_v46, %v1541_v5  ;;  %v1614_v55 = vrot.slane %v1594_v43, 4  ;;  %v1626_v56 = vrot.slane %v1605_v13, 4  ;;  %v1612_v57 = vrot.slane %v1600_v49, 4 }
 0x606   : > { %v1565_v58 = vperm.slane %v1559_v54, %v8931_v61  ;;  %v1584_v59 = vrot.slane %v1569_v50, 4  ;;  %v1586_v60 = vrot.slane %v1577_v51, 4  ;;  %v1589_v62 = vsel %vm484_vm1, 0.0, %v1588_v52  ;;  %v459_v54 = vld [vmem:[%s10483_s3] sm:$0xff] }
 0x607   : > { %v1615_v63 = vsel %vm484_vm1, %v1600_v49, %v1614_v55  ;;  %v1627_v0 = vsel %vm484_vm1, %v1611_v53, %v1626_v56  ;;  %v1613_v1 = vsel %vm484_vm1, %v1612_v57, %v1594_v43  ;;  %v1660_v4 = vrot.slane %v1589_v62, 4 }
 0x608   : > { %v1582_v2 = vrot.slane %v1565_v58, 4  ;;  %v1585_v3 = vsel %vm484_vm1, 0.0, %v1584_v59  ;;  %v1623_v5 = vperm.slane %v1615_v63, %v8931_v61  ;;  %v1635_v7 = vperm.slane %v1627_v0, %v8931_v61 }
 0x609   : > { %v1649_v6 = vrot.slane %v1585_v3, 4  ;;  %v1619_v8 = vperm.slane %v1613_v1, %v8931_v61  ;;  %v1624_v9 = vrot.slane %v1611_v53, 4  ;;  %v1587_v10 = vsel %vm484_vm1, 0.0, %v1586_v60  ;;  %v460_v53 = vld [vmem:[%s10483_s3 + $0x8] sm:$0xff] }
 0x60a   : > { %v1642_v12 = vrot.slane %v1623_v5, 4  ;;  %v1583_v14 = vsel %vm484_vm1, 0.0, %v1582_v2  ;;  %v1655_v15 = vsel %vm484_vm1, %v1588_v52, %v1577_v51  ;;  %v1640_v16 = vrot.slane %v1635_v7, 4  ;;  %v462_v51 = vld [vmem:[%s10483_s3 + $0x18] sm:$0xff]  ;;  %v461_v52 = vld [vmem:[%s10483_s3 + $0x10] sm:$0xff] }
 0x60b   : > { %v1625_v11 = vsel %vm484_vm1, %v1624_v9, %v1605_v13  ;;  %v1638_v19 = vrot.slane %v1619_v8, 4  ;;  %v1644_v20 = vsel %vm484_vm1, %v1584_v59, %v1565_v58  ;;  %v1650_v23 = vsel %vm484_vm1, %v1649_v6, %v1583_v14  ;;  %1748 = vmatpush.msra.mxu3 %v462_v51 }
 0x60c   : > { %v1643_v21 = vsel %vm484_vm1, %v1635_v7, %v1642_v12  ;;  %v1631_v22 = vperm.slane %v1625_v11, %v8931_v61  ;;  %v1659_v24 = vperm.slane %v1655_v15, %v8914_v42  ;;  %v1641_v25 = vsel %vm484_vm1, %v1640_v16, %v1623_v5  ;;  %v8442_v15 = vld [vmem:[%s8836_s16 + $0x8] sm:$0xff] }
 0x60d   : > { %1716 = vrot.lane.b32.xlu0 %v1643_v21, %s8657_s18  ;;  %v1654_v26 = vperm.slane %v1650_v23, %v8914_v42  ;;  %v1661_v28 = vsel %vm484_vm1, %v1660_v4, %v1587_v10  ;;  %1708 = vrot.lane.b32.xlu2 %v1641_v25, %s8658_s11  ;;  %v1648_v30 = vperm.slane %v1644_v20, %v8914_v42  ;;  %v9175_v4 = vld [vmem:[#allocation9] sm:$0xff] }
 0x60e   : > { %v1636_v18 = vrot.slane %v1631_v22, 4  ;;  %v1639_v29 = vsel %vm484_vm1, %v1631_v22, %v1638_v19  ;;  %v1665_v27 = vperm.slane %v1661_v28, %v8914_v42  ;;  %v1680_v32 = vrot.slane %v1659_v24, 4  ;;  %1749 = vmatpush.msra.mxu3 %v461_v52 }
 0x60f   : > { %1700 = vrot.lane.b32.xlu1 %v1639_v29, %s8659_s15  ;;  %v1666_v31 = vrot.slane %v1654_v26, 4  ;;  %v1668_v17 = vrot.slane %v1648_v30, 4  ;;  %v1729_v5 = vperm.slane %v9175_v4, 1  ;;  %v8660_v19 = vmov 32.0  }
 0x610   : > { %v1678_v33 = vrot.slane %v1665_v27, 4  ;;  %v1637_v34 = vsel %vm484_vm1, %v1636_v18, %v1619_v8  ;;  %v1681_v38 = vsel %vm484_vm1, %v1665_v27, %v1680_v32  ;;  %1750 = vmatpush.msra.mxu3 %v460_v53  ;;  %v8441_v8 = vld [vmem:[%s8836_s16] sm:$0xff]  ;;  %8310 = vrcp.f32 %v8660_v19 }
 0x611   : > { %v1667_v35 = vsel %vm484_vm1, %v1666_v31, %v1648_v30  ;;  %v1689_v43 = vperm.slane %v1681_v38, %v8931_v61  ;;  %v1669_v44 = vsel %vm484_vm1, %v1654_v26, %v1668_v17  ;;  %v1819_v17 = vld [vmem:[#allocation6 + $0x8] sm:$0xff] }
 0x612   : > { %v1673_v36 = vperm.slane %v1667_v35, %v8931_v61  ;;  %v1679_v37 = vsel %vm484_vm1, %v1678_v33, %v1659_v24  ;;  %v1677_v46 = vperm.slane %v1669_v44, %v8931_v61  ;;  %1751 = vmatpush.msra.mxu3 %v459_v54  ;;  %v1821_v35 = vld [vmem:[#allocation6 + $0x18] sm:$0xff] }
 0x613   : > { %v1685_v13 = vperm.slane %v1679_v37, %v8931_v61  ;;  %v1694_v47 = vrot.slane %v1689_v43, 4  ;;  %1849 = vmatpush.msra.mxu0 %v1821_v35 }
 0x614   : > { %v1692_v39 = vrot.slane %v1673_v36, 4  ;;  %v1696_v49 = vrot.slane %v1677_v46, 4 }
 0x615   : > { %v1690_v40 = vrot.slane %v1685_v13, 4  ;;  %v1695_v48 = vsel %vm484_vm1, %v1694_v47, %v1677_v46  ;;  %v1829_v46 = vld [vmem:[%s10485_s5 + $0x38] sm:$0xff]  ;;  %v1828_v47 = vld [vmem:[%s10485_s5 + $0x30] sm:$0xff] }
 0x616   : > { %v1693_v41 = vsel %vm484_vm1, %v1685_v13, %v1692_v39  ;;  %v1697_v50 = vsel %vm484_vm1, %v1689_v43, %v1696_v49  ;;  %v8311_v20 = vpop.eup %8310  ;;  %v1818_v39 = vld [vmem:[#allocation6] sm:$0xff]  ;;  %1878 = vmatpush.msra.mxu1 %v1829_v46  ;;  %v1812_v49 = vperm.slane %v9175_v4, 4  ;;  %v7886_v46 = vld [vmem:[%s10482_s2 + $0x20] sm:$0xff] }
 0x617   : > { %1702 = vrot.lane.b32.xlu1 %v1693_v41, %s8659_s15  ;;  %v1691_v45 = vsel %vm484_vm1, %v1690_v40, %v1673_v36  ;;  %v1768_v21 = vmul.f32 32.0, %v8311_v20  ;;  %vm1772_vm5 = vweird.f32 %v8311_v20  ;;  %v1820_v36 = vld [vmem:[#allocation6 + $0x10] sm:$0xff] }
 0x618   : > { %1850 = vmatpush.msra.mxu0 %v1820_v36  ;;  %1879 = vmatpush.msra.mxu1 %v1828_v47 }
 0x619   : > { %v1769_v22 = vsub.f32 1.0, %v1768_v21 }
 0x61a   : > { %1851 = vmatpush.msra.mxu0 %v1819_v17 }
 0x61b   : > { %v1770_v23 = vmul.f32 %v8311_v20, %v1769_v22  ;;  %v1862_v22 = vperm.slane %v9175_v4, 3 }
 0x61c   : > { %1852 = vmatpush.msra.mxu0 %v1818_v39  ;;  %v7889_v39 = vld [vmem:[%s10482_s2 + $0x38] sm:$0xff] }
 0x61d   : > { %v1771_v24 = vadd.f32 %v8311_v20, %v1770_v23  ;;  %1969 = vmatpush.msrb.mxu2 %v7889_v39 }
 0x61f   : > { %1710 = vrot.lane.b32.xlu1 %v1695_v48, %s8658_s11  ;;  %v9182_v25 = vsel %vm1772_vm5, %v8311_v20, %v1771_v24 }
 0x627   : > { %1718 = vrot.lane.b32.xlu1 %v1697_v50, %s8657_s18  ;;  %v1827_v50 = vld [vmem:[%s10485_s5 + $0x28] sm:$0xff] }
 0x628   : > { %1880 = vmatpush.msra.mxu1 %v1827_v50 }
 0x667   : > { %v1709_v56 = vpop.permute.xlu2 %1708 }
 0x67f   : > { %v1717_v58 = vpop.permute.xlu0 %1716 }
 0x681   : > { %v1701_v55 = vpop.permute.xlu1 %1700 }
 0x682   : > { %v1722_v57 = vsel %vm876_vm2, %v1637_v34, %v1701_v55  ;;  %v1815_v55 = vperm.slane %v9175_v4, 5 }
 0x683   : > { %v1724_v59 = vsel %vm993_vm3, %v1722_v57, %v1709_v56  ;;  %v1826_v56 = vld [vmem:[%s10485_s5 + $0x20] sm:$0xff] }
 0x684   : > { %v1727_v60 = vsel %vm1726_vm4, %v1724_v59, %v1717_v58  ;;  %v1825_v59 = vld [vmem:[%s10485_s5 + $0x18] sm:$0xff]  ;;  %1881 = vmatpush.msra.mxu1 %v1826_v56 }
 0x685   : > { %7880 = vmatmul.msk.f32.vlgmr.msra.gmra.mxu3 %vm429_vm0, %v1727_v60 }
 0x686   : > { %1882 = vmatpush.msra.mxu1 %v1825_v59 }
 0x689   : > { %v1703_v62 = vpop.permute.xlu1 %1702 }
 0x68a   : > { %v1723_v0 = vsel %vm876_vm2, %v1691_v45, %v1703_v62 }
 0x691   : > { %v1711_v63 = vpop.permute.xlu1 %1710 }
 0x692   : > { %v1725_v1 = vsel %vm993_vm3, %v1723_v0, %v1711_v63 }
 0x699   : > { %v1719_v2 = vpop.permute.xlu1 %1718 }
 0x69a   : > { %v1728_v3 = vsel %vm1726_vm4, %v1725_v1, %v1719_v2 }
 0x69b   : > { %7881 = vmatmul.msk.f32.gmra.mxu3 %vm429_vm0, %v1728_v3 }
 0x708   : > { %v1753_v6 = vpop.f32.mrf.mxu3 }
 0x709   : > { %v1754_v7 = vadd.f32 %v1753_v6, %v1729_v5 }
 0x70b   : > { %v1759_v9 = vadd.f32 %v8441_v8, %v1754_v7 }
 0x70d   : > { %v1761_v10 = vsel %vm429_vm0, %v1759_v9, 0.0 }
 0x70e   : > { %1762 = vadd.xlane.f32.xlu1 %v1761_v10  ;;  %v1823_v10 = vld [vmem:[%s10485_s5 + $0x8] sm:$0xff] }
 0x71e   : > { %v1756_v12 = vpop.f32.mrf.mxu3 }
 0x71f   : > { %v1757_v14 = vadd.f32 %v1756_v12, %v1729_v5  ;;  %v1822_v12 = vld [vmem:[%s10485_s5] sm:$0xff] }
 0x721   : > { %v1760_v16 = vadd.f32 %v8442_v15, %v1757_v14  ;;  %v1830_v14 = vperm.slane %v9175_v4, 2 }
 0x723   : > { %v1764_v11 = vsel %vm429_vm0, %v1760_v16, 0.0 }
 0x724   : > { %1765 = vadd.xlane.f32.xlu2 %v1764_v11 }
 0x781   : > { %v1763_v26 = vpop.xlane.xlu1 %1762 }
 0x782   : > { %v1774_v28 = vmul.f32 %v9182_v25, %v1763_v26 }
 0x784   : > { %v1776_v18 = vsub.f32 %v1759_v9, %v1774_v28  ;;  %v1824_v9 = vld [vmem:[%s10485_s5 + $0x10] sm:$0xff] }
 0x785   : > { %1883 = vmatpush.msra.mxu1 %v1824_v9  ;;  %v417_v9 = vld [vmem:[#allocation9 + $0x8] sm:$0xff] }
 0x786   : > { %v1778_v29 = vmul.f32 %v1776_v18, %v1776_v18 }
 0x787   : > { %1884 = vmatpush.msra.mxu1 %v1823_v10  ;;  %v1950_v10 = vperm.slane %v417_v9, 0 }
 0x788   : > { %v1780_v27 = vsel %vm429_vm0, %v1778_v29, 0.0 }
 0x789   : > { %1781 = vadd.xlane.f32.xlu0 %v1780_v27  ;;  %1885 = vmatpush.msra.mxu1 %v1822_v12 }
 0x797   : > { %v1766_v30 = vpop.xlane.xlu2 %1765 }
 0x798   : > { %v1775_v31 = vmul.f32 %v9182_v25, %v1766_v30 }
 0x79a   : > { %v1777_v32 = vsub.f32 %v1760_v16, %v1775_v31 }
 0x79c   : > { %v1779_v33 = vmul.f32 %v1777_v32, %v1777_v32 }
 0x79e   : > { %v1783_v34 = vsel %vm429_vm0, %v1779_v33, 0.0 }
 0x79f   : > { %1784 = vadd.xlane.f32.xlu1 %v1783_v34 }
 0x7fc   : > { %v1782_v37 = vpop.xlane.xlu0 %1781 }
 0x7fd   : > { %v1786_v13 = vmul.f32 %v1782_v37, %v9182_v25 }
 0x7ff   : > { %v1788_v38 = vadd.f32 1e-05, %v1786_v13 }
 0x801   : > { %8312 = vrsqrt.f32 %v1788_v38  ;;  %vm1796_vm7 = vweird.f32 %v1788_v38 }
 0x807   : > { %v8313_v40 = vpop.eup %8312 }
 0x808   : > { %v1791_v41 = vmul.f32 %v8313_v40, %v1788_v38  ;;  %vm1797_vm6 = vweird.f32 %v8313_v40 }
 0x809   : > { %vm1798_vm8 = vmor %vm1796_vm7, %vm1797_vm6 }
 0x80a   : > { %v1792_v43 = vmul.f32 %v8313_v40, %v1791_v41 }
 0x80c   : > { %v1793_v44 = vmul.f32 0.5, %v1792_v43 }
 0x80e   : > { %v1794_v45 = vsub.f32 1.5, %v1793_v44  ;;  %v7887_v44 = vld [vmem:[%s10482_s2 + $0x28] sm:$0xff] }
 0x810   : > { %v1795_v48 = vmul.f32 %v8313_v40, %v1794_v45 }
 0x812   : > { %v1799_v51 = vsel %vm1798_vm8, %v8313_v40, %v1795_v48  ;;  %v1785_v52 = vpop.xlane.xlu1 %1784  ;;  %v7888_v40 = vld [vmem:[%s10482_s2 + $0x30] sm:$0xff] }
 0x813   : > { %v1810_v53 = vmul.f32 %v1799_v51, %v1776_v18  ;;  %v1787_v54 = vmul.f32 %v1785_v52, %v9182_v25  ;;  %1970 = vmatpush.msrb.mxu2 %v7888_v40 }
 0x815   : > { %v1813_v57 = vmul.f32 %v1812_v49, %v1810_v53  ;;  %v1789_v58 = vadd.f32 1e-05, %v1787_v54  ;;  %1971 = vmatpush.msrb.mxu2 %v7887_v44  ;;  %v1939_v53 = vperm.slane %v9175_v4, 6 }
 0x817   : > { %8314 = vrsqrt.f32 %v1789_v58  ;;  %v1816_v60 = vadd.f32 %v1815_v55, %v1813_v57  ;;  %vm1806_vm10 = vweird.f32 %v1789_v58  ;;  %1972 = vmatpush.msrb.mxu2 %v7886_v46 }
 0x819   : > { %7882 = vmatmul.msk.f32.vlgmr.msra.gmra.mxu0 %vm429_vm0, %v1816_v60 }
 0x81d   : > { %v8315_v62 = vpop.eup %8314 }
 0x81e   : > { %v1801_v63 = vmul.f32 %v8315_v62, %v1789_v58  ;;  %vm1807_vm9 = vweird.f32 %v8315_v62  ;;  %v1942_v58 = vperm.slane %v9175_v4, 7 }
 0x81f   : > { %vm1808_vm11 = vmor %vm1806_vm10, %vm1807_vm9 }
 0x820   : > { %v1802_v0 = vmul.f32 %v8315_v62, %v1801_v63 }
 0x822   : > { %v1803_v1 = vmul.f32 0.5, %v1802_v0 }
 0x824   : > { %v1804_v2 = vsub.f32 1.5, %v1803_v1 }
 0x826   : > { %v1805_v3 = vmul.f32 %v8315_v62, %v1804_v2 }
 0x828   : > { %v1809_v5 = vsel %vm1808_vm11, %v8315_v62, %v1805_v3 }
 0x829   : > { %v1811_v6 = vmul.f32 %v1809_v5, %v1777_v32 }
 0x82b   : > { %v1814_v7 = vmul.f32 %v1812_v49, %v1811_v6 }
 0x82d   : > { %v1817_v8 = vadd.f32 %v1815_v55, %v1814_v7 }
 0x82f   : > { %7883 = vmatmul.msk.f32.gmra.mxu0 %vm429_vm0, %v1817_v8 }
 0x896   : > { %v1854_v15 = vpop.f32.mrf.mxu0 }
 0x897   : > { %v1855_v16 = vadd.f32 %v1854_v15, %v1830_v14 }
 0x899   : > { %v1860_v11 = vmax.f32 %v1855_v16, 0.0 }
 0x89b   : > { %7884 = vmatmul.msk.f32.vlgmr.msra.gmra.mxu1 %vm1863_vm12, %v1860_v11 }
 0x8ac   : > { %v1857_v19 = vpop.f32.mrf.mxu0 }
 0x8ad   : > { %v1858_v20 = vadd.f32 %v1857_v19, %v1830_v14 }
 0x8af   : > { %v1861_v21 = vmax.f32 %v1858_v20, 0.0 }
 0x8b1   : > { %7885 = vmatmul.msk.f32.gmra.mxu1 %vm1863_vm12, %v1861_v21 }
 0x918   : > { %v1887_v23 = vpop.f32.mrf.mxu1 }
 0x919   : > { %v1888_v24 = vadd.f32 %v1887_v23, %v1862_v22 }
 0x91b   : > { %v1893_v26 = vadd.f32 %v1888_v24, %v1816_v60 }
 0x91d   : > { %v1895_v28 = vsel %vm429_vm0, %v1893_v26, 0.0 }
 0x91e   : > { %1896 = vadd.xlane.f32.xlu2 %v1895_v28 }
 0x92e   : > { %v1890_v18 = vpop.f32.mrf.mxu1 }
 0x92f   : > { %v1891_v29 = vadd.f32 %v1890_v18, %v1862_v22 }
 0x931   : > { %v1894_v27 = vadd.f32 %v1891_v29, %v1817_v8 }
 0x933   : > { %v1898_v30 = vsel %vm429_vm0, %v1894_v27, 0.0 }
 0x934   : > { %1899 = vadd.xlane.f32.xlu1 %v1898_v30 }
 0x991   : > { %v1897_v31 = vpop.xlane.xlu2 %1896 }
 0x992   : > { %v1901_v32 = vmul.f32 %v1897_v31, %v9182_v25 }
 0x994   : > { %v1903_v33 = vsub.f32 %v1893_v26, %v1901_v32 }
 0x996   : > { %v1905_v34 = vmul.f32 %v1903_v33, %v1903_v33 }
 0x998   : > { %v1907_v35 = vsel %vm429_vm0, %v1905_v34, 0.0 }
 0x999   : > { %1908 = vadd.xlane.f32.xlu2 %v1907_v35 }
 0x9a7   : > { %v1900_v36 = vpop.xlane.xlu1 %1899 }
 0x9a8   : > { %v1902_v37 = vmul.f32 %v1900_v36, %v9182_v25 }
 0x9aa   : > { %v1904_v13 = vsub.f32 %v1894_v27, %v1902_v37 }
 0x9ac   : > { %v1906_v17 = vmul.f32 %v1904_v13, %v1904_v13 }
 0x9ae   : > { %v1910_v38 = vsel %vm429_vm0, %v1906_v17, 0.0 }
 0x9af   : > { %1911 = vadd.xlane.f32.xlu0 %v1910_v38 }
 0xa0c   : > { %v1909_v41 = vpop.xlane.xlu2 %1908 }
 0xa0d   : > { %v1913_v43 = vmul.f32 %v1909_v41, %v9182_v25 }
 0xa0f   : > { %v1915_v45 = vadd.f32 1e-05, %v1913_v43 }
 0xa11   : > { %8316 = vrsqrt.f32 %v1915_v45  ;;  %vm1923_vm14 = vweird.f32 %v1915_v45 }
 0xa17   : > { %v8317_v47 = vpop.eup %8316 }
 0xa18   : > { %v1918_v48 = vmul.f32 %v8317_v47, %v1915_v45  ;;  %vm1924_vm13 = vweird.f32 %v8317_v47 }
 0xa19   : > { %vm1925_vm15 = vmor %vm1923_vm14, %vm1924_vm13 }
 0xa1a   : > { %v1919_v49 = vmul.f32 %v8317_v47, %v1918_v48 }
 0xa1c   : > { %v1920_v50 = vmul.f32 0.5, %v1919_v49 }
 0xa1e   : > { %v1921_v51 = vsub.f32 1.5, %v1920_v50 }
 0xa20   : > { %v1922_v52 = vmul.f32 %v8317_v47, %v1921_v51 }
 0xa22   : > { %v1926_v54 = vsel %vm1925_vm15, %v8317_v47, %v1922_v52  ;;  %v1912_v55 = vpop.xlane.xlu0 %1911 }
 0xa23   : > { %v1937_v56 = vmul.f32 %v1926_v54, %v1903_v33  ;;  %v1914_v57 = vmul.f32 %v1912_v55, %v9182_v25 }
 0xa25   : > { %v1940_v59 = vmul.f32 %v1939_v53, %v1937_v56  ;;  %v1916_v60 = vadd.f32 1e-05, %v1914_v57 }
 0xa27   : > { %8318 = vrsqrt.f32 %v1916_v60  ;;  %v9244_v62 = vadd.f32 %v1942_v58, %v1940_v59  ;;  %vm1933_vm6 = vweird.f32 %v1916_v60 }
 0xa29   : > { %7890 = vmatmul.msk.f32.vlgmr.msrb.gmra.mxu2 %vm429_vm0, %v9244_v62 }
 0xa2d   : > { %v8319_v63 = vpop.eup %8318 }
 0xa2e   : > { %v1928_v0 = vmul.f32 %v8319_v63, %v1916_v60  ;;  %vm1934_vm5 = vweird.f32 %v8319_v63 }
 0xa2f   : > { %vm1935_vm7 = vmor %vm1933_vm6, %vm1934_vm5 }
 0xa30   : > { %v1929_v1 = vmul.f32 %v8319_v63, %v1928_v0 }
 0xa32   : > { %v1930_v2 = vmul.f32 0.5, %v1929_v1 }
 0xa34   : > { %v1931_v3 = vsub.f32 1.5, %v1930_v2 }
 0xa36   : > { %v1932_v5 = vmul.f32 %v8319_v63, %v1931_v3 }
 0xa38   : > { %v1936_v6 = vsel %vm1935_vm7, %v8319_v63, %v1932_v5 }
 0xa39   : > { %v1938_v7 = vmul.f32 %v1936_v6, %v1904_v13 }
 0xa3b   : > { %v1941_v4 = vmul.f32 %v1939_v53, %v1938_v7 }
 0xa3d   : > { %v9248_v8 = vadd.f32 %v1942_v58, %v1941_v4 }
 0xa3f   : > { %7891 = vmatmul.msk.f32.gmra.mxu2 %vm429_vm0, %v9248_v8 }
 0xaac   : > { %v1974_v12 = vpop.f32.mrf.mxu2 }
 0xaad   : > { %v1975_v14 = vadd.f32 %v1974_v12, %v1950_v10 }
 0xaaf   : > { %1987 = vrot.lane.b32.xlu2 %v1975_v14, %s8651_s30  ;;  %1999 = vrot.lane.b32.xlu1 %v1975_v14, %s8650_s21  ;;  %v2007_v39 = vrot.slane %v1975_v14, 4 }
 0xac2   : > { %v1977_v15 = vpop.f32.mrf.mxu2 }
 0xac3   : > { %v9254_v16 = vadd.f32 %v1977_v15, %v1950_v10 }
 0xac5   : > { %1995 = vrot.lane.b32.xlu2 %v9254_v16, %s8652_s27  ;;  %1989 = vrot.lane.b32.xlu1 %v9254_v16, %s8651_s30  ;;  %v2063_v48 = vrot.slane %v9254_v16, 4 }
 0xac6   : > { %2001 = vrot.lane.b32.xlu0 %v9254_v16, %s8650_s21 }
 0xace   : > { %1993 = vrot.lane.b32.xlu0 %v1975_v14, %s8652_s27 }
 0xb09   : > { %v9263_v11 = vpop.permute.xlu2 %1987 }
 0xb0a   : > { %v8179_v19 = vpack.i.bf16 %v9254_v16, %v9263_v11  ;;  %v2019_v51 = vrot.slane %v9263_v11, 4 }
 0xb0c   : > { %8180 = vrot.lane.b32.xlu0 %v8179_v19, %s8653_s7 }
 0xb1f   : > { %v1996_v20 = vpop.permute.xlu2 %1995 }
 0xb20   : > { %2255 = vrot.lane.b32.xlu0 %v1996_v20, %s8653_s7  ;;  %v2061_v13 = vrot.slane %v1996_v20, 4  ;;  %v2064_v54 = vsel %vm484_vm1, %v1996_v20, %v2063_v48 }
 0xb21   : > { %v9269_v21 = vpop.permute.xlu1 %1999  ;;  %v2072_v60 = vperm.slane %v2064_v54, %v8914_v42 }
 0xb22   : > { %v8174_v22 = vpack.i.bf16 %v9269_v21, %v1975_v14  ;;  %v2062_v40 = vsel %vm484_vm1, %v2061_v13, %v9254_v16  ;;  %v2017_v41 = vrot.slane %v9269_v21, 4  ;;  %v2020_v56 = vsel %vm484_vm1, %v9269_v21, %v2019_v51 }
 0xb23   : > { %v2068_v46 = vperm.slane %v2062_v40, %v8914_v42  ;;  %v2028_v2 = vperm.slane %v2020_v56, %v8914_v42  ;;  %v2099_v4 = vrot.slane %v2072_v60, 4 }
 0xb24   : > { %8175 = vrot.lane.b32.xlu1 %v8174_v22, %s8653_s7  ;;  %v2018_v49 = vsel %vm484_vm1, %v2017_v41, %v9263_v11 }
 0xb25   : > { %v2087_v55 = vrot.slane %v2068_v46, 4  ;;  %v2024_v57 = vperm.slane %v2018_v49, %v8914_v42 }
 0xb27   : > { %v2029_v9 = vrot.slane %v2024_v57, 4 }
 0xb37   : > { %v9273_v23 = vpop.permute.xlu1 %1989 }
 0xb38   : > { %v2002_v24 = vpop.permute.xlu0 %2001  ;;  %v2075_v47 = vrot.slane %v9273_v23, 4 }
 0xb39   : > { %v8184_v26 = vpack.i.bf16 %v9273_v23, %v2002_v24  ;;  %v2073_v17 = vrot.slane %v2002_v24, 4 }
 0xb3a   : > { %v2076_v58 = vsel %vm484_vm1, %v2002_v24, %v2075_v47 }
 0xb3b   : > { %8185 = vrot.lane.b32.xlu2 %v8184_v26, %s8653_s7  ;;  %v2074_v45 = vsel %vm484_vm1, %v2073_v17, %v9273_v23  ;;  %v2084_v3 = vperm.slane %v2076_v58, %v8914_v42 }
 0xb3c   : > { %v2080_v52 = vperm.slane %v2074_v45, %v8914_v42 }
 0xb3d   : > { %v2097_v12 = vrot.slane %v2084_v3, 4 }
 0xb3e   : > { %v2085_v63 = vrot.slane %v2080_v52, 4  ;;  %v2088_v0 = vsel %vm484_vm1, %v2080_v52, %v2087_v55 }
 0xb3f   : > { %v2096_v5 = vperm.slane %v2088_v0, %v8931_v61 }
 0xb40   : > { %v9277_v28 = vpop.permute.xlu0 %1993  ;;  %v2086_v10 = vsel %vm484_vm1, %v2085_v63, %v2068_v46 }
 0xb41   : > { %2253 = vrot.lane.b32.xlu1 %v9277_v28, %s8653_s7  ;;  %v2005_v37 = vrot.slane %v9277_v28, 4  ;;  %v2008_v43 = vsel %vm484_vm1, %v9277_v28, %v2007_v39  ;;  %v2092_v22 = vperm.slane %v2086_v10, %v8931_v61  ;;  %v2127_v51 = vmul.f32 0.35355338, %v2096_v5 }
 0xb42   : > { %v2016_v50 = vperm.slane %v2008_v43, %v8914_v42 }
 0xb43   : > { %v2006_v38 = vsel %vm484_vm1, %v2005_v37, %v1975_v14  ;;  %v2125_v58 = vmul.f32 0.35355338, %v2092_v22  ;;  %v2189_v0 = vrot.slane %v2127_v51, 4 }
 0xb44   : > { %v2012_v44 = vperm.slane %v2006_v38, %v8914_v42  ;;  %v2043_v59 = vrot.slane %v2016_v50, 4 }
 0xb46   : > { %v2031_v53 = vrot.slane %v2012_v44, 4  ;;  %v2044_v7 = vsel %vm484_vm1, %v2028_v2, %v2043_v59  ;;  %v2030_v15 = vsel %vm484_vm1, %v2029_v9, %v2012_v44 }
 0xb47   : > { %v2052_v19 = vperm.slane %v2044_v7, %v8931_v61 }
 0xb48   : > { %v2032_v1 = vsel %vm484_vm1, %v2024_v57, %v2031_v53 }
 0xb49   : > { %v2040_v6 = vperm.slane %v2032_v1, %v8931_v61  ;;  %v2123_v59 = vmul.f32 0.35355338, %v2052_v19 }
 0xb4b   : > { %v2055_v26 = vrot.slane %v2040_v6, 4  ;;  %v2119_v46 = vmul.f32 0.35355338, %v2040_v6 }
 0xb4d   : > { %v2133_v56 = vrot.slane %v2119_v46, 4 }
 0xb7e   : > { %v8181_v18 = vpop.permute.xlu0 %8180 }
 0xb7f   : > { %v8182_v29 = vunpack.i.l.bf16 %v8181_v18  ;;  %v8183_v33 = vunpack.i.h.bf16 %v8181_v18  ;;  %v2098_v18 = vsel %vm484_vm1, %v2097_v12, %v2072_v60  ;;  %v2145_v12 = vrot.slane %v2123_v59, 4 }
 0xb81   : > { %2301 = vxpose.xlu1.b32.start [1/2] (short) (narrow) %v8182_v29, 8 }
 0xb92   : > { %v2256_v36 = vpop.permute.xlu0 %2255 }
 0xb95   : > { %v8186_v27 = vpop.permute.xlu2 %8185 }
 0xb96   : > { %v8188_v30 = vunpack.i.h.bf16 %v8186_v27  ;;  %v8176_v31 = vpop.permute.xlu1 %8175  ;;  %v8187_v32 = vunpack.i.l.bf16 %v8186_v27  ;;  %v2036_v27 = vperm.slane %v2030_v15, %v8931_v61 }
 0xb97   : > { %8190 = vxpose.xlu2.b32.start [1/2] (short) (narrow) %v8176_v31, 8  ;;  %v2059_v31 = vrot.slane %v2052_v19, 4 }
 0xb98   : > { %2302 = vxpose.xlu1.b32.end [2/2] (short) (narrow) %v8188_v30, 8  ;;  %v8191_v34 = vpack.i.bf16 %v8187_v32, %v8183_v33  ;;  %v2109_v32 = vrot.slane %v2092_v22, 4  ;;  %v2053_v13 = vrot.slane %v2036_v27, 4  ;;  %v2117_v1 = vmul.f32 0.35355338, %v2036_v27 }
 0xb99   : > { %v2060_v38 = vsel %vm484_vm1, 0.0, %v2059_v31 }
 0xb9a   : > { %v2110_v40 = vsel %vm484_vm1, 0.0, %v2109_v32  ;;  %v2054_v45 = vsel %vm484_vm1, 0.0, %v2053_v13  ;;  %v2124_v47 = vmul.f32 0.35355338, %v2060_v38 }
 0xb9b   : > { %v2126_v48 = vmul.f32 0.35355338, %v2110_v40  ;;  %v2118_v53 = vmul.f32 0.35355338, %v2054_v45 }
 0xb9c   : > { %v2151_v55 = vrot.slane %v2124_v47, 4 }
 0xb9f   : > { %8192 = vxpose.xlu2.b32.end [2/2] (short) (narrow) %v8191_v34, 8  ;;  %v2056_v34 = vsel %vm484_vm1, 0.0, %v2055_v26 }
 0xba0   : > { %v2120_v39 = vmul.f32 0.35355338, %v2056_v34 }
 0xbb3   : > { %v2254_v35 = vpop.permute.xlu1 %2253 }
 0xbb4   : > { %2333 = vxpose.xlu0.b32.start [1/2] (short) (narrow) %v2254_v35, 8  ;;  %v2104_v35 = vperm.slane %v2098_v18, %v8931_v61 }
 0xbb6   : > { %v2113_v41 = vrot.slane %v2104_v35, 4  ;;  %v2129_v27 = vmul.f32 0.35355338, %v2104_v35 }
 0xbb8   : > { %v2114_v57 = vsel %vm484_vm1, 0.0, %v2113_v41 }
 0xbbc   : > { %2334 = vxpose.xlu0.b32.end [2/2] (short) (narrow) %v2256_v36, 8 }
 0xbf2   : > { %2601 = vrot.lane.b32.xlu1 %v1975_v14, %s8654_s6  ;;  %v2100_v14 = vsel %vm484_vm1, %v2084_v3, %v2099_v4  ;;  %v2130_v3 = vmul.f32 0.35355338, %v2114_v57 }
 0xbf3   : > { %v2108_v29 = vperm.slane %v2100_v14, %v8931_v61  ;;  %v2190_v14 = vsel %vm484_vm1, %v2189_v0, %v2125_v58 }
 0xbf4   : > { %v2194_v31 = vperm.slane %v2190_v14, %v8914_v42 }
 0xbf5   : > { %v2115_v37 = vrot.slane %v2108_v29, 4  ;;  %v2131_v10 = vmul.f32 0.35355338, %v2108_v29 }
 0xbf7   : > { %v2116_v44 = vsel %vm484_vm1, 0.0, %v2115_v37 }
 0xbf8   : > { %v2132_v54 = vmul.f32 0.35355338, %v2116_v44 }
 0xbfa   : > { %2615 = vrot.lane.b32.xlu1 %v2002_v24, %s8654_s6  ;;  %v2111_v24 = vrot.slane %v2096_v5, 4  ;;  %v2207_v6 = vrot.slane %v2132_v54, 4  ;;  %v2134_v5 = vsel %vm484_vm1, %v2133_v56, %v2117_v1 }
 0xbfb   : > { %v2138_v19 = vperm.slane %v2134_v5, %v8914_v42 }
 0xbfc   : > { %v2112_v33 = vsel %vm484_vm1, 0.0, %v2111_v24  ;;  %v2208_v22 = vsel %vm484_vm1, %v2207_v6, %v2130_v3 }
 0xbfd   : > { %v2128_v17 = vmul.f32 0.35355338, %v2112_v33  ;;  %v2212_v29 = vperm.slane %v2208_v22, %v8914_v42  ;;  %v2159_v33 = vrot.slane %v2138_v19, 4 }
 0xbff   : > { %v2195_v49 = vrot.slane %v2128_v17, 4  ;;  %v2225_v17 = vrot.slane %v2212_v29, 4 }
 0xc01   : > { %v2196_v63 = vsel %vm484_vm1, %v2195_v49, %v2126_v48  ;;  %v2215_v48 = vrot.slane %v2194_v31, 4 }
 0xc02   : > { %2611 = vrot.lane.b32.xlu1 %v1996_v20, %s8654_s6  ;;  %v2041_v20 = vrot.slane %v2028_v2, 4  ;;  %v2200_v9 = vperm.slane %v2196_v63, %v8914_v42 }
 0xc04   : > { %v2042_v30 = vsel %vm484_vm1, %v2041_v20, %v2016_v50  ;;  %v2139_v50 = vrot.slane %v2120_v39, 4  ;;  %v2213_v26 = vrot.slane %v2200_v9, 4  ;;  %v2216_v58 = vsel %vm484_vm1, %v2200_v9, %v2215_v48 }
 0xc05   : > { %v2048_v36 = vperm.slane %v2042_v30, %v8931_v61  ;;  %v2201_v30 = vrot.slane %v2131_v10, 4 }
 0xc06   : > { %v2140_v60 = vsel %vm484_vm1, %v2139_v50, %v2118_v53  ;;  %v2214_v37 = vsel %vm484_vm1, %v2213_v26, %v2194_v31 }
 0xc07   : > { %v2057_v43 = vrot.slane %v2048_v36, 4  ;;  %v2144_v7 = vperm.slane %v2140_v60, %v8914_v42  ;;  %v2121_v15 = vmul.f32 0.35355338, %v2048_v36  ;;  %v2202_v13 = vsel %vm484_vm1, %v2201_v30, %v2129_v27 }
 0xc08   : > { %v2220_v39 = vperm.slane %v2214_v37, %v8931_v61  ;;  %v2206_v41 = vperm.slane %v2202_v13, %v8914_v42 }
 0xc09   : > { %v2058_v52 = vsel %vm484_vm1, 0.0, %v2057_v43  ;;  %v2157_v24 = vrot.slane %v2144_v7, 4  ;;  %v2146_v18 = vsel %vm484_vm1, %v2145_v12, %v2121_v15  ;;  %v2160_v40 = vsel %vm484_vm1, %v2144_v7, %v2159_v33 }
 0xc0a   : > { %v2122_v2 = vmul.f32 0.35355338, %v2058_v52  ;;  %v2150_v34 = vperm.slane %v2146_v18, %v8914_v42  ;;  %v2226_v45 = vsel %vm484_vm1, %v2225_v17, %v2206_v41  ;;  %v2239_v47 = vrot.slane %v2220_v39, 4 }
 0xc0b   : > { %v2158_v36 = vsel %vm484_vm1, %v2157_v24, %v2138_v19  ;;  %v2232_v50 = vperm.slane %v2226_v45, %v8931_v61  ;;  %v2227_v63 = vrot.slane %v2206_v41, 4 }
 0xc0c   : > { %v2152_v4 = vsel %vm484_vm1, %v2151_v55, %v2122_v2  ;;  %v2164_v35 = vperm.slane %v2158_v36, %v8931_v61  ;;  %v2171_v43 = vrot.slane %v2150_v34, 4  ;;  %v2224_v2 = vperm.slane %v2216_v58, %v8931_v61 }
 0xc0d   : > { %v2156_v20 = vperm.slane %v2152_v4, %v8914_v42  ;;  %v2240_v56 = vsel %vm484_vm1, %v2232_v50, %v2239_v47  ;;  %v2228_v3 = vsel %vm484_vm1, %v2212_v29, %v2227_v63  ;;  %v2237_v6 = vrot.slane %v2232_v50, 4 }
 0xc0e   : > { %v2183_v46 = vrot.slane %v2164_v35, 4  ;;  %v2243_v5 = vrot.slane %v2224_v2, 4  ;;  %v2236_v7 = vperm.slane %v2228_v3, %v8931_v61 }
 0xc0f   : > { %v2169_v32 = vrot.slane %v2156_v20, 4  ;;  %v2172_v49 = vsel %vm484_vm1, %v2156_v20, %v2171_v43  ;;  %v2238_v4 = vsel %vm484_vm1, %v2237_v6, %v2220_v39 }
 0xc10   : > { %v2180_v57 = vperm.slane %v2172_v49, %v8931_v61  ;;  %v2244_v9 = vsel %vm484_vm1, %v2236_v7, %v2243_v5  ;;  %v2241_v15 = vrot.slane %v2236_v7, 4 }
 0xc11   : > { %v2170_v38 = vsel %vm484_vm1, %v2169_v32, %v2150_v34 }
 0xc12   : > { %v2176_v44 = vperm.slane %v2170_v38, %v8931_v61  ;;  %v2185_v10 = vrot.slane %v2180_v57, 4  ;;  %v2242_v19 = vsel %vm484_vm1, %v2241_v15, %v2224_v2 }
 0xc14   : > { %v2181_v51 = vrot.slane %v2176_v44, 4  ;;  %v2184_v55 = vsel %vm484_vm1, %v2176_v44, %v2183_v46 }
 0xc16   : > { %v2182_v0 = vsel %vm484_vm1, %v2181_v51, %v2164_v35 }
 0xc2a   : > { %2603 = vrot.lane.b32.xlu0 %v9254_v16, %s8654_s6  ;;  %v2168_v16 = vperm.slane %v2160_v40, %v8931_v61 }
 0xc2c   : > { %v2187_v52 = vrot.slane %v2168_v16, 4  ;;  %v2186_v14 = vsel %vm484_vm1, %v2185_v10, %v2168_v16 }
 0xc2e   : > { %v2188_v1 = vsel %vm484_vm1, %v2180_v57, %v2187_v52 }
 0xc30   : > { %v8193_v54 = vpop.trf.xlu2 }
 0xc31   : > { %v8194_v59 = vunpack.i.l.bf16 %v8193_v54  ;;  %v8197_v60 = vunpack.i.h.bf16 %v8193_v54 }
 0xc33   : > { %2418 = vmatpush.msrb.mxu3 %v8194_v59  ;;  %2505 = vmatpush.msra.mxu2 %v8197_v60 }
 0xc34   : > { %v2317_v53 = vpop.trf.xlu1  ;;  %7896 = vmatmul.msk.f32.vlgmr.msrb.gmra.mxu3 %vm876_vm2, %v2182_v0  ;;  %7902 = vmatmul.msk.f32.vlgmr.msra.gmra.mxu2 %vm876_vm2, %v2188_v1 }
 0xc35   : > { %2447 = vmatpush.msrb.mxu0 %v2317_v53  ;;  %8045 = vmatpush.msrb.mxu1 %v2317_v53 }
 0xc36   : > { %7898 = vmatmul.msk.f32.vlgmr.msrb.gmra.mxu0 %vm876_vm2, %v2184_v55  ;;  %7899 = vmatmul.msk.f32.vlgmr.msrb.gmra.mxu1 %vm876_vm2, %v2240_v56 }
 0xc3c   : > { %7897 = vmatmul.msk.f32.gmra.mxu3 %vm876_vm2, %v2238_v4  ;;  %7903 = vmatmul.msk.f32.gmra.mxu2 %vm876_vm2, %v2244_v9 }
 0xc58   : > { %v2349_v12 = vpop.trf.xlu0 }
 0xc59   : > { %2476 = vmatpush.msra.mxu1 %v2349_v12 }
 0xc5a   : > { %7900 = vmatmul.msk.f32.vlgmr.msra.gmra.mxu1 %vm876_vm2, %v2186_v14 }
 0xc62   : > { %7901 = vmatmul.msk.f32.gmra.mxu1 %vm876_vm2, %v2242_v19 }
 0xc64   : > { %v2602_v36 = vpop.permute.xlu1 %2601 }
 0xc6c   : > { %v2616_v13 = vpop.permute.xlu1 %2615 }
 0xc74   : > { %v9395_v17 = vpop.permute.xlu1 %2611 }
 0xc9c   : > { %v2604_v37 = vpop.permute.xlu0 %2603 }
 0xcb3   : > { %v2449_v20 = vpop.f32.mrf.mxu0  ;;  %v2452_v30 = vpop.f32.mrf.mxu1 }
 0xcb4   : > { %v2519_v22 = vsel %vm993_vm3, %v2449_v20, -inf  ;;  %v2522_v33 = vsel %vm993_vm3, %v2452_v30, -inf }
 0xcb5   : > { %2520 = vmax.xlane.f32.xlu0 %v2519_v22 }
 0xcb7   : > { %v2420_v24 = vpop.f32.mrf.mxu3  ;;  %v2507_v26 = vpop.f32.mrf.mxu2 }
 0xcb8   : > { %v2531_v18 = vsel %vm993_vm3, %v2507_v26, -inf  ;;  %v2513_v27 = vsel %vm993_vm3, %v2420_v24, -inf }
 0xcb9   : > { %2514 = vmax.xlane.f32.xlu1 %v2513_v27 }
 0xcbd   : > { %2532 = vmax.xlane.f32.xlu0 %v2531_v18 }
 0xcbf   : > { %v2423_v31 = vpop.f32.mrf.mxu3  ;;  %v9387_v29 = vpop.f32.mrf.mxu2 }
 0xcc0   : > { %v2534_v32 = vsel %vm993_vm3, %v9387_v29, -inf  ;;  %v2516_v34 = vsel %vm993_vm3, %v2423_v31, -inf }
 0xcc1   : > { %2523 = vmax.xlane.f32.xlu1 %v2522_v33  ;;  %2517 = vmax.xlane.f32.xlu2 %v2516_v34 }
 0xcc5   : > { %2535 = vmax.xlane.f32.xlu0 %v2534_v32 }
 0xcd7   : > { %v2478_v63 = vpop.f32.mrf.mxu1 }
 0xcd8   : > { %v2525_v0 = vsel %vm993_vm3, %v2478_v63, -inf }
 0xcda   : > { %2607 = vrot.lane.b32.xlu1 %v9273_v23, %s8654_s6 }
 0xcdf   : > { %v2481_v1 = vpop.f32.mrf.mxu1 }
 0xce0   : > { %v2528_v2 = vsel %vm993_vm3, %v2481_v1, -inf }
 0xcea   : > { %2625 = vxpose.xlu2.b32.start [1/2] (short) (narrow) %v2602_v36, 8 }
 0xcf2   : > { %2626 = vxpose.xlu2.b32.end [2/2] (short) (narrow) %v2604_v37, 8 }
 0xd28   : > { %v2521_v23 = vpop.xlane.xlu0 %2520 }
 0xd29   : > { %v2539_v49 = vsub.f32 %v2449_v20, %v2521_v23 }
 0xd2b   : > { %v2549_v51 = vmul.f32 1.442695, %v2539_v49 }
 0xd2c   : > { %v2515_v35 = vpop.xlane.xlu1 %2514 }
 0xd2d   : > { %v2537_v38 = vsub.f32 %v2420_v24, %v2515_v35 }
 0xd2f   : > { %v2545_v39 = vmul.f32 1.442695, %v2537_v38 }
 0xd30   : > { %v2533_v52 = vpop.xlane.xlu0 %2532 }
 0xd31   : > { %8320 = vpow2.f32 %v2545_v39  ;;  %v2543_v54 = vsub.f32 %v2507_v26, %v2533_v52 }
 0xd33   : > { %v2557_v56 = vmul.f32 1.442695, %v2543_v54 }
 0xd34   : > { %v2518_v40 = vpop.xlane.xlu2 %2517  ;;  %v2524_v41 = vpop.xlane.xlu1 %2523 }
 0xd35   : > { %v2538_v43 = vsub.f32 %v2423_v31, %v2518_v40  ;;  %v2540_v16 = vsub.f32 %v2452_v30, %v2524_v41 }
 0xd37   : > { %v8321_v44 = vpop.eup %8320  ;;  %v2547_v45 = vmul.f32 1.442695, %v2538_v43  ;;  %v2551_v47 = vmul.f32 1.442695, %v2540_v16 }
 0xd38   : > { %v2561_v46 = vsel %vm993_vm3, %v8321_v44, 0.0  ;;  %v2536_v5 = vpop.xlane.xlu0 %2535 }
 0xd39   : > { %2562 = vadd.xlane.f32.xlu1 %v2561_v46  ;;  %8322 = vpow2.f32 %v2547_v45  ;;  %v2544_v27 = vsub.f32 %v9387_v29, %v2536_v5 }
 0xd3a   : > { %8324 = vpow2.f32 %v2551_v47 }
 0xd3b   : > { %8326 = vpow2.f32 %v2549_v51  ;;  %v2559_v31 = vmul.f32 1.442695, %v2544_v27 }
 0xd3c   : > { %8328 = vpow2.f32 %v2557_v56 }
 0xd3f   : > { %v8323_v48 = vpop.eup %8322 }
 0xd40   : > { %v2564_v50 = vsel %vm993_vm3, %v8323_v48, 0.0  ;;  %v8325_v53 = vpop.eup %8324 }
 0xd41   : > { %2565 = vadd.xlane.f32.xlu0 %v2564_v50  ;;  %v2570_v55 = vsel %vm993_vm3, %v8325_v53, 0.0  ;;  %v8327_v57 = vpop.eup %8326 }
 0xd42   : > { %v2567_v58 = vsel %vm993_vm3, %v8327_v57, 0.0  ;;  %v9401_v59 = vpop.eup %8328 }
 0xd43   : > { %v2579_v60 = vsel %vm993_vm3, %v9401_v59, 0.0 }
 0xd49   : > { %2571 = vadd.xlane.f32.xlu0 %v2570_v55 }
 0xd4c   : > { %v2608_v6 = vpop.permute.xlu1 %2607 }
 0xd51   : > { %2568 = vadd.xlane.f32.xlu0 %v2567_v58 }
 0xd59   : > { %2580 = vadd.xlane.f32.xlu0 %v2579_v60 }
 0xd5b   : > { %2613 = vrot.lane.b32.xlu2 %v9269_v21, %s8654_s6 }
 0xd63   : > { %2609 = vrot.lane.b32.xlu2 %v9277_v28, %s8654_s6 }
 0xd83   : > { %v2641_v3 = vpop.trf.xlu2 }
 0xd8c   : > { %2526 = vmax.xlane.f32.xlu2 %v2525_v0 }
 0xd94   : > { %2529 = vmax.xlane.f32.xlu2 %v2528_v2 }
 0xdac   : > { %2605 = vrot.lane.b32.xlu2 %v9263_v11, %s8654_s6  ;;  %v2563_v7 = vpop.xlane.xlu1 %2562 }
 0xdb4   : > { %v2566_v4 = vpop.xlane.xlu0 %2565 }
 0xdb5   : > { %v2614_v21 = vpop.permute.xlu2 %2613  ;;  %8330 = vrcp.f32 %v2566_v4 }
 0xdb6   : > { %2721 = vxpose.xlu1.b32.start [1/2] (short) (narrow) %v2614_v21, 8  ;;  %8332 = vrcp.f32 %v2563_v7 }
 0xdbb   : > { %v8331_v28 = vpop.eup %8330 }
 0xdbc   : > { %v2594_v9 = vmul.f32 %v8331_v28, %v8323_v48  ;;  %v2572_v10 = vpop.xlane.xlu0 %2571  ;;  %v8333_v12 = vpop.eup %8332 }
 0xdbd   : > { %8334 = vrcp.f32 %v2572_v10  ;;  %v2593_v14 = vmul.f32 %v8333_v12, %v8321_v44  ;;  %v2610_v24 = vpop.permute.xlu2 %2609 }
 0xdbe   : > { %2722 = vxpose.xlu1.b32.end [2/2] (short) (narrow) %v2616_v13, 8  ;;  %7904 = vmatpush.xpose.msk.msra.mxu3 %vm993_vm3, %v2594_v9 }
 0xdc2   : > { %7905 = vmatpush.xpose.msk.msra.mxu3 %vm993_vm3, %v2593_v14 }
 0xdc3   : > { %v8335_v15 = vpop.eup %8334 }
 0xdc4   : > { %v2596_v11 = vmul.f32 %v8335_v15, %v8325_v53  ;;  %v2569_v19 = vpop.xlane.xlu0 %2568 }
 0xdc5   : > { %8336 = vrcp.f32 %v2569_v19  ;;  %7906 = vmatmul.msk.f32.vlgmr.msra.gmra.mxu3 %vm993_vm3, %v2641_v3 }
 0xdc6   : > { %7907 = vmatpush.xpose.msk.msra.mxu0 %vm993_vm3, %v2596_v11 }
 0xdcb   : > { %v8337_v20 = vpop.eup %8336 }
 0xdcc   : > { %v2595_v22 = vmul.f32 %v8337_v20, %v8327_v57  ;;  %v2581_v41 = vpop.xlane.xlu0 %2580 }
 0xdce   : > { %7908 = vmatpush.xpose.msk.msra.mxu0 %vm993_vm3, %v2595_v22 }
 0xdff   : > { %v2527_v26 = vpop.xlane.xlu2 %2526 }
 0xe00   : > { %v2541_v18 = vsub.f32 %v2478_v63, %v2527_v26 }
 0xe02   : > { %v2553_v30 = vmul.f32 1.442695, %v2541_v18 }
 0xe04   : > { %8338 = vpow2.f32 %v2553_v30 }
 0xe05   : > { %8340 = vpow2.f32 %v2559_v31 }
 0xe07   : > { %v2530_v32 = vpop.xlane.xlu2 %2529 }
 0xe08   : > { %v2542_v33 = vsub.f32 %v2481_v1, %v2530_v32 }
 0xe0a   : > { %v8339_v34 = vpop.eup %8338  ;;  %v2555_v36 = vmul.f32 1.442695, %v2542_v33 }
 0xe0b   : > { %v2573_v37 = vsel %vm993_vm3, %v8339_v34, 0.0  ;;  %v8341_v13 = vpop.eup %8340 }
 0xe0c   : > { %8342 = vpow2.f32 %v2555_v36  ;;  %2574 = vadd.xlane.f32.xlu0 %v2573_v37  ;;  %v2582_v38 = vsel %vm993_vm3, %v8341_v13, 0.0 }
 0xe0f   : > { %v2606_v29 = vpop.permute.xlu2 %2605 }
 0xe12   : > { %v8343_v35 = vpop.eup %8342 }
 0xe13   : > { %v2576_v39 = vsel %vm993_vm3, %v8343_v35, 0.0 }
 0xe14   : > { %2583 = vadd.xlane.f32.xlu0 %v2582_v38  ;;  %2577 = vadd.xlane.f32.xlu2 %v2576_v39 }
 0xe3d   : > { %2689 = vxpose.xlu0.b32.start [1/2] (short) (narrow) %v2610_v24, 8  ;;  %2657 = vxpose.xlu2.b32.start [1/2] (short) (narrow) %v2606_v29, 8 }
 0xe45   : > { %2690 = vxpose.xlu0.b32.end [2/2] (short) (narrow) %v9395_v17, 8  ;;  %2658 = vxpose.xlu2.b32.end [2/2] (short) (narrow) %v2608_v6, 8 }
 0xe48   : > { %v2779_v40 = vpop.f32.mrf.mxu3 }
 0xe4d   : > { %2869 = vxpose.xlu2.b32.start.end [1/1] (short) (narrow) %v2779_v40, 16 }
 0xe5a   : > { %v2737_v51 = vpop.trf.xlu1 }
 0xe7f   : > { %v2575_v43 = vpop.xlane.xlu0 %2574 }
 0xe87   : > { %v2584_v44 = vpop.xlane.xlu0 %2583  ;;  %v2578_v45 = vpop.xlane.xlu2 %2577 }
 0xe88   : > { %8344 = vrcp.f32 %v2584_v44 }
 0xe89   : > { %8346 = vrcp.f32 %v2578_v45 }
 0xe8a   : > { %8348 = vrcp.f32 %v2581_v41 }
 0xe8b   : > { %8350 = vrcp.f32 %v2575_v43 }
 0xe8e   : > { %v8345_v16 = vpop.eup %8344 }
 0xe8f   : > { %v8347_v46 = vpop.eup %8346  ;;  %v2600_v23 = vmul.f32 %v8345_v16, %v8341_v13 }
 0xe90   : > { %v8349_v47 = vpop.eup %8348  ;;  %v2598_v48 = vmul.f32 %v8347_v46, %v8343_v35 }
 0xe91   : > { %v8351_v49 = vpop.eup %8350  ;;  %7913 = vmatpush.xpose.msk.msrb.mxu2 %vm993_vm3, %v2600_v23  ;;  %v2599_v17 = vmul.f32 %v8349_v47, %v9401_v59 }
 0xe92   : > { %7910 = vmatpush.xpose.msk.msrb.mxu1 %vm993_vm3, %v2598_v48  ;;  %v2597_v50 = vmul.f32 %v8351_v49, %v8339_v34 }
 0xe95   : > { %7914 = vmatpush.xpose.msk.msrb.mxu2 %vm993_vm3, %v2599_v17 }
 0xe96   : > { %7911 = vmatpush.xpose.msk.msrb.mxu1 %vm993_vm3, %v2597_v50 }
 0xe98   : > { %7915 = vmatmul.msk.f32.vlgmr.msrb.gmra.mxu2 %vm993_vm3, %v2737_v51 }
 0xed6   : > { %v2673_v52 = vpop.trf.xlu2 }
 0xed7   : > { %7909 = vmatmul.msk.f32.vlgmr.msra.gmra.mxu0 %vm993_vm3, %v2673_v52 }
 0xee1   : > { %v2705_v53 = vpop.trf.xlu0 }
 0xee2   : > { %7912 = vmatmul.msk.f32.vlgmr.msrb.gmra.mxu1 %vm993_vm3, %v2705_v53 }
 0xee6   : > { %v2885_v57 = vpop.trf.xlu2 }
 0xee7   : > { %v2999_v59 = vrot.slane %v2885_v57, 4 }
 0xeee   : > { %v2886_v0 = vpop.trf.xlu2 }
 0xeef   : > { %v3055_v6 = vrot.slane %v2886_v0, 4 }
 0xf1b   : > { %v2866_v56 = vpop.f32.mrf.mxu2 }
 0xf54   : > { %v2808_v54 = vpop.f32.mrf.mxu0 }
 0xf55   : > { %2901 = vxpose.xlu1.b32.start.end [1/1] (short) (narrow) %v2808_v54, 16 }
 0xf5f   : > { %v2837_v55 = vpop.f32.mrf.mxu1 }
 0xf60   : > { %2933 = vxpose.xlu0.b32.start.end [1/1] (short) (narrow) %v2837_v55, 16 }
 0xf70   : > { %2965 = vxpose.xlu0.b32.start.end [1/1] (short) (narrow) %v2866_v56, 16 }
 0xff9   : > { %v2917_v1 = vpop.trf.xlu1 }
 0xffa   : > { %v3011_v7 = vrot.slane %v2917_v1, 4 }
0x1001   : > { %v2918_v24 = vpop.trf.xlu1 }
0x1002   : > { %v3067_v36 = vrot.slane %v2918_v24, 4 }
0x1004   : > { %v2949_v58 = vpop.trf.xlu0 }
0x1005   : > { %v2997_v60 = vrot.slane %v2949_v58, 4  ;;  %v3000_v2 = vsel %vm484_vm1, %v2949_v58, %v2999_v59 }
0x1006   : > { %v3008_v4 = vperm.slane %v3000_v2, %v8914_v42 }
0x1007   : > { %v2998_v3 = vsel %vm484_vm1, %v2997_v60, %v2885_v57 }
0x1008   : > { %v3004_v21 = vperm.slane %v2998_v3, %v8914_v42  ;;  %v3035_v15 = vrot.slane %v3008_v4, 4 }
0x100a   : > { %v3023_v19 = vrot.slane %v3004_v21, 4 }
0x100c   : > { %v2950_v63 = vpop.trf.xlu0 }
0x100d   : > { %v3053_v5 = vrot.slane %v2950_v63, 4  ;;  %v3056_v28 = vsel %vm484_vm1, %v2950_v63, %v3055_v6 }
0x100e   : > { %v3064_v20 = vperm.slane %v3056_v28, %v8914_v42 }
0x100f   : > { %v3054_v10 = vsel %vm484_vm1, %v3053_v5, %v2886_v0 }
0x1010   : > { %v3060_v26 = vperm.slane %v3054_v10, %v8914_v42  ;;  %v3091_v39 = vrot.slane %v3064_v20, 4 }
0x1012   : > { %v3079_v38 = vrot.slane %v3060_v26, 4 }
0x1014   : > { %v2981_v9 = vpop.trf.xlu0 }
0x1015   : > { %v3009_v12 = vrot.slane %v2981_v9, 4  ;;  %v3012_v14 = vsel %vm484_vm1, %v2981_v9, %v3011_v7 }
0x1016   : > { %v3020_v11 = vperm.slane %v3012_v14, %v8914_v42 }
0x1017   : > { %v3010_v22 = vsel %vm484_vm1, %v3009_v12, %v2917_v1 }
0x1018   : > { %v3016_v18 = vperm.slane %v3010_v22, %v8914_v42  ;;  %v3033_v27 = vrot.slane %v3020_v11, 4  ;;  %v3036_v30 = vsel %vm484_vm1, %v3020_v11, %v3035_v15 }
0x1019   : > { %v3044_v31 = vperm.slane %v3036_v30, %v8931_v61 }
0x101a   : > { %v3021_v32 = vrot.slane %v3016_v18, 4  ;;  %v3024_v33 = vsel %vm484_vm1, %v3016_v18, %v3023_v19  ;;  %v3034_v34 = vsel %vm484_vm1, %v3033_v27, %v3008_v4 }
0x101b   : > { %v3032_v37 = vperm.slane %v3024_v33, %v8931_v61  ;;  %v3040_v13 = vperm.slane %v3034_v34, %v8931_v61  ;;  %v3051_v35 = vrot.slane %v3044_v31, 4 }
0x101c   : > { %v3022_v29 = vsel %vm484_vm1, %v3021_v32, %v3004_v21  ;;  %v2982_v40 = vpop.trf.xlu0 }
0x101d   : > { %v3028_v41 = vperm.slane %v3022_v29, %v8931_v61  ;;  %v3047_v43 = vrot.slane %v3032_v37, 4  ;;  %v3049_v44 = vrot.slane %v3040_v13, 4  ;;  %v3052_v45 = vsel %vm484_vm1, 0.0, %v3051_v35 }
0x101e   : > { %v3120_v16 = vsel %vm484_vm1, %v3051_v35, %v3040_v13  ;;  %v3125_v46 = vrot.slane %v3052_v45, 4  ;;  %v3065_v23 = vrot.slane %v2982_v40, 4  ;;  %v3068_v47 = vsel %vm484_vm1, %v2982_v40, %v3067_v36 }
0x101f   : > { %v3048_v48 = vsel %vm484_vm1, 0.0, %v3047_v43  ;;  %v3050_v49 = vsel %vm484_vm1, 0.0, %v3049_v44  ;;  %v3076_v17 = vperm.slane %v3068_v47, %v8914_v42  ;;  %v3045_v50 = vrot.slane %v3028_v41, 4 }
0x1020   : > { %v3066_v51 = vsel %vm484_vm1, %v3065_v23, %v2918_v24  ;;  %v3109_v52 = vsel %vm484_vm1, %v3047_v43, %v3028_v41  ;;  %v3114_v53 = vrot.slane %v3048_v48, 4  ;;  %v3124_v54 = vperm.slane %v3120_v16, %v8914_v42 }
0x1021   : > { %v3072_v55 = vperm.slane %v3066_v51, %v8914_v42  ;;  %v3089_v56 = vrot.slane %v3076_v17, 4  ;;  %v3092_v57 = vsel %vm484_vm1, %v3076_v17, %v3091_v39  ;;  %v3046_v58 = vsel %vm484_vm1, 0.0, %v3045_v50 }
0x1022   : > { %v3100_v59 = vperm.slane %v3092_v57, %v8931_v61  ;;  %v3113_v60 = vperm.slane %v3109_v52, %v8914_v42  ;;  %v3115_v63 = vsel %vm484_vm1, %v3114_v53, %v3046_v58  ;;  %v3126_v0 = vsel %vm484_vm1, %v3125_v46, %v3050_v49 }
0x1023   : > { %v3077_v1 = vrot.slane %v3072_v55, 4  ;;  %v3080_v2 = vsel %vm484_vm1, %v3072_v55, %v3079_v38  ;;  %v3090_v3 = vsel %vm484_vm1, %v3089_v56, %v3064_v20  ;;  %v3119_v6 = vperm.slane %v3115_v63, %v8914_v42 }
0x1024   : > { %v3088_v5 = vperm.slane %v3080_v2, %v8931_v61  ;;  %v3096_v7 = vperm.slane %v3090_v3, %v8931_v61  ;;  %v3107_v4 = vrot.slane %v3100_v59, 4  ;;  %v3130_v21 = vperm.slane %v3126_v0, %v8914_v42 }
0x1025   : > { %v3078_v28 = vsel %vm484_vm1, %v3077_v1, %v3060_v26  ;;  %v3133_v9 = vrot.slane %v3113_v60, 4  ;;  %v3145_v10 = vrot.slane %v3124_v54, 4  ;;  %v3131_v12 = vrot.slane %v3119_v6, 4 }
0x1026   : > { %v3084_v14 = vperm.slane %v3078_v28, %v8931_v61  ;;  %v3103_v15 = vrot.slane %v3088_v5, 4  ;;  %v3105_v11 = vrot.slane %v3096_v7, 4  ;;  %v3108_v19 = vsel %vm484_vm1, 0.0, %v3107_v4  ;;  %v7895_v28 = vld [vmem:[%s10483_s3 + $0x38] sm:$0xff] }
0x1027   : > { %v3179_v20 = vrot.slane %v3108_v19, 4  ;;  %v3134_v22 = vsel %vm484_vm1, %v3119_v6, %v3133_v9  ;;  %v3146_v24 = vsel %vm484_vm1, %v3130_v21, %v3145_v10  ;;  %v3132_v18 = vsel %vm484_vm1, %v3131_v12, %v3113_v60  ;;  %v7894_v9 = vld [vmem:[%s10483_s3 + $0x30] sm:$0xff]  ;;  %3266 = vmatpush.msrb.mxu3 %v7895_v28  ;;  %v7893_v10 = vld [vmem:[%s10483_s3 + $0x28] sm:$0xff]  ;;  %v7892_v12 = vld [vmem:[%s10483_s3 + $0x20] sm:$0xff] }
0x1028   : > { %v3101_v27 = vrot.slane %v3084_v14, 4  ;;  %v3104_v30 = vsel %vm484_vm1, 0.0, %v3103_v15  ;;  %v3142_v26 = vperm.slane %v3134_v22, %v8931_v61  ;;  %v3154_v31 = vperm.slane %v3146_v24, %v8931_v61 }
0x1029   : > { %v3168_v32 = vrot.slane %v3104_v30, 4  ;;  %v3138_v33 = vperm.slane %v3132_v18, %v8931_v61  ;;  %v3143_v34 = vrot.slane %v3130_v21, 4  ;;  %v3106_v36 = vsel %vm484_vm1, 0.0, %v3105_v11  ;;  %3267 = vmatpush.msrb.mxu3 %v7894_v9  ;;  %v7921_v9 = vld [vmem:[%s10485_s5 + $0x58] sm:$0xff] }
0x102a   : > { %v3159_v37 = vrot.slane %v3154_v31, 4  ;;  %v3161_v13 = vrot.slane %v3142_v26, 4  ;;  %v3102_v35 = vsel %vm484_vm1, 0.0, %v3101_v27  ;;  %v3163_v38 = vsel %vm484_vm1, %v3103_v15, %v3084_v14 }
0x102b   : > { %v3144_v39 = vsel %vm484_vm1, %v3143_v34, %v3124_v54  ;;  %v3157_v29 = vrot.slane %v3138_v33, 4  ;;  %v3167_v40 = vperm.slane %v3163_v38, %v8914_v42  ;;  %v3169_v41 = vsel %vm484_vm1, %v3168_v32, %v3102_v35  ;;  %3268 = vmatpush.msrb.mxu3 %v7893_v10  ;;  %v9537_v32 = vld [vmem:[#allocation9 + $0x8] sm:$0xff] }
0x102c   : > { %v3160_v43 = vsel %vm484_vm1, %v3159_v37, %v3142_v26  ;;  %v3162_v44 = vsel %vm484_vm1, %v3154_v31, %v3161_v13  ;;  %v3150_v45 = vperm.slane %v3144_v39, %v8931_v61  ;;  %v3173_v16 = vperm.slane %v3169_v41, %v8914_v42 }
0x102d   : > { %3227 = vrot.lane.b32.xlu1 %v3160_v43, %s8658_s11  ;;  %3235 = vrot.lane.b32.xlu0 %v3162_v44, %s8657_s18  ;;  %v3174_v46 = vsel %vm484_vm1, %v3107_v4, %v3096_v7  ;;  %v3180_v23 = vsel %vm484_vm1, %v3179_v20, %v3106_v36  ;;  %v3187_v47 = vrot.slane %v3167_v40, 4 }
0x102e   : > { %v3155_v48 = vrot.slane %v3150_v45, 4  ;;  %v3158_v49 = vsel %vm484_vm1, %v3150_v45, %v3157_v29  ;;  %v3178_v17 = vperm.slane %v3174_v46, %v8914_v42  ;;  %v3184_v50 = vperm.slane %v3180_v23, %v8914_v42  ;;  %3269 = vmatpush.msrb.mxu3 %v7892_v12 }
0x102f   : > { %3219 = vrot.lane.b32.xlu2 %v3158_v49, %s8659_s15  ;;  %v3188_v51 = vsel %vm484_vm1, %v3173_v16, %v3187_v47  ;;  %v3185_v52 = vrot.slane %v3173_v16, 4  ;;  %v3333_v47 = vld [vmem:[#allocation6 + $0x38] sm:$0xff] }
0x1030   : > { %v3196_v53 = vperm.slane %v3188_v51, %v8931_v61  ;;  %v3199_v54 = vrot.slane %v3178_v17, 4  ;;  %v3197_v55 = vrot.slane %v3184_v50, 4  ;;  %v3156_v56 = vsel %vm484_vm1, %v3155_v48, %v3138_v33  ;;  %v7935_v48 = vld [vmem:[%s10482_s2 + $0x58] sm:$0xff]  ;;  %3362 = vmatpush.msrb.mxu0 %v3333_v47  ;;  %v7934_v51 = vld [vmem:[%s10482_s2 + $0x50] sm:$0xff] }
0x1031   : > { %v3186_v57 = vsel %vm484_vm1, %v3185_v52, %v3167_v40  ;;  %v3247_v33 = vperm.slane %v9537_v32, 1  ;;  %3513 = vmatpush.msra.mxu3 %v7935_v48 }
0x1032   : > { %v3200_v58 = vsel %vm484_vm1, %v3184_v50, %v3199_v54  ;;  %v3215_v59 = vrot.slane %v3196_v53, 4  ;;  %v3192_v60 = vperm.slane %v3186_v57, %v8931_v61  ;;  %v3198_v63 = vsel %vm484_vm1, %v3197_v55, %v3178_v17  ;;  %v3332_v50 = vld [vmem:[#allocation6 + $0x30] sm:$0xff]  ;;  %v7933_v54 = vld [vmem:[%s10482_s2 + $0x48] sm:$0xff]  ;;  %v3330_v55 = vld [vmem:[#allocation6 + $0x20] sm:$0xff] }
0x1033   : > { %v3204_v0 = vperm.slane %v3198_v63, %v8931_v61  ;;  %v3208_v1 = vperm.slane %v3200_v58, %v8931_v61  ;;  %3363 = vmatpush.msrb.mxu0 %v3332_v50  ;;  %3514 = vmatpush.msra.mxu3 %v7934_v51  ;;  %v9566_v57 = vld [vmem:[%s8843_s17] sm:$0xff]  ;;  %v7925_v63 = vld [vmem:[%s10485_s5 + $0x78] sm:$0xff]  ;;  %s8661_s17 = smov 32  }
0x1034   : > { %v3211_v2 = vrot.slane %v3192_v60, 4  ;;  %3390 = vmatpush.msra.mxu1 %v7925_v63 }
0x1035   : > { %v3209_v3 = vrot.slane %v3204_v0, 4  ;;  %v3216_v6 = vsel %vm484_vm1, %v3208_v1, %v3215_v59  ;;  %v3213_v4 = vrot.slane %v3208_v1, 4  ;;  %3515 = vmatpush.msra.mxu3 %v7933_v54 }
0x1036   : > { %v3212_v5 = vsel %vm484_vm1, %v3204_v0, %v3211_v2  ;;  %v7924_v0 = vld [vmem:[%s10485_s5 + $0x70] sm:$0xff]  ;;  %v7923_v2 = vld [vmem:[%s10485_s5 + $0x68] sm:$0xff] }
0x1037   : > { %3237 = vrot.lane.b32.xlu2 %v3216_v6, %s8657_s18  ;;  %3221 = vrot.lane.b32.xlu1 %v3212_v5, %s8659_s15  ;;  %v3210_v7 = vsel %vm484_vm1, %v3209_v3, %v3192_v60  ;;  %v3214_v21 = vsel %vm484_vm1, %v3213_v4, %v3196_v53  ;;  %v3331_v53 = vld [vmem:[#allocation6 + $0x28] sm:$0xff] }
0x1038   : > { %3364 = vmatpush.msrb.mxu0 %v3331_v53  ;;  %3391 = vmatpush.msra.mxu1 %v7924_v0 }
0x103a   : > { %3365 = vmatpush.msrb.mxu0 %v3330_v55  ;;  %3392 = vmatpush.msra.mxu1 %v7923_v2 }
0x103f   : > { %3229 = vrot.lane.b32.xlu1 %v3214_v21, %s8658_s11  ;;  %v3323_v21 = vperm.slane %v9537_v32, 4 }
0x1089   : > { %v3220_v14 = vpop.permute.xlu2 %3219 }
0x108a   : > { %v3241_v15 = vsel %vm876_vm2, %v3156_v56, %v3220_v14  ;;  %v7932_v56 = vld [vmem:[%s10482_s2 + $0x40] sm:$0xff]  ;;  %v3326_v14 = vperm.slane %v9537_v32, 5 }
0x108b   : > { %3516 = vmatpush.msra.mxu3 %v7932_v56 }
0x1091   : > { %v3238_v30 = vpop.permute.xlu2 %3237 }
0x109f   : > { %v3228_v11 = vpop.permute.xlu1 %3227  ;;  %v3236_v19 = vpop.permute.xlu0 %3235 }
0x10a0   : > { %v3243_v20 = vsel %vm993_vm3, %v3241_v15, %v3228_v11 }
0x10a1   : > { %v3245_v22 = vsel %vm1726_vm4, %v3243_v20, %v3236_v19 }
0x10a2   : > { %7916 = vmatmul.msk.f32.vlgmr.msrb.gmra.mxu3 %vm429_vm0, %v3245_v22 }
0x10a9   : > { %v3222_v24 = vpop.permute.xlu1 %3221 }
0x10aa   : > { %v3242_v18 = vsel %vm876_vm2, %v3210_v7, %v3222_v24  ;;  %v7922_v7 = vld [vmem:[%s10485_s5 + $0x60] sm:$0xff] }
0x10ab   : > { %3393 = vmatpush.msra.mxu1 %v7922_v7 }
0x10ad   : > { %3394 = vmatpush.msra.mxu1 %v7921_v9 }
0x10b1   : > { %v3230_v27 = vpop.permute.xlu1 %3229 }
0x10b2   : > { %v3244_v26 = vsel %vm993_vm3, %v3242_v18, %v3230_v27 }
0x10b3   : > { %v3246_v31 = vsel %vm1726_vm4, %v3244_v26, %v3238_v30 }
0x10b4   : > { %7917 = vmatmul.msk.f32.gmra.mxu3 %vm429_vm0, %v3246_v31 }
0x10bc   : > { %7936 = vmatmul.msk.f32.vlgmr.msra.gmra.mxu3 %vm429_vm0, %v9566_v57 }
0x1125   : > { %v3271_v34 = vpop.f32.mrf.mxu3 }
0x1126   : > { %v3272_v36 = vadd.f32 %v3271_v34, %v3247_v33  ;;  %v7920_v34 = vld [vmem:[%s10485_s5 + $0x50] sm:$0xff] }
0x1127   : > { %3395 = vmatpush.msra.mxu1 %v7920_v34 }
0x1128   : > { %v3277_v37 = vadd.f32 %v3272_v36, %v9244_v62  ;;  %v7919_v36 = vld [vmem:[%s10485_s5 + $0x48] sm:$0xff] }
0x1129   : > { %3396 = vmatpush.msra.mxu1 %v7919_v36 }
0x112a   : > { %v3279_v13 = vsel %vm429_vm0, %v3277_v37, 0.0 }
0x112b   : > { %3280 = vadd.xlane.f32.xlu1 %v3279_v13  ;;  %v9600_v13 = vld [vmem:[#allocation9 + $0x10] sm:$0xff] }
0x1137   : > { %v3274_v35 = vpop.f32.mrf.mxu3 }
0x1138   : > { %v3275_v38 = vadd.f32 %v3274_v35, %v3247_v33  ;;  %v3497_v35 = vperm.slane %v9600_v13, 0 }
0x113a   : > { %v3278_v39 = vadd.f32 %v3275_v38, %v9248_v8 }
0x113c   : > { %v3282_v29 = vsel %vm429_vm0, %v3278_v39, 0.0 }
0x113d   : > { %3283 = vadd.xlane.f32.xlu2 %v3282_v29  ;;  %v3343_v29 = vperm.slane %v9537_v32, 2 }
0x113f   : > { %v3518_v38 = vpop.f32.mrf.mxu3 }
0x119e   : > { %v3281_v40 = vpop.xlane.xlu1 %3280 }
0x119f   : > { %v3285_v41 = vmul.f32 %v3281_v40, %v9182_v25 }
0x11a1   : > { %v3287_v43 = vsub.f32 %v3277_v37, %v3285_v41  ;;  %v7918_v37 = vld [vmem:[%s10485_s5 + $0x40] sm:$0xff] }
0x11a2   : > { %3397 = vmatpush.msra.mxu1 %v7918_v37 }
0x11a3   : > { %v3289_v44 = vmul.f32 %v3287_v43, %v3287_v43 }
0x11a5   : > { %v3291_v45 = vsel %vm429_vm0, %v3289_v44, 0.0 }
0x11a6   : > { %3292 = vadd.xlane.f32.xlu0 %v3291_v45 }
0x11b0   : > { %v3284_v16 = vpop.xlane.xlu2 %3283 }
0x11b1   : > { %v3286_v62 = vmul.f32 %v3284_v16, %v9182_v25 }
0x11b3   : > { %v9547_v46 = vsub.f32 %v3278_v39, %v3286_v62  ;;  %v9603_v39 = vadd.f32 %v3518_v38, %v3497_v35  ;;  %v3375_v62 = vperm.slane %v9537_v32, 3 }
0x11b5   : > { %v3290_v23 = vmul.f32 %v9547_v46, %v9547_v46  ;;  %v3538_v54 = vrot.slane %v9603_v39, 4 }
0x11b7   : > { %v3294_v8 = vsel %vm429_vm0, %v3290_v23, 0.0 }
0x11b8   : > { %3295 = vadd.xlane.f32.xlu1 %v3294_v8 }
0x11ba   : > { %3530 = vrot.lane.b32.xlu0 %v9603_v39, %s8652_s27 }
0x11d1   : > { %3533 = vrot.lane.b32.xlu1 %v9603_v39, %s8650_s21 }
0x1219   : > { %v3293_v49 = vpop.xlane.xlu0 %3292 }
0x121a   : > { %v3297_v17 = vmul.f32 %v3293_v49, %v9182_v25 }
0x121c   : > { %v3299_v52 = vadd.f32 1e-05, %v3297_v17 }
0x121e   : > { %8352 = vrsqrt.f32 %v3299_v52  ;;  %vm3307_vm9 = vweird.f32 %v3299_v52 }
0x1224   : > { %v8353_v58 = vpop.eup %8352 }
0x1225   : > { %v3302_v59 = vmul.f32 %v8353_v58, %v3299_v52  ;;  %vm3308_vm8 = vweird.f32 %v8353_v58 }
0x1226   : > { %vm3309_vm10 = vmor %vm3307_vm9, %vm3308_vm8 }
0x1227   : > { %v3303_v60 = vmul.f32 %v8353_v58, %v3302_v59 }
0x1229   : > { %v3304_v1 = vmul.f32 0.5, %v3303_v60 }
0x122b   : > { %v3305_v3 = vsub.f32 1.5, %v3304_v1  ;;  %v3296_v6 = vpop.xlane.xlu1 %3295 }
0x122c   : > { %v3298_v5 = vmul.f32 %v3296_v6, %v9182_v25  ;;  %v9620_v51 = vpop.permute.xlu0 %3530 }
0x122d   : > { %v3306_v4 = vmul.f32 %v8353_v58, %v3305_v3  ;;  %v3536_v52 = vrot.slane %v9620_v51, 4  ;;  %v3539_v60 = vsel %vm484_vm1, %v9620_v51, %v3538_v54 }
0x122e   : > { %v3300_v28 = vadd.f32 1e-05, %v3298_v5  ;;  %v3547_v3 = vperm.slane %v3539_v60, %v8914_v42 }
0x122f   : > { %v3310_v10 = vsel %vm3309_vm10, %v8353_v58, %v3306_v4  ;;  %v3537_v56 = vsel %vm484_vm1, %v3536_v52, %v9603_v39 }
0x1230   : > { %v3321_v12 = vmul.f32 %v3310_v10, %v3287_v43  ;;  %8354 = vrsqrt.f32 %v3300_v28  ;;  %vm3317_vm13 = vweird.f32 %v3300_v28  ;;  %v3543_v0 = vperm.slane %v3537_v56, %v8914_v42 }
0x1231   : > { %v3574_v10 = vrot.slane %v3547_v3, 4 }
0x1232   : > { %v3324_v15 = vmul.f32 %v3323_v21, %v3321_v12 }
0x1234   : > { %v3327_v11 = vadd.f32 %v3326_v14, %v3324_v15 }
0x1236   : > { %v8355_v19 = vpop.eup %8354  ;;  %7926 = vmatmul.msk.f32.vlgmr.msrb.gmra.mxu0 %vm429_vm0, %v3327_v11 }
0x1237   : > { %v3312_v20 = vmul.f32 %v8355_v19, %v3300_v28  ;;  %vm3318_vm11 = vweird.f32 %v8355_v19 }
0x1238   : > { %vm3319_vm14 = vmor %vm3317_vm13, %vm3318_vm11 }
0x1239   : > { %v3313_v22 = vmul.f32 %v8355_v19, %v3312_v20 }
0x123b   : > { %v3314_v24 = vmul.f32 0.5, %v3313_v22 }
0x123d   : > { %v3315_v18 = vsub.f32 1.5, %v3314_v24 }
0x123f   : > { %v3316_v27 = vmul.f32 %v8355_v19, %v3315_v18 }
0x1241   : > { %v3320_v30 = vsel %vm3319_vm14, %v8355_v19, %v3316_v27 }
0x1242   : > { %v3322_v26 = vmul.f32 %v3320_v30, %v9547_v46 }
0x1243   : > { %v9631_v59 = vpop.permute.xlu1 %3533 }
0x1244   : > { %v3325_v31 = vmul.f32 %v3323_v21, %v3322_v26  ;;  %v3548_v1 = vrot.slane %v9631_v59, 4  ;;  %v3562_v21 = vrot.slane %v3543_v0, 4 }
0x1246   : > { %v3328_v33 = vadd.f32 %v3326_v14, %v3325_v31 }
0x1248   : > { %7927 = vmatmul.msk.f32.gmra.mxu0 %vm429_vm0, %v3328_v33 }
0x12b3   : > { %v3367_v40 = vpop.f32.mrf.mxu0 }
0x12b4   : > { %v3368_v41 = vadd.f32 %v3367_v40, %v3343_v29 }
0x12b6   : > { %v3373_v43 = vmax.f32 %v3368_v41, 0.0 }
0x12b8   : > { %7928 = vmatmul.msk.f32.vlgmr.msra.gmra.mxu1 %vm1863_vm12, %v3373_v43 }
0x12c5   : > { %v3370_v44 = vpop.f32.mrf.mxu0 }
0x12c6   : > { %v3371_v45 = vadd.f32 %v3370_v44, %v3343_v29 }
0x12c8   : > { %v3374_v16 = vmax.f32 %v3371_v45, 0.0 }
0x12ca   : > { %7929 = vmatmul.msk.f32.gmra.mxu1 %vm1863_vm12, %v3374_v16 }
0x1335   : > { %v3399_v46 = vpop.f32.mrf.mxu1 }
0x1336   : > { %v3400_v23 = vadd.f32 %v3399_v46, %v3375_v62 }
0x1338   : > { %v3405_v8 = vadd.f32 %v3400_v23, %v3327_v11 }
0x133a   : > { %v3407_v47 = vsel %vm429_vm0, %v3405_v8, 0.0 }
0x133b   : > { %3408 = vadd.xlane.f32.xlu2 %v3407_v47 }
0x1347   : > { %v3402_v48 = vpop.f32.mrf.mxu1 }
0x1348   : > { %v3403_v49 = vadd.f32 %v3402_v48, %v3375_v62 }
0x134a   : > { %v9614_v17 = vadd.f32 %v3403_v49, %v3328_v33 }
0x134c   : > { %v3410_v50 = vsel %vm429_vm0, %v9614_v17, 0.0 }
0x134d   : > { %3411 = vadd.xlane.f32.xlu1 %v3410_v50 }
0x1353   : > { %3527 = vrot.lane.b32.xlu2 %v9603_v39, %s8651_s30 }
0x1366   : > { %3660 = vrot.lane.b32.xlu1 %v9620_v51, %s8653_s7 }
0x13ae   : > { %v3409_v53 = vpop.xlane.xlu2 %3408 }
0x13af   : > { %v3413_v55 = vmul.f32 %v3409_v53, %v9182_v25 }
0x13b1   : > { %v9629_v58 = vsub.f32 %v3405_v8, %v3413_v55 }
0x13b3   : > { %v3417_v63 = vmul.f32 %v9629_v58, %v9629_v58 }
0x13b5   : > { %v3419_v2 = vsel %vm429_vm0, %v3417_v63, 0.0 }
0x13b6   : > { %3420 = vadd.xlane.f32.xlu0 %v3419_v2  ;;  %v9641_v6 = vpop.permute.xlu2 %3527 }
0x13b7   : > { %v3549_v5 = vsel %vm484_vm1, %v3548_v1, %v9641_v6  ;;  %v3550_v7 = vrot.slane %v9641_v6, 4  ;;  %v8198_v4 = vpack.i.bf16 %v9603_v39, %v9641_v6 }
0x13b8   : > { %v3555_v28 = vperm.slane %v3549_v5, %v8914_v42 }
0x13b9   : > { %v3551_v9 = vsel %vm484_vm1, %v9631_v59, %v3550_v7  ;;  %8199 = vrot.lane.b32.xlu1 %v8198_v4, %s8653_s7 }
0x13ba   : > { %v3559_v12 = vperm.slane %v3551_v9, %v8914_v42  ;;  %v3560_v14 = vrot.slane %v3555_v28, 4  ;;  %v3563_v15 = vsel %vm484_vm1, %v3555_v28, %v3562_v21 }
0x13bb   : > { %v3571_v11 = vperm.slane %v3563_v15, %v8931_v61 }
0x13bc   : > { %v3561_v19 = vsel %vm484_vm1, %v3560_v14, %v3543_v0  ;;  %v3572_v20 = vrot.slane %v3559_v12, 4  ;;  %v3575_v22 = vsel %vm484_vm1, %v3559_v12, %v3574_v10  ;;  %v3460_v12 = vld [vmem:[#allocation7 + $0x18] sm:$0xff] }
0x13bd   : > { %v3567_v24 = vperm.slane %v3561_v19, %v8931_v61  ;;  %v3583_v18 = vperm.slane %v3575_v22, %v8931_v61  ;;  %v3586_v27 = vrot.slane %v3571_v11, 4  ;;  %v3594_v26 = vmul.f32 0.35355338, %v3571_v11  ;;  %3480 = vmatpush.msra.mxu2 %v3460_v12  ;;  %v3459_v11 = vld [vmem:[#allocation7 + $0x10] sm:$0xff]  ;;  %v3458_v22 = vld [vmem:[#allocation7 + $0x8] sm:$0xff] }
0x13be   : > { %v3573_v30 = vsel %vm484_vm1, %v3572_v20, %v3547_v3 }
0x13bf   : > { %v3579_v31 = vperm.slane %v3573_v30, %v8931_v61  ;;  %v3584_v33 = vrot.slane %v3567_v24, 4  ;;  %v3587_v34 = vsel %vm484_vm1, 0.0, %v3586_v27  ;;  %v3590_v36 = vrot.slane %v3583_v18, 4  ;;  %3481 = vmatpush.msra.mxu2 %v3459_v11 }
0x13c0   : > { %v3592_v37 = vmul.f32 0.35355338, %v3567_v24  ;;  %v3595_v35 = vmul.f32 0.35355338, %v3587_v34  ;;  %v3598_v38 = vmul.f32 0.35355338, %v3583_v18  ;;  %v3412_v29 = vpop.xlane.xlu1 %3411 }
0x13c1   : > { %v3585_v40 = vsel %vm484_vm1, 0.0, %v3584_v33  ;;  %v3588_v41 = vrot.slane %v3579_v31, 4  ;;  %v3591_v43 = vsel %vm484_vm1, 0.0, %v3590_v36  ;;  %v3596_v44 = vmul.f32 0.35355338, %v3579_v31  ;;  %3662 = vrot.lane.b32.xlu1 %v9631_v59, %s8653_s7  ;;  %3482 = vmatpush.msra.mxu2 %v3458_v22  ;;  %v3457_v24 = vld [vmem:[#allocation7] sm:$0xff] }
0x13c2   : > { %v3593_v45 = vmul.f32 0.35355338, %v3585_v40  ;;  %v3599_v16 = vmul.f32 0.35355338, %v3591_v43  ;;  %v3600_v62 = vrot.slane %v3594_v26, 4  ;;  %v3606_v46 = vrot.slane %v3595_v35, 4 }
0x13c3   : > { %v3589_v23 = vsel %vm484_vm1, 0.0, %v3588_v41  ;;  %v3612_v8 = vrot.slane %v3598_v38, 4  ;;  %v3414_v47 = vmul.f32 %v3412_v29, %v9182_v25  ;;  %3483 = vmatpush.msra.mxu2 %v3457_v24  ;;  %v3454_v41 = vperm.slane %v9537_v32, 7 }
0x13c4   : > { %v3597_v48 = vmul.f32 0.35355338, %v3589_v23  ;;  %v3618_v49 = vrot.slane %v3599_v16, 4  ;;  %v3601_v50 = vsel %vm484_vm1, %v3600_v62, %v3592_v37  ;;  %v3607_v52 = vsel %vm484_vm1, %v3606_v46, %v3593_v45 }
0x13c5   : > { %v9671_v53 = vsub.f32 %v9614_v17, %v3414_v47  ;;  %v9674_v54 = vperm.slane %v3601_v50, %v8914_v42  ;;  %v9677_v55 = vperm.slane %v3607_v52, %v8914_v42  ;;  %v3613_v56 = vsel %vm484_vm1, %v3612_v8, %v3596_v44 }
0x13c6   : > { %v9681_v60 = vperm.slane %v3613_v56, %v8914_v42  ;;  %v3619_v63 = vsel %vm484_vm1, %v3618_v49, %v3597_v48  ;;  %v3451_v37 = vperm.slane %v9537_v32, 6 }
0x13c7   : > { %v3418_v0 = vmul.f32 %v9671_v53, %v9671_v53  ;;  %v9687_v1 = vperm.slane %v3619_v63, %v8914_v42  ;;  %v3626_v17 = vrot.slane %v9674_v54, 4  ;;  %v3624_v56 = vrot.slane %v9677_v55, 4 }
0x13c8   : > { %v3638_v2 = vrot.slane %v9681_v60, 4 }
0x13c9   : > { %v3422_v3 = vsel %vm429_vm0, %v3418_v0, 0.0  ;;  %v3627_v5 = vsel %vm484_vm1, %v9677_v55, %v3626_v17  ;;  %v3636_v63 = vrot.slane %v9687_v1, 4  ;;  %v3625_v0 = vsel %vm484_vm1, %v3624_v56, %v9674_v54 }
0x13ca   : > { %3423 = vadd.xlane.f32.xlu2 %v3422_v3  ;;  %v3635_v7 = vperm.slane %v3627_v5, %v8931_v61  ;;  %v3639_v4 = vsel %vm484_vm1, %v9687_v1, %v3638_v2  ;;  %v3631_v17 = vperm.slane %v3625_v0, %v8931_v61 }
0x13cb   : > { %v3647_v21 = vperm.slane %v3639_v4, %v8931_v61 }
0x13cc   : > { %v3654_v28 = vrot.slane %v3635_v7, 4  ;;  %v3650_v5 = vrot.slane %v3631_v17, 4 }
0x13cd   : > { %v3652_v32 = vrot.slane %v3647_v21, 4 }
0x13ce   : > { %v9699_v9 = vsel %vm484_vm1, %v3647_v21, %v3654_v28 }
0x13cf   : > { %v3653_v52 = vsel %vm484_vm1, %v3652_v32, %v3635_v7 }
0x13d8   : > { %v3661_v10 = vpop.permute.xlu1 %3660 }
0x13f6   : > { %3732 = vxpose.xlu1.b32.start.end [1/1] (short) (narrow) %v3661_v10, 8 }
0x1429   : > { %v3421_v14 = vpop.xlane.xlu0 %3420 }
0x142a   : > { %v3425_v15 = vmul.f32 %v3421_v14, %v9182_v25 }
0x142b   : > { %v8200_v19 = vpop.permute.xlu1 %8199 }
0x142c   : > { %v3427_v20 = vadd.f32 1e-05, %v3425_v15  ;;  %8204 = vxpose.xlu0.b32.start.end [1/1] (short) (narrow) %v8200_v19, 8 }
0x142e   : > { %8356 = vrsqrt.f32 %v3427_v20  ;;  %vm3435_vm5 = vweird.f32 %v3427_v20 }
0x1433   : > { %v3663_v18 = vpop.permute.xlu1 %3662 }
0x1434   : > { %v8357_v27 = vpop.eup %8356  ;;  %3764 = vxpose.xlu2.b32.start.end [1/1] (short) (narrow) %v3663_v18, 8 }
0x1435   : > { %v3430_v30 = vmul.f32 %v8357_v27, %v3427_v20  ;;  %vm3436_vm15 = vweird.f32 %v8357_v27 }
0x1436   : > { %vm3437_vm6 = vmor %vm3435_vm5, %vm3436_vm15 }
0x1437   : > { %v3431_v26 = vmul.f32 %v8357_v27, %v3430_v30 }
0x1439   : > { %v3432_v31 = vmul.f32 0.5, %v3431_v26 }
0x143b   : > { %v3433_v33 = vsub.f32 1.5, %v3432_v31 }
0x143d   : > { %v3434_v34 = vmul.f32 %v8357_v27, %v3433_v33  ;;  %v3424_v36 = vpop.xlane.xlu2 %3423 }
0x143e   : > { %v3426_v35 = vmul.f32 %v3424_v36, %v9182_v25 }
0x143f   : > { %v3438_v38 = vsel %vm3437_vm6, %v8357_v27, %v3434_v34 }
0x1440   : > { %v3449_v29 = vmul.f32 %v3438_v38, %v9629_v58  ;;  %v3428_v40 = vadd.f32 1e-05, %v3426_v35 }
0x1442   : > { %v3452_v43 = vmul.f32 %v3451_v37, %v3449_v29  ;;  %8358 = vrsqrt.f32 %v3428_v40  ;;  %vm3445_vm8 = vweird.f32 %v3428_v40 }
0x1444   : > { %v3455_v44 = vadd.f32 %v3454_v41, %v3452_v43 }
0x1446   : > { %7930 = vmatmul.msk.f32.vlgmr.msra.gmra.mxu2 %vm429_vm0, %v3455_v44 }
0x1448   : > { %v8359_v45 = vpop.eup %8358 }
0x1449   : > { %v3440_v16 = vmul.f32 %v8359_v45, %v3428_v40  ;;  %vm3446_vm7 = vweird.f32 %v8359_v45 }
0x144a   : > { %vm3447_vm9 = vmor %vm3445_vm8, %vm3446_vm7 }
0x144b   : > { %v3441_v62 = vmul.f32 %v8359_v45, %v3440_v16 }
0x144d   : > { %v3442_v46 = vmul.f32 0.5, %v3441_v62 }
0x144f   : > { %v3443_v23 = vsub.f32 1.5, %v3442_v46 }
0x1451   : > { %v3444_v8 = vmul.f32 %v8359_v45, %v3443_v23 }
0x1453   : > { %v3448_v47 = vsel %vm3447_vm9, %v8359_v45, %v3444_v8 }
0x1454   : > { %v3450_v58 = vmul.f32 %v3448_v47, %v9671_v53  ;;  %v3637_v53 = vsel %vm484_vm1, %v3636_v63, %v9681_v60 }
0x1455   : > { %v3643_v2 = vperm.slane %v3637_v53, %v8931_v61 }
0x1456   : > { %v3453_v48 = vmul.f32 %v3451_v37, %v3450_v58 }
0x1457   : > { %v3648_v3 = vrot.slane %v3643_v2, 4  ;;  %v3651_v1 = vsel %vm484_vm1, %v3643_v2, %v3650_v5 }
0x1458   : > { %v3456_v49 = vadd.f32 %v3454_v41, %v3453_v48 }
0x1459   : > { %v3649_v55 = vsel %vm484_vm1, %v3648_v3, %v3631_v17 }
0x145a   : > { %7931 = vmatmul.msk.f32.gmra.mxu2 %vm429_vm0, %v3456_v49 }
0x149a   : > { %v3748_v50 = vpop.trf.xlu1 }
0x149b   : > { %3860 = vmatpush.msrb.mxu3 %v3748_v50 }
0x149c   : > { %7943 = vmatmul.msk.f32.vlgmr.msrb.gmra.mxu3 %vm876_vm2, %v3653_v52 }
0x14c9   : > { %v9726_v10 = vpop.f32.mrf.mxu2 }
0x14cd   : > { %v3780_v28 = vpop.trf.xlu2 }
0x14d0   : > { %v8205_v4 = vpop.trf.xlu0 }
0x14d1   : > { %v8209_v7 = vunpack.i.h.bf16 %v8205_v4  ;;  %v8206_v21 = vunpack.i.l.bf16 %v8205_v4 }
0x14d3   : > { %3814 = vmatpush.msra.mxu0 %v8209_v7  ;;  %3837 = vmatpush.msrb.mxu2 %v8206_v21 }
0x14d4   : > { %7941 = vmatmul.msk.f32.vlgmr.msra.gmra.mxu0 %vm876_vm2, %v3649_v55  ;;  %7942 = vmatmul.msk.f32.vlgmr.msrb.gmra.mxu2 %vm876_vm2, %v3651_v1 }
0x14d5   : > { %3883 = vmatpush.msrb.mxu0 %v3780_v28 }
0x14dc   : > { %7944 = vmatmul.msk.f32.vlgmr.msrb.gmra.mxu0 %vm876_vm2, %v9699_v9 }
0x14dd   : > { %v9728_v12 = vpop.f32.mrf.mxu2 }
0x151f   : > { %v3862_v54 = vpop.f32.mrf.mxu3 }
0x1520   : > { %v3894_v60 = vsel %vm876_vm2, %v3862_v54, -inf }
0x1521   : > { %3895 = vmax.xlane.f32.xlu0 %v3894_v60 }
0x1551   : > { %v3816_v14 = vpop.f32.mrf.mxu0 }
0x1552   : > { %v3888_v15 = vsel %vm876_vm2, %v3816_v14, -inf }
0x1553   : > { %3889 = vmax.xlane.f32.xlu1 %v3888_v15 }
0x1557   : > { %v3839_v11 = vpop.f32.mrf.mxu2 }
0x1558   : > { %v3891_v19 = vsel %vm876_vm2, %v3839_v11, -inf }
0x1559   : > { %3892 = vmax.xlane.f32.xlu2 %v3891_v19  ;;  %v3885_v20 = vpop.f32.mrf.mxu0 }
0x155a   : > { %v3897_v22 = vsel %vm876_vm2, %v3885_v20, -inf }
0x155b   : > { %3898 = vmax.xlane.f32.xlu1 %v3897_v22 }
0x1571   : > { %3934 = vrot.lane.b32.xlu2 %v9641_v6, %s8654_s6 }
0x1574   : > { %3936 = vrot.lane.b32.xlu1 %v9620_v51, %s8654_s6 }
0x157c   : > { %3938 = vrot.lane.b32.xlu1 %v9631_v59, %s8654_s6 }
0x1594   : > { %v3896_v9 = vpop.xlane.xlu0 %3895 }
0x1595   : > { %v3902_v24 = vsub.f32 %v3862_v54, %v3896_v9 }
0x1597   : > { %v3908_v18 = vmul.f32 1.442695, %v3902_v24 }
0x1599   : > { %8360 = vpow2.f32 %v3908_v18 }
0x159f   : > { %v8361_v27 = vpop.eup %8360 }
0x15a0   : > { %v3918_v30 = vsel %vm876_vm2, %v8361_v27, 0.0 }
0x15a1   : > { %3919 = vadd.xlane.f32.xlu0 %v3918_v30 }
0x15c6   : > { %v3890_v26 = vpop.xlane.xlu1 %3889 }
0x15c7   : > { %v3900_v31 = vsub.f32 %v3816_v14, %v3890_v26 }
0x15c9   : > { %v3904_v33 = vmul.f32 1.442695, %v3900_v31 }
0x15cb   : > { %8362 = vpow2.f32 %v3904_v33 }
0x15cc   : > { %v3893_v29 = vpop.xlane.xlu2 %3892 }
0x15cd   : > { %v3901_v58 = vsub.f32 %v3839_v11, %v3893_v29 }
0x15ce   : > { %v3899_v34 = vpop.xlane.xlu1 %3898 }
0x15cf   : > { %v3903_v6 = vsub.f32 %v3885_v20, %v3899_v34  ;;  %v3906_v48 = vmul.f32 1.442695, %v3901_v58 }
0x15d1   : > { %v8363_v36 = vpop.eup %8362  ;;  %v3910_v37 = vmul.f32 1.442695, %v3903_v6 }
0x15d2   : > { %v3912_v51 = vsel %vm876_vm2, %v8363_v36, 0.0 }
0x15d3   : > { %8364 = vpow2.f32 %v3910_v37  ;;  %3913 = vadd.xlane.f32.xlu2 %v3912_v51 }
0x15d4   : > { %v3935_v40 = vpop.permute.xlu2 %3934 }
0x15d9   : > { %v8365_v59 = vpop.eup %8364 }
0x15da   : > { %v3921_v35 = vsel %vm876_vm2, %v8365_v59, 0.0 }
0x15db   : > { %3922 = vadd.xlane.f32.xlu1 %v3921_v35 }
0x15e6   : > { %v3937_v38 = vpop.permute.xlu1 %3936 }
0x15e7   : > { %4008 = vxpose.xlu0.b32.start.end [1/1] (short) (narrow) %v3937_v38, 8 }
0x15ee   : > { %v3939_v43 = vpop.permute.xlu1 %3938 }
0x15fc   : > { %3976 = vxpose.xlu2.b32.start.end [1/1] (short) (narrow) %v3935_v40, 8 }
0x1614   : > { %v3920_v41 = vpop.xlane.xlu0 %3919 }
0x1615   : > { %8366 = vrcp.f32 %v3920_v41  ;;  %4040 = vxpose.xlu1.b32.start.end [1/1] (short) (narrow) %v3939_v43, 8 }
0x161b   : > { %v8367_v44 = vpop.eup %8366 }
0x161c   : > { %v3930_v45 = vmul.f32 %v8367_v44, %v8361_v27 }
0x161e   : > { %7949 = vmatpush.xpose.msk.msra.mxu3 %vm876_vm2, %v3930_v45 }
0x1646   : > { %v3914_v16 = vpop.xlane.xlu2 %3913 }
0x1647   : > { %8368 = vrcp.f32 %v3914_v16 }
0x164d   : > { %v8369_v62 = vpop.eup %8368 }
0x164e   : > { %v3928_v46 = vmul.f32 %v8369_v62, %v8363_v36  ;;  %v3923_v23 = vpop.xlane.xlu1 %3922 }
0x164f   : > { %8370 = vrcp.f32 %v3923_v23 }
0x1650   : > { %7945 = vmatpush.xpose.msk.msrb.mxu1 %vm876_vm2, %v3928_v46  ;;  %8372 = vpow2.f32 %v3906_v48 }
0x1655   : > { %v8371_v8 = vpop.eup %8370  ;;  %3932 = vrot.lane.b32.xlu0 %v9603_v39, %s8654_s6 }
0x1656   : > { %v3931_v47 = vmul.f32 %v8371_v8, %v8365_v59  ;;  %v8373_v49 = vpop.eup %8372 }
0x1657   : > { %v3915_v32 = vsel %vm876_vm2, %v8373_v49, 0.0 }
0x1658   : > { %7951 = vmatpush.xpose.msk.msra.mxu0 %vm876_vm2, %v3931_v47 }
0x167f   : > { %3916 = vadd.xlane.f32.xlu0 %v3915_v32 }
0x168b   : > { %v4024_v50 = vpop.trf.xlu0 }
0x168c   : > { %7950 = vmatmul.msk.f32.vlgmr.msra.gmra.mxu3 %vm876_vm2, %v4024_v50 }
0x1695   : > { %v3992_v17 = vpop.trf.xlu2 }
0x16b9   : > { %v4056_v53 = vpop.trf.xlu1 }
0x16ba   : > { %7952 = vmatmul.msk.f32.vlgmr.msra.gmra.mxu0 %vm876_vm2, %v4056_v53 }
0x16c7   : > { %v3933_v52 = vpop.permute.xlu0 %3932 }
0x16c8   : > { %3944 = vxpose.xlu0.b32.start.end [1/1] (short) (narrow) %v3933_v52, 8 }
0x16f2   : > { %v3917_v56 = vpop.xlane.xlu0 %3916 }
0x16f3   : > { %8374 = vrcp.f32 %v3917_v56 }
0x16f9   : > { %v8375_v63 = vpop.eup %8374 }
0x16fa   : > { %v3929_v0 = vmul.f32 %v8375_v63, %v8373_v49 }
0x16fc   : > { %7947 = vmatpush.xpose.msk.msra.mxu2 %vm876_vm2, %v3929_v0 }
0x16ff   : > { %7948 = vmatmul.msk.f32.vlgmr.msra.gmra.mxu2 %vm876_vm2, %v3992_v17 }
0x170f   : > { %v4147_v39 = vpop.f32.mrf.mxu3 }
0x1710   : > { %4240 = vxpose.xlu0.b32.start.end [1/1] (short) (narrow) %v4147_v39, 8 }
0x1737   : > { %v4173_v5 = vpop.f32.mrf.mxu0 }
0x176c   : > { %v3960_v2 = vpop.trf.xlu0 }
0x176d   : > { %7946 = vmatmul.msk.f32.vlgmr.msrb.gmra.mxu1 %vm876_vm2, %v3960_v2 }
0x1782   : > { %v4121_v4 = vpop.f32.mrf.mxu2 }
0x17b4   : > { %v4256_v7 = vpop.trf.xlu0 }
0x17b5   : > { %v4304_v55 = vrot.slane %v4256_v7, 4 }
0x17ea   : > { %v4095_v3 = vpop.f32.mrf.mxu1 }
0x17eb   : > { %4176 = vxpose.xlu0.b32.start.end [1/1] (short) (narrow) %v4095_v3, 8 }
0x17f3   : > { %4272 = vxpose.xlu0.b32.start.end [1/1] (short) (narrow) %v4173_v5, 8 }
0x17fb   : > { %4208 = vxpose.xlu0.b32.start.end [1/1] (short) (narrow) %v4121_v4, 8 }
0x188f   : > { %v4192_v21 = vpop.trf.xlu0 }
0x1890   : > { %v4306_v1 = vrot.slane %v4192_v21, 4  ;;  %v4305_v54 = vsel %vm484_vm1, %v4304_v55, %v4192_v21  ;;  %v421_v21 = vld [vmem:[#allocation9 + $0x28] sm:$0x7] }
0x1891   : > { %v4311_v14 = vperm.slane %v4305_v54, %v8914_v42 }
0x1892   : > { %v4307_v60 = vsel %vm484_vm1, %v4256_v7, %v4306_v1 }
0x1893   : > { %v4315_v11 = vperm.slane %v4307_v60, %v8914_v42  ;;  %v4330_v9 = vrot.slane %v4311_v14, 4 }
0x1895   : > { %v4342_v27 = vrot.slane %v4315_v11, 4 }
0x1897   : > { %v4288_v28 = vpop.trf.xlu0 }
0x1898   : > { %v4316_v15 = vrot.slane %v4288_v28, 4 }
0x189f   : > { %v4224_v19 = vpop.trf.xlu0 }
0x18a0   : > { %v4317_v20 = vsel %vm484_vm1, %v4316_v15, %v4224_v19  ;;  %v4318_v22 = vrot.slane %v4224_v19, 4 }
0x18a1   : > { %v4323_v24 = vperm.slane %v4317_v20, %v8914_v42 }
0x18a2   : > { %v4319_v18 = vsel %vm484_vm1, %v4288_v28, %v4318_v22 }
0x18a3   : > { %v4327_v30 = vperm.slane %v4319_v18, %v8914_v42  ;;  %v4328_v26 = vrot.slane %v4323_v24, 4  ;;  %v4331_v31 = vsel %vm484_vm1, %v4323_v24, %v4330_v9  ;;  %v7939_v9 = vld [vmem:[%s10483_s3 + $0x50] sm:$0xff]  ;;  %v7937_v24 = vld [vmem:[%s10483_s3 + $0x40] sm:$0xff] }
0x18a4   : > { %v4339_v33 = vperm.slane %v4331_v31, %v8931_v61 }
0x18a5   : > { %v4329_v34 = vsel %vm484_vm1, %v4328_v26, %v4311_v14  ;;  %v4340_v6 = vrot.slane %v4327_v30, 4  ;;  %v4343_v36 = vsel %vm484_vm1, %v4327_v30, %v4342_v27 }
0x18a6   : > { %v4335_v37 = vperm.slane %v4329_v34, %v8931_v61  ;;  %v4351_v51 = vperm.slane %v4343_v36, %v8931_v61  ;;  %v4354_v59 = vrot.slane %v4339_v33, 4  ;;  %v4429_v34 = vperm.slane %v9600_v13, 1 }
0x18a7   : > { %v4341_v35 = vsel %vm484_vm1, %v4340_v6, %v4315_v11  ;;  %v3461_v11 = vperm.slane %v421_v21, 0 }
0x18a8   : > { %v4347_v38 = vperm.slane %v4341_v35, %v8931_v61  ;;  %v4352_v29 = vrot.slane %v4335_v37, 4  ;;  %v4355_v40 = vsel %vm484_vm1, 0.0, %v4354_v59  ;;  %v4358_v41 = vrot.slane %v4351_v51, 4 }
0x18a9   : > { %v4360_v43 = vsel %vm484_vm1, %v4354_v59, %v4335_v37  ;;  %v4365_v44 = vrot.slane %v4355_v40, 4  ;;  %v9797_v20 = vadd.f32 %v9726_v10, %v3461_v11  ;;  %v9802_v22 = vadd.f32 %v9728_v12, %v3461_v11  ;;  %v7940_v10 = vld [vmem:[%s10483_s3 + $0x58] sm:$0xff]  ;;  %v7938_v12 = vld [vmem:[%s10483_s3 + $0x48] sm:$0xff] }
0x18aa   : > { %v4353_v45 = vsel %vm484_vm1, 0.0, %v4352_v29  ;;  %v4356_v16 = vrot.slane %v4347_v38, 4  ;;  %v4359_v62 = vsel %vm484_vm1, 0.0, %v4358_v41  ;;  %v4364_v46 = vperm.slane %v4360_v43, %v8914_v42  ;;  %4445 = vmatpush.msra.mxu1 %v7940_v10 }
0x18ab   : > { %v4366_v23 = vsel %vm484_vm1, %v4365_v44, %v4353_v45  ;;  %v4376_v8 = vrot.slane %v4359_v62, 4  ;;  %v4371_v47 = vsel %vm484_vm1, %v4358_v41, %v4347_v38  ;;  %v7957_v44 = vld [vmem:[%s10483_s3 + $0xd8] sm:$0xff]  ;;  %v7956_v45 = vld [vmem:[%s10483_s3 + $0xd0] sm:$0xff]  ;;  %v7954_v62 = vld [vmem:[%s10483_s3 + $0xc0] sm:$0xff] }
0x18ac   : > { %v4357_v58 = vsel %vm484_vm1, 0.0, %v4356_v16  ;;  %v4370_v48 = vperm.slane %v4366_v23, %v8914_v42  ;;  %v4375_v49 = vperm.slane %v4371_v47, %v8914_v42  ;;  %v4384_v32 = vrot.slane %v4364_v46, 4  ;;  %4446 = vmatpush.msra.mxu1 %v7939_v9  ;;  %4501 = vmatpush.msrb.mxu2 %v7957_v44  ;;  %v7955_v16 = vld [vmem:[%s10483_s3 + $0xc8] sm:$0xff] }
0x18ad   : > { %v4377_v50 = vsel %vm484_vm1, %v4376_v8, %v4357_v58 }
0x18ae   : > { %v4381_v52 = vperm.slane %v4377_v50, %v8914_v42  ;;  %v4385_v56 = vsel %vm484_vm1, %v4370_v48, %v4384_v32  ;;  %v4396_v63 = vrot.slane %v4375_v49, 4  ;;  %v4382_v0 = vrot.slane %v4370_v48, 4  ;;  %4447 = vmatpush.msra.mxu1 %v7938_v12  ;;  %4502 = vmatpush.msrb.mxu2 %v7956_v45 }
0x18af   : > { %v4393_v39 = vperm.slane %v4385_v56, %v8931_v61 }
0x18b0   : > { %v4397_v53 = vsel %vm484_vm1, %v4381_v52, %v4396_v63  ;;  %v4383_v17 = vsel %vm484_vm1, %v4382_v0, %v4364_v46  ;;  %v4394_v2 = vrot.slane %v4381_v52, 4  ;;  %4448 = vmatpush.msra.mxu1 %v7937_v24  ;;  %4503 = vmatpush.msrb.mxu2 %v7955_v16  ;;  %v4476_v0 = vperm.slane %v9600_v13, 6 }
0x18b1   : > { %v4405_v3 = vperm.slane %v4397_v53, %v8931_v61  ;;  %v4412_v5 = vrot.slane %v4393_v39, 4  ;;  %v4389_v4 = vperm.slane %v4383_v17, %v8931_v61  ;;  %v4478_v17 = vperm.slane %v9600_v13, 7 }
0x18b2   : > { %v4395_v7 = vsel %vm484_vm1, %v4394_v2, %v4375_v49  ;;  %4504 = vmatpush.msrb.mxu2 %v7954_v62 }
0x18b3   : > { %v4413_v28 = vsel %vm484_vm1, %v4405_v3, %v4412_v5  ;;  %v4410_v55 = vrot.slane %v4405_v3, 4  ;;  %v4401_v1 = vperm.slane %v4395_v7, %v8931_v61  ;;  %v4408_v54 = vrot.slane %v4389_v4, 4 }
0x18b4   : > { %4423 = vrot.lane.b32.xlu1 %v4413_v28, %s8657_s18  ;;  %v4485_v7 = vperm.slane %v9600_v13, 2 }
0x18b5   : > { %v4411_v60 = vsel %vm484_vm1, %v4410_v55, %v4393_v39  ;;  %v4409_v14 = vsel %vm484_vm1, %v4401_v1, %v4408_v54  ;;  %v4406_v15 = vrot.slane %v4401_v1, 4 }
0x18b6   : > { %4419 = vrot.lane.b32.xlu2 %v4411_v60, %s8658_s11  ;;  %4415 = vrot.lane.b32.xlu0 %v4409_v14, %s8659_s15 }
0x18b7   : > { %v4407_v19 = vsel %vm484_vm1, %v4406_v15, %v4389_v4 }
0x18bc   : > { %4602 = vrot.lane.b32.xlu1 %v9797_v20, %s8650_s21 }
0x18c4   : > { %4604 = vrot.lane.b32.xlu1 %v9802_v22, %s8650_s21 }
0x18cc   : > { %4598 = vrot.lane.b32.xlu1 %v9802_v22, %s8652_s27 }
0x18d4   : > { %4592 = vrot.lane.b32.xlu1 %v9802_v22, %s8651_s30 }
0x1910   : > { %v4420_v27 = vpop.permute.xlu2 %4419 }
0x1926   : > { %v4424_v26 = vpop.permute.xlu1 %4423 }
0x1928   : > { %v4416_v18 = vpop.permute.xlu0 %4415 }
0x1929   : > { %v4426_v30 = vsel %vm876_vm2, %v4407_v19, %v4416_v18 }
0x192a   : > { %v4427_v31 = vsel %vm993_vm3, %v4426_v30, %v4420_v27 }
0x192b   : > { %v4428_v33 = vsel %vm1726_vm4, %v4427_v31, %v4424_v26 }
0x192c   : > { %7953 = vmatmul.msk.f32.vlgmr.msra.gmra.mxu1 %vm429_vm0, %v4428_v33 }
0x192e   : > { %v9835_v41 = vpop.permute.xlu1 %4602 }
0x192f   : > { %v8210_v55 = vpack.i.bf16 %v9835_v41, %v9797_v20 }
0x19a9   : > { %v4450_v6 = vpop.f32.mrf.mxu1 }
0x19aa   : > { %v4451_v36 = vadd.f32 %v4450_v6, %v4429_v34 }
0x19ac   : > { %v4453_v37 = vadd.f32 %v4451_v36, %v9566_v57  ;;  %v9841_v57 = vpop.permute.xlu1 %4604 }
0x19ad   : > { %v8212_v1 = vpack.i.bf16 %v9841_v57, %v9802_v22 }
0x19ae   : > { %v4454_v51 = vsel %vm429_vm0, %v4453_v37, 0.0 }
0x19af   : > { %4455 = vadd.xlane.f32.xlu2 %v4454_v51 }
0x19b4   : > { %v9862_v49 = vpop.permute.xlu1 %4598 }
0x19bc   : > { %v9870_v2 = vpop.permute.xlu1 %4592 }
0x19bd   : > { %v8221_v4 = vpack.i.bf16 %v9870_v2, %v9862_v49 }
0x19c7   : > { %4596 = vrot.lane.b32.xlu2 %v9797_v20, %s8652_s27 }
0x1a22   : > { %v4456_v59 = vpop.xlane.xlu2 %4455 }
0x1a23   : > { %v4457_v35 = vmul.f32 %v4456_v59, %v9182_v25 }
0x1a25   : > { %v4458_v38 = vsub.f32 %v4453_v37, %v4457_v35 }
0x1a27   : > { %v4459_v29 = vmul.f32 %v4458_v38, %v4458_v38 }
0x1a29   : > { %v4460_v40 = vsel %vm429_vm0, %v4459_v29, 0.0 }
0x1a2a   : > { %4461 = vadd.xlane.f32.xlu0 %v4460_v40  ;;  %v9845_v43 = vpop.permute.xlu2 %4596 }
0x1a3e   : > { %4590 = vrot.lane.b32.xlu0 %v9797_v20, %s8651_s30 }
0x1a46   : > { %4940 = vrot.lane.b32.xlu0 %v9835_v41, %s8653_s7 }
0x1a4e   : > { %4930 = vrot.lane.b32.xlu0 %v9802_v22, %s8653_s7 }
0x1a56   : > { %4942 = vrot.lane.b32.xlu0 %v9841_v57, %s8653_s7 }
0x1a5e   : > { %4936 = vrot.lane.b32.xlu0 %v9845_v43, %s8653_s7 }
0x1a9d   : > { %v4462_v46 = vpop.xlane.xlu0 %4461 }
0x1a9e   : > { %v4463_v23 = vmul.f32 %v4462_v46, %v9182_v25 }
0x1aa0   : > { %v4464_v8 = vadd.f32 1e-05, %v4463_v23 }
0x1aa2   : > { %8376 = vrsqrt.f32 %v4464_v8  ;;  %vm4471_vm11 = vweird.f32 %v4464_v8 }
0x1aa8   : > { %v8377_v47 = vpop.eup %8376 }
0x1aa9   : > { %v4466_v58 = vmul.f32 %v8377_v47, %v4464_v8  ;;  %vm4472_vm10 = vweird.f32 %v8377_v47 }
0x1aaa   : > { %vm4473_vm13 = vmor %vm4471_vm11, %vm4472_vm10 }
0x1aab   : > { %v4467_v48 = vmul.f32 %v8377_v47, %v4466_v58 }
0x1aad   : > { %v4468_v32 = vmul.f32 0.5, %v4467_v48 }
0x1aaf   : > { %v4469_v50 = vsub.f32 1.5, %v4468_v32 }
0x1ab0   : > { %v9864_v52 = vpop.permute.xlu0 %4590 }
0x1ab1   : > { %v4470_v56 = vmul.f32 %v8377_v47, %v4469_v50  ;;  %v8219_v63 = vpack.i.bf16 %v9864_v52, %v9845_v43 }
0x1ab3   : > { %v4474_v39 = vsel %vm4473_vm13, %v8377_v47, %v4470_v56  ;;  %8220 = vxpose.xlu2.b32.start [1/2] (short) (narrow) %v8219_v63, 8 }
0x1ab4   : > { %v4475_v53 = vmul.f32 %v4474_v39, %v4458_v38 }
0x1ab6   : > { %v4477_v3 = vmul.f32 %v4476_v0, %v4475_v53 }
0x1ab8   : > { %v9872_v5 = vadd.f32 %v4478_v17, %v4477_v3 }
0x1aba   : > { %7958 = vmatmul.msk.f32.vlgmr.msrb.gmra.mxu2 %vm429_vm0, %v9872_v5 }
0x1abb   : > { %8222 = vxpose.xlu2.b32.end [2/2] (short) (narrow) %v8221_v4, 8 }
0x1b3d   : > { %v4506_v21 = vpop.f32.mrf.mxu2 }
0x1b3e   : > { %v4507_v28 = vadd.f32 %v4506_v21, %v4485_v7 }
0x1b40   : > { %4515 = vrot.lane.b32.xlu1 %v4507_v28, %s8651_s30  ;;  %v4526_v19 = vrot.slane %v4507_v28, 4 }
0x1b48   : > { %4518 = vrot.lane.b32.xlu1 %v4507_v28, %s8652_s27 }
0x1b4c   : > { %v8223_v54 = vpop.trf.xlu2 }
0x1b4d   : > { %v8227_v14 = vunpack.i.h.bf16 %v8223_v54  ;;  %v8224_v13 = vunpack.i.l.bf16 %v8223_v54 }
0x1b4f   : > { %4856 = vmatpush.msrb.mxu1 %v8224_v13  ;;  %4833 = vmatpush.msrb.mxu0 %v8227_v14 }
0x1b50   : > { %4521 = vrot.lane.b32.xlu1 %v4507_v28, %s8650_s21 }
0x1b85   : > { %8211 = vxpose.xlu1.b32.start [1/2] (short) (narrow) %v8210_v55, 8 }
0x1b8d   : > { %8213 = vxpose.xlu1.b32.end [2/2] (short) (narrow) %v8212_v1, 8 }
0x1bb2   : > { %v4516_v60 = vpop.permute.xlu1 %4515 }
0x1bb3   : > { %v4538_v24 = vrot.slane %v4516_v60, 4 }
0x1bba   : > { %v4519_v15 = vpop.permute.xlu1 %4518 }
0x1bbb   : > { %v4524_v11 = vrot.slane %v4519_v15, 4  ;;  %v4527_v10 = vsel %vm484_vm1, %v4519_v15, %v4526_v19 }
0x1bbc   : > { %v4535_v12 = vperm.slane %v4527_v10, %v8914_v42 }
0x1bbd   : > { %v4525_v9 = vsel %vm484_vm1, %v4524_v11, %v4507_v28 }
0x1bbe   : > { %v4531_v18 = vperm.slane %v4525_v9, %v8914_v42  ;;  %v4562_v31 = vrot.slane %v4535_v12, 4 }
0x1bc0   : > { %v4550_v6 = vrot.slane %v4531_v18, 4 }
0x1bc2   : > { %v4522_v27 = vpop.permute.xlu1 %4521 }
0x1bc3   : > { %v4536_v30 = vrot.slane %v4522_v27, 4  ;;  %v4539_v26 = vsel %vm484_vm1, %v4522_v27, %v4538_v24 }
0x1bc4   : > { %v4547_v33 = vperm.slane %v4539_v26, %v8914_v42 }
0x1bc5   : > { %v4537_v34 = vsel %vm484_vm1, %v4536_v30, %v4516_v60 }
0x1bc6   : > { %v4543_v36 = vperm.slane %v4537_v34, %v8914_v42  ;;  %v4560_v37 = vrot.slane %v4547_v33, 4  ;;  %v4563_v51 = vsel %vm484_vm1, %v4547_v33, %v4562_v31 }
0x1bc7   : > { %v4571_v59 = vperm.slane %v4563_v51, %v8931_v61 }
0x1bc8   : > { %v4548_v35 = vrot.slane %v4543_v36, 4  ;;  %v4551_v38 = vsel %vm484_vm1, %v4543_v36, %v4550_v6  ;;  %v4561_v29 = vsel %vm484_vm1, %v4560_v37, %v4535_v12 }
0x1bc9   : > { %v4559_v40 = vperm.slane %v4551_v38, %v8931_v61  ;;  %v4567_v44 = vperm.slane %v4561_v29, %v8931_v61  ;;  %v4578_v45 = vrot.slane %v4571_v59, 4  ;;  %v4586_v62 = vmul.f32 0.35355338, %v4571_v59 }
0x1bca   : > { %v4549_v16 = vsel %vm484_vm1, %v4548_v35, %v4531_v18 }
0x1bcb   : > { %v4555_v46 = vperm.slane %v4549_v16, %v8931_v61  ;;  %v4574_v23 = vrot.slane %v4559_v40, 4  ;;  %v4576_v8 = vrot.slane %v4567_v44, 4  ;;  %v4579_v47 = vsel %vm484_vm1, 0.0, %v4578_v45 }
0x1bcc   : > { %v4582_v58 = vmul.f32 0.35355338, %v4559_v40  ;;  %v4584_v48 = vmul.f32 0.35355338, %v4567_v44  ;;  %v4587_v32 = vmul.f32 0.35355338, %v4579_v47 }
0x1bcd   : > { %v4572_v50 = vrot.slane %v4555_v46, 4  ;;  %v4575_v56 = vsel %vm484_vm1, 0.0, %v4574_v23  ;;  %v4577_v63 = vsel %vm484_vm1, 0.0, %v4576_v8  ;;  %v4580_v0 = vmul.f32 0.35355338, %v4555_v46  ;;  %v4941_v8 = vpop.permute.xlu0 %4940 }
0x1bce   : > { %v4583_v39 = vmul.f32 0.35355338, %v4575_v56  ;;  %v4585_v53 = vmul.f32 0.35355338, %v4577_v63  ;;  %v4608_v17 = vrot.slane %v4582_v58, 4  ;;  %v4620_v3 = vrot.slane %v4586_v62, 4 }
0x1bcf   : > { %v4573_v4 = vsel %vm484_vm1, 0.0, %v4572_v50  ;;  %v4626_v7 = vrot.slane %v4587_v32, 4 }
0x1bd0   : > { %v4581_v21 = vmul.f32 0.35355338, %v4573_v4  ;;  %v4614_v28 = vrot.slane %v4583_v39, 4  ;;  %v4621_v55 = vsel %vm484_vm1, %v4620_v3, %v4584_v48  ;;  %v4609_v1 = vsel %vm484_vm1, %v4608_v17, %v4580_v0 }
0x1bd1   : > { %v4625_v54 = vperm.slane %v4621_v55, %v8914_v42  ;;  %v4627_v60 = vsel %vm484_vm1, %v4626_v7, %v4585_v53  ;;  %v4613_v14 = vperm.slane %v4609_v1, %v8914_v42 }
0x1bd2   : > { %v4615_v13 = vsel %vm484_vm1, %v4614_v28, %v4581_v21  ;;  %v4631_v15 = vperm.slane %v4627_v60, %v8914_v42 }
0x1bd3   : > { %v4619_v11 = vperm.slane %v4615_v13, %v8914_v42  ;;  %v4634_v19 = vrot.slane %v4613_v14, 4  ;;  %v4646_v10 = vrot.slane %v4625_v54, 4 }
0x1bd4   : > { %v4644_v9 = vrot.slane %v4631_v15, 4 }
0x1bd5   : > { %v4635_v12 = vsel %vm484_vm1, %v4619_v11, %v4634_v19  ;;  %v4647_v24 = vsel %vm484_vm1, %v4631_v15, %v4646_v10  ;;  %v4632_v18 = vrot.slane %v4619_v11, 4  ;;  %v4931_v58 = vpop.permute.xlu0 %4930 }
0x1bd6   : > { %v4643_v27 = vperm.slane %v4635_v12, %v8931_v61  ;;  %v4655_v30 = vperm.slane %v4647_v24, %v8931_v61  ;;  %v4645_v26 = vsel %vm484_vm1, %v4644_v9, %v4625_v54 }
0x1bd7   : > { %v4633_v31 = vsel %vm484_vm1, %v4632_v18, %v4613_v14  ;;  %v4651_v33 = vperm.slane %v4645_v26, %v8931_v61 }
0x1bd8   : > { %v4660_v34 = vrot.slane %v4655_v30, 4  ;;  %v4639_v6 = vperm.slane %v4633_v31, %v8931_v61  ;;  %v4662_v36 = vrot.slane %v4643_v27, 4 }
0x1bd9   : > { %v4656_v37 = vrot.slane %v4651_v33, 4 }
0x1bda   : > { %v4661_v51 = vsel %vm484_vm1, %v4660_v34, %v4643_v27  ;;  %v4658_v59 = vrot.slane %v4639_v6, 4  ;;  %v4663_v35 = vsel %vm484_vm1, %v4655_v30, %v4662_v36 }
0x1bdb   : > { %7965 = vmatmul.msk.f32.vlgmr.msrb.gmra.mxu1 %vm876_vm2, %v4661_v51  ;;  %v4657_v38 = vsel %vm484_vm1, %v4656_v37, %v4639_v6 }
0x1bdc   : > { %v4659_v29 = vsel %vm484_vm1, %v4651_v33, %v4658_v59 }
0x1bdd   : > { %7964 = vmatmul.msk.f32.vlgmr.msrb.gmra.mxu0 %vm876_vm2, %v4659_v29  ;;  %v4943_v53 = vpop.permute.xlu0 %4942 }
0x1be5   : > { %v4937_v4 = vpop.permute.xlu0 %4936 }
0x1be7   : > { %4928 = vrot.lane.b32.xlu1 %v9797_v20, %s8653_s7 }
0x1bef   : > { %4938 = vrot.lane.b32.xlu1 %v9862_v49, %s8653_s7 }
0x1c29   : > { %v8214_v40 = vpop.trf.xlu1 }
0x1c2a   : > { %v8218_v44 = vunpack.i.h.bf16 %v8214_v40  ;;  %v8215_v45 = vunpack.i.l.bf16 %v8214_v40 }
0x1c2c   : > { %4810 = vmatpush.msrb.mxu3 %v8215_v45  ;;  %4879 = vmatpush.msra.mxu2 %v8218_v44 }
0x1c2d   : > { %7963 = vmatmul.msk.f32.vlgmr.msrb.gmra.mxu3 %vm876_vm2, %v4657_v38  ;;  %7966 = vmatmul.msk.f32.vlgmr.msra.gmra.mxu2 %vm876_vm2, %v4663_v35 }
0x1c58   : > { %v4858_v16 = vpop.f32.mrf.mxu1 }
0x1c59   : > { %v4890_v62 = vsel %vm993_vm3, %v4858_v16, -inf  ;;  %v4929_v47 = vpop.permute.xlu1 %4928 }
0x1c5a   : > { %4891 = vmax.xlane.f32.xlu2 %v4890_v62  ;;  %v4835_v46 = vpop.f32.mrf.mxu0 }
0x1c5b   : > { %v4887_v23 = vsel %vm993_vm3, %v4835_v46, -inf }
0x1c5c   : > { %4888 = vmax.xlane.f32.xlu0 %v4887_v23 }
0x1c61   : > { %v4939_v18 = vpop.permute.xlu1 %4938 }
0x1c72   : > { %4934 = vrot.lane.b32.xlu2 %v9870_v2, %s8653_s7 }
0x1c98   : > { %4952 = vxpose.xlu2.b32.start [1/2] (short) (narrow) %v4929_v47, 8 }
0x1ca0   : > { %4953 = vxpose.xlu2.b32.end [2/2] (short) (narrow) %v4931_v58, 8 }
0x1cb0   : > { %v4812_v48 = vpop.f32.mrf.mxu3  ;;  %v4881_v50 = vpop.f32.mrf.mxu2 }
0x1cb1   : > { %v4884_v32 = vsel %vm993_vm3, %v4812_v48, -inf  ;;  %v4893_v56 = vsel %vm993_vm3, %v4881_v50, -inf }
0x1cb2   : > { %4885 = vmax.xlane.f32.xlu0 %v4884_v32 }
0x1cba   : > { %4894 = vmax.xlane.f32.xlu0 %v4893_v56 }
0x1ccd   : > { %v4892_v63 = vpop.xlane.xlu2 %4891 }
0x1cce   : > { %v4898_v0 = vsub.f32 %v4858_v16, %v4892_v63  ;;  %4932 = vrot.lane.b32.xlu0 %v9864_v52, %s8653_s7 }
0x1ccf   : > { %v4889_v7 = vpop.xlane.xlu0 %4888 }
0x1cd0   : > { %v4904_v39 = vmul.f32 1.442695, %v4898_v0  ;;  %v4897_v21 = vsub.f32 %v4835_v46, %v4889_v7 }
0x1cd2   : > { %8378 = vpow2.f32 %v4904_v39  ;;  %v4902_v28 = vmul.f32 1.442695, %v4897_v21 }
0x1cd4   : > { %8380 = vpow2.f32 %v4902_v28 }
0x1cd5   : > { %v4935_v27 = vpop.permute.xlu2 %4934 }
0x1cd8   : > { %v8379_v17 = vpop.eup %8378 }
0x1cd9   : > { %v4914_v3 = vsel %vm993_vm3, %v8379_v17, 0.0 }
0x1cda   : > { %4915 = vadd.xlane.f32.xlu1 %v4914_v3  ;;  %v8381_v55 = vpop.eup %8380 }
0x1cdb   : > { %v4911_v1 = vsel %vm993_vm3, %v8381_v55, 0.0 }
0x1cf8   : > { %4912 = vadd.xlane.f32.xlu0 %v4911_v1 }
0x1d14   : > { %5048 = vxpose.xlu1.b32.start [1/2] (short) (narrow) %v4941_v8, 8 }
0x1d1c   : > { %5049 = vxpose.xlu1.b32.end [2/2] (short) (narrow) %v4943_v53, 8 }
0x1d25   : > { %v4886_v54 = vpop.xlane.xlu0 %4885 }
0x1d26   : > { %v4896_v60 = vsub.f32 %v4812_v48, %v4886_v54 }
0x1d28   : > { %v4900_v14 = vmul.f32 1.442695, %v4896_v60 }
0x1d2a   : > { %8382 = vpow2.f32 %v4900_v14 }
0x1d2d   : > { %v4895_v13 = vpop.xlane.xlu0 %4894 }
0x1d2e   : > { %v4899_v15 = vsub.f32 %v4881_v50, %v4895_v13 }
0x1d30   : > { %v8383_v11 = vpop.eup %8382  ;;  %v4906_v19 = vmul.f32 1.442695, %v4899_v15 }
0x1d31   : > { %v4908_v10 = vsel %vm993_vm3, %v8383_v11, 0.0  ;;  %v4968_v35 = vpop.trf.xlu2 }
0x1d32   : > { %8384 = vpow2.f32 %v4906_v19  ;;  %4909 = vadd.xlane.f32.xlu0 %v4908_v10 }
0x1d38   : > { %v8385_v9 = vpop.eup %8384 }
0x1d39   : > { %v4917_v12 = vsel %vm993_vm3, %v8385_v9, 0.0 }
0x1d3a   : > { %4918 = vadd.xlane.f32.xlu0 %v4917_v12 }
0x1d40   : > { %v4933_v24 = vpop.permute.xlu0 %4932 }
0x1d41   : > { %4984 = vxpose.xlu2.b32.start [1/2] (short) (narrow) %v4933_v24, 8 }
0x1d49   : > { %4985 = vxpose.xlu2.b32.end [2/2] (short) (narrow) %v4935_v27, 8 }
0x1d4d   : > { %v4916_v30 = vpop.xlane.xlu1 %4915 }
0x1d4e   : > { %8386 = vrcp.f32 %v4916_v30 }
0x1d54   : > { %v8387_v26 = vpop.eup %8386 }
0x1d55   : > { %v4926_v31 = vmul.f32 %v8387_v26, %v8379_v17 }
0x1d57   : > { %7971 = vmatpush.xpose.msk.msra.mxu1 %vm993_vm3, %v4926_v31 }
0x1d63   : > { %5016 = vxpose.xlu0.b32.start [1/2] (short) (narrow) %v4937_v4, 8 }
0x1d6b   : > { %5017 = vxpose.xlu0.b32.end [2/2] (short) (narrow) %v4939_v18, 8  ;;  %v4913_v33 = vpop.xlane.xlu0 %4912 }
0x1d6c   : > { %8388 = vrcp.f32 %v4913_v33 }
0x1d72   : > { %v8389_v34 = vpop.eup %8388 }
0x1d73   : > { %v4925_v6 = vmul.f32 %v8389_v34, %v8381_v55 }
0x1d75   : > { %7969 = vmatpush.xpose.msk.msra.mxu0 %vm993_vm3, %v4925_v6 }
0x1da5   : > { %v4910_v36 = vpop.xlane.xlu0 %4909 }
0x1da6   : > { %8390 = vrcp.f32 %v4910_v36 }
0x1dac   : > { %v8391_v37 = vpop.eup %8390 }
0x1dad   : > { %v4924_v51 = vmul.f32 %v8391_v37, %v8383_v11  ;;  %v4919_v59 = vpop.xlane.xlu0 %4918 }
0x1dae   : > { %8392 = vrcp.f32 %v4919_v59 }
0x1daf   : > { %7967 = vmatpush.xpose.msk.msra.mxu3 %vm993_vm3, %v4924_v51 }
0x1db2   : > { %7968 = vmatmul.msk.f32.vlgmr.msra.gmra.mxu3 %vm993_vm3, %v4968_v35 }
0x1db4   : > { %v8393_v38 = vpop.eup %8392 }
0x1db5   : > { %v4927_v29 = vmul.f32 %v8393_v38, %v8385_v9 }
0x1db7   : > { %7973 = vmatpush.xpose.msk.msrb.mxu2 %vm993_vm3, %v4927_v29 }
0x1db8   : > { %v5064_v44 = vpop.trf.xlu1 }
0x1dba   : > { %7974 = vmatmul.msk.f32.vlgmr.msrb.gmra.mxu2 %vm993_vm3, %v5064_v44 }
0x1dda   : > { %v5000_v40 = vpop.trf.xlu2 }
0x1ddb   : > { %7970 = vmatmul.msk.f32.vlgmr.msra.gmra.mxu0 %vm993_vm3, %v5000_v40 }
0x1e07   : > { %v5032_v45 = vpop.trf.xlu0 }
0x1e08   : > { %7972 = vmatmul.msk.f32.vlgmr.msra.gmra.mxu1 %vm993_vm3, %v5032_v45 }
0x1e35   : > { %v5103_v46 = vpop.f32.mrf.mxu3 }
0x1e3d   : > { %v5181_v23 = vpop.f32.mrf.mxu2 }
0x1e58   : > { %v5129_v16 = vpop.f32.mrf.mxu0 }
0x1e59   : > { %5216 = vxpose.xlu1.b32.start.end [1/1] (short) (narrow) %v5129_v16, 8 }
0x1e85   : > { %v5155_v62 = vpop.f32.mrf.mxu1 }
0x1e86   : > { %5248 = vxpose.xlu2.b32.start.end [1/1] (short) (narrow) %v5155_v62, 8 }
0x1e8e   : > { %5184 = vxpose.xlu2.b32.start.end [1/1] (short) (narrow) %v5103_v46, 8 }
0x1e96   : > { %5280 = vxpose.xlu2.b32.start.end [1/1] (short) (narrow) %v5181_v23, 8 }
0x1efd   : > { %v5232_v48 = vpop.trf.xlu1 }
0x1efe   : > { %v5326_v63 = vrot.slane %v5232_v48, 4 }
0x1f1f   : > { %v5264_v8 = vpop.trf.xlu2 }
0x1f20   : > { %v5312_v32 = vrot.slane %v5264_v8, 4 }
0x1f27   : > { %v5200_v47 = vpop.trf.xlu2 }
0x1f28   : > { %v5314_v58 = vrot.slane %v5200_v47, 4  ;;  %v5313_v56 = vsel %vm484_vm1, %v5312_v32, %v5200_v47 }
0x1f29   : > { %v5319_v39 = vperm.slane %v5313_v56, %v8914_v42 }
0x1f2a   : > { %v5315_v50 = vsel %vm484_vm1, %v5264_v8, %v5314_v58 }
0x1f2b   : > { %v5323_v0 = vperm.slane %v5315_v50, %v8914_v42  ;;  %v5338_v28 = vrot.slane %v5319_v39, 4 }
0x1f2d   : > { %v5350_v4 = vrot.slane %v5323_v0, 4 }
0x1f2f   : > { %v5296_v53 = vpop.trf.xlu2 }
0x1f30   : > { %v5324_v17 = vrot.slane %v5296_v53, 4  ;;  %v5327_v3 = vsel %vm484_vm1, %v5296_v53, %v5326_v63 }
0x1f31   : > { %v5335_v7 = vperm.slane %v5327_v3, %v8914_v42 }
0x1f32   : > { %v5325_v21 = vsel %vm484_vm1, %v5324_v17, %v5232_v48 }
0x1f33   : > { %v5331_v55 = vperm.slane %v5325_v21, %v8914_v42  ;;  %v5348_v1 = vrot.slane %v5335_v7, 4  ;;  %v5351_v54 = vsel %vm484_vm1, %v5335_v7, %v5350_v4  ;;  %v7962_v7 = vld [vmem:[%s10483_s3 + $0x98] sm:$0xff]  ;;  %v7961_v21 = vld [vmem:[%s10483_s3 + $0x90] sm:$0xff] }
0x1f34   : > { %v5359_v60 = vperm.slane %v5351_v54, %v8931_v61  ;;  %5453 = vmatpush.msrb.mxu3 %v7962_v7 }
0x1f35   : > { %v5336_v14 = vrot.slane %v5331_v55, 4  ;;  %v5339_v13 = vsel %vm484_vm1, %v5331_v55, %v5338_v28  ;;  %v5349_v15 = vsel %vm484_vm1, %v5348_v1, %v5323_v0  ;;  %v7960_v28 = vld [vmem:[%s10483_s3 + $0x88] sm:$0xff]  ;;  %v7959_v55 = vld [vmem:[%s10483_s3 + $0x80] sm:$0xff] }
0x1f36   : > { %v5347_v11 = vperm.slane %v5339_v13, %v8931_v61  ;;  %v5355_v19 = vperm.slane %v5349_v15, %v8931_v61  ;;  %v5366_v10 = vrot.slane %v5359_v60, 4  ;;  %5454 = vmatpush.msrb.mxu3 %v7961_v21 }
0x1f37   : > { %v5337_v9 = vsel %vm484_vm1, %v5336_v14, %v5319_v39 }
0x1f38   : > { %v5343_v12 = vperm.slane %v5337_v9, %v8931_v61  ;;  %v5362_v24 = vrot.slane %v5347_v11, 4  ;;  %v5364_v18 = vrot.slane %v5355_v19, 4  ;;  %v5367_v27 = vsel %vm484_vm1, 0.0, %v5366_v10  ;;  %5455 = vmatpush.msrb.mxu3 %v7960_v28  ;;  %v10013_v11 = vld [vmem:[#allocation9 + $0x10] sm:$0xff] }
0x1f39   : > { %v5379_v30 = vsel %vm484_vm1, %v5366_v10, %v5355_v19  ;;  %v5384_v26 = vrot.slane %v5367_v27, 4  ;;  %v5437_v19 = vperm.slane %v10013_v11, 3  ;;  %v5527_v7 = vperm.slane %v10013_v11, 5 }
0x1f3a   : > { %v5360_v31 = vrot.slane %v5343_v12, 4  ;;  %v5363_v33 = vsel %vm484_vm1, 0.0, %v5362_v24  ;;  %v5365_v34 = vsel %vm484_vm1, 0.0, %v5364_v18  ;;  %v5383_v6 = vperm.slane %v5379_v30, %v8914_v42  ;;  %5456 = vmatpush.msrb.mxu3 %v7959_v55 }
0x1f3b   : > { %v5373_v36 = vrot.slane %v5363_v33, 4  ;;  %v5385_v37 = vsel %vm484_vm1, %v5384_v26, %v5365_v34  ;;  %v5368_v51 = vsel %vm484_vm1, %v5362_v24, %v5343_v12  ;;  %v5492_v33 = vld [vmem:[#allocation6 + $0x58] sm:$0xff]  ;;  %v5491_v34 = vld [vmem:[#allocation6 + $0x50] sm:$0xff] }
0x1f3c   : > { %v5361_v59 = vsel %vm484_vm1, 0.0, %v5360_v31  ;;  %v5372_v35 = vperm.slane %v5368_v51, %v8914_v42  ;;  %v5389_v38 = vperm.slane %v5385_v37, %v8914_v42  ;;  %v5404_v29 = vrot.slane %v5383_v6, 4  ;;  %5518 = vmatpush.msrb.mxu0 %v5492_v33  ;;  %v7982_v37 = vld [vmem:[%s10485_s5 + $0xb0] sm:$0xff]  ;;  %v7981_v51 = vld [vmem:[%s10485_s5 + $0xa8] sm:$0xff] }
0x1f3d   : > { %v5374_v40 = vsel %vm484_vm1, %v5373_v36, %v5361_v59  ;;  %v5489_v36 = vld [vmem:[#allocation6 + $0x40] sm:$0xff] }
0x1f3e   : > { %v5378_v44 = vperm.slane %v5374_v40, %v8914_v42  ;;  %v5392_v45 = vrot.slane %v5372_v35, 4  ;;  %v5405_v16 = vsel %vm484_vm1, %v5389_v38, %v5404_v29  ;;  %v5402_v62 = vrot.slane %v5389_v38, 4  ;;  %5519 = vmatpush.msrb.mxu0 %v5491_v34  ;;  %v7980_v38 = vld [vmem:[%s10485_s5 + $0xa0] sm:$0xff]  ;;  %v7979_v40 = vld [vmem:[%s10485_s5 + $0x98] sm:$0xff] }
0x1f3f   : > { %v5413_v46 = vperm.slane %v5405_v16, %v8931_v61 }
0x1f40   : > { %v5393_v23 = vsel %vm484_vm1, %v5378_v44, %v5392_v45  ;;  %v5390_v8 = vrot.slane %v5378_v44, 4  ;;  %v5403_v47 = vsel %vm484_vm1, %v5402_v62, %v5383_v6  ;;  %v5490_v6 = vld [vmem:[#allocation6 + $0x48] sm:$0xff] }
0x1f41   : > { %v5401_v58 = vperm.slane %v5393_v23, %v8931_v61  ;;  %v5418_v48 = vrot.slane %v5413_v46, 4  ;;  %v5409_v32 = vperm.slane %v5403_v47, %v8931_v61  ;;  %5520 = vmatpush.msrb.mxu0 %v5490_v6 }
0x1f42   : > { %v5391_v50 = vsel %vm484_vm1, %v5390_v8, %v5372_v35 }
0x1f43   : > { %v5419_v56 = vsel %vm484_vm1, %v5418_v48, %v5401_v58  ;;  %v5420_v63 = vrot.slane %v5401_v58, 4  ;;  %v5397_v0 = vperm.slane %v5391_v50, %v8931_v61  ;;  %v5414_v39 = vrot.slane %v5409_v32, 4  ;;  %5521 = vmatpush.msrb.mxu0 %v5489_v36 }
0x1f44   : > { %5427 = vrot.lane.b32.xlu2 %v5419_v56, %s8658_s11 }
0x1f45   : > { %v5421_v53 = vsel %vm484_vm1, %v5413_v46, %v5420_v63  ;;  %v5416_v17 = vrot.slane %v5397_v0, 4  ;;  %v5415_v3 = vsel %vm484_vm1, %v5414_v39, %v5397_v0  ;;  %v10036_v46 = vld [vmem:[#allocation9 + $0x18] sm:$0xff]  ;;  %v7978_v63 = vld [vmem:[%s10485_s5 + $0x90] sm:$0xff]  ;;  %v7976_v39 = vld [vmem:[%s10485_s5 + $0x80] sm:$0xff] }
0x1f46   : > { %5431 = vrot.lane.b32.xlu1 %v5421_v53, %s8657_s18  ;;  %v5484_v47 = vperm.slane %v10036_v46, 0  ;;  %v7977_v0 = vld [vmem:[%s10485_s5 + $0x88] sm:$0xff]  ;;  %v5502_v53 = vperm.slane %v10013_v11, 4  ;;  %v7988_v11 = vld [vmem:[%s10482_s2 + $0x70] sm:$0xff]  ;;  %v5574_v6 = vperm.slane %v10036_v46, 2 }
0x1f47   : > { %v5417_v4 = vsel %vm484_vm1, %v5409_v32, %v5416_v17  ;;  %v5486_v32 = vperm.slane %v10036_v46, 1 }
0x1f48   : > { %5423 = vrot.lane.b32.xlu0 %v5417_v4, %s8659_s15 }
0x1f9e   : > { %v5428_v54 = vpop.permute.xlu2 %5427 }
0x1fb8   : > { %v5432_v14 = vpop.permute.xlu1 %5431 }
0x1fba   : > { %v5424_v1 = vpop.permute.xlu0 %5423 }
0x1fbb   : > { %v5434_v60 = vsel %vm876_vm2, %v5415_v3, %v5424_v1 }
0x1fbc   : > { %v5435_v13 = vsel %vm993_vm3, %v5434_v60, %v5428_v54 }
0x1fbd   : > { %v5436_v15 = vsel %vm1726_vm4, %v5435_v13, %v5432_v14 }
0x1fbe   : > { %7975 = vmatmul.msk.f32.vlgmr.msrb.gmra.mxu3 %vm429_vm0, %v5436_v15 }
0x2041   : > { %v5458_v10 = vpop.f32.mrf.mxu3 }
0x2042   : > { %v5459_v9 = vadd.f32 %v5458_v10, %v5437_v19  ;;  %v7989_v19 = vld [vmem:[%s10482_s2 + $0x78] sm:$0xff]  ;;  %v7987_v10 = vld [vmem:[%s10482_s2 + $0x68] sm:$0xff] }
0x2043   : > { %5626 = vmatpush.msra.mxu2 %v7989_v19 }
0x2044   : > { %v5461_v12 = vadd.f32 %v5459_v9, %v9872_v5  ;;  %v7983_v5 = vld [vmem:[%s10485_s5 + $0xb8] sm:$0xff]  ;;  %v7986_v9 = vld [vmem:[%s10482_s2 + $0x60] sm:$0xff] }
0x2045   : > { %5539 = vmatpush.msrb.mxu1 %v7983_v5  ;;  %5627 = vmatpush.msra.mxu2 %v7988_v11 }
0x2046   : > { %v5462_v24 = vsel %vm429_vm0, %v5461_v12, 0.0 }
0x2047   : > { %5463 = vadd.xlane.f32.xlu1 %v5462_v24  ;;  %5540 = vmatpush.msrb.mxu1 %v7982_v37  ;;  %v5576_v37 = vperm.slane %v10036_v46, 3 }
0x2048   : > { %5628 = vmatpush.msra.mxu2 %v7987_v10 }
0x2049   : > { %5541 = vmatpush.msrb.mxu1 %v7981_v51 }
0x204a   : > { %5629 = vmatpush.msra.mxu2 %v7986_v9 }
0x204b   : > { %5542 = vmatpush.msrb.mxu1 %v7980_v38 }
0x204d   : > { %5543 = vmatpush.msrb.mxu1 %v7979_v40 }
0x204f   : > { %5544 = vmatpush.msrb.mxu1 %v7978_v63 }
0x2051   : > { %5545 = vmatpush.msrb.mxu1 %v7977_v0 }
0x2053   : > { %5546 = vmatpush.msrb.mxu1 %v7976_v39 }
0x20ba   : > { %v5464_v18 = vpop.xlane.xlu1 %5463 }
0x20bb   : > { %v5465_v27 = vmul.f32 %v5464_v18, %v9182_v25 }
0x20bd   : > { %v5466_v30 = vsub.f32 %v5461_v12, %v5465_v27 }
0x20bf   : > { %v5467_v26 = vmul.f32 %v5466_v30, %v5466_v30 }
0x20c1   : > { %v5468_v31 = vsel %vm429_vm0, %v5467_v26, 0.0 }
0x20c2   : > { %5469 = vadd.xlane.f32.xlu2 %v5468_v31 }
0x2135   : > { %v5470_v59 = vpop.xlane.xlu2 %5469 }
0x2136   : > { %v5471_v35 = vmul.f32 %v5470_v59, %v9182_v25 }
0x2138   : > { %v5472_v29 = vadd.f32 1e-05, %v5471_v35  ;;  %v5610_v35 = vperm.slane %v10036_v46, 4 }
0x213a   : > { %8394 = vrsqrt.f32 %v5472_v29  ;;  %vm5479_vm15 = vweird.f32 %v5472_v29 }
0x2140   : > { %v8395_v44 = vpop.eup %8394 }
0x2141   : > { %v5474_v45 = vmul.f32 %v8395_v44, %v5472_v29  ;;  %vm5480_vm14 = vweird.f32 %v8395_v44 }
0x2142   : > { %vm5481_vm5 = vmor %vm5479_vm15, %vm5480_vm14 }
0x2143   : > { %v5475_v16 = vmul.f32 %v8395_v44, %v5474_v45 }
0x2145   : > { %v5476_v62 = vmul.f32 0.5, %v5475_v16 }
0x2147   : > { %v5477_v23 = vsub.f32 1.5, %v5476_v62 }
0x2149   : > { %v5478_v8 = vmul.f32 %v8395_v44, %v5477_v23 }
0x214b   : > { %v5482_v58 = vsel %vm5481_vm5, %v8395_v44, %v5478_v8 }
0x214c   : > { %v5483_v48 = vmul.f32 %v5482_v58, %v5466_v30 }
0x214e   : > { %v5485_v50 = vmul.f32 %v5484_v47, %v5483_v48 }
0x2150   : > { %v5487_v56 = vadd.f32 %v5486_v32, %v5485_v50 }
0x2152   : > { %7984 = vmatmul.msk.f32.vlgmr.msrb.gmra.mxu0 %vm429_vm0, %v5487_v56 }
0x21cf   : > { %v5523_v17 = vpop.f32.mrf.mxu0 }
0x21d0   : > { %v5524_v3 = vadd.f32 %v5523_v17, %v5502_v53 }
0x21d2   : > { %v5526_v4 = vmax.f32 %v5524_v3, 0.0 }
0x21d4   : > { %7985 = vmatmul.msk.f32.vlgmr.msrb.gmra.mxu1 %vm1863_vm12, %v5526_v4 }
0x2251   : > { %v5548_v21 = vpop.f32.mrf.mxu1 }
0x2252   : > { %v5549_v28 = vadd.f32 %v5548_v21, %v5527_v7 }
0x2254   : > { %v5551_v55 = vadd.f32 %v5549_v28, %v5487_v56 }
0x2256   : > { %v5552_v1 = vsel %vm429_vm0, %v5551_v55, 0.0 }
0x2257   : > { %5553 = vadd.xlane.f32.xlu0 %v5552_v1 }
0x22ca   : > { %v5554_v54 = vpop.xlane.xlu0 %5553 }
0x22cb   : > { %v5555_v60 = vmul.f32 %v5554_v54, %v9182_v25 }
0x22cd   : > { %v5556_v14 = vsub.f32 %v5551_v55, %v5555_v60 }
0x22cf   : > { %v5557_v13 = vmul.f32 %v5556_v14, %v5556_v14 }
0x22d1   : > { %v5558_v15 = vsel %vm429_vm0, %v5557_v13, 0.0 }
0x22d2   : > { %5559 = vadd.xlane.f32.xlu1 %v5558_v15 }
0x2345   : > { %v5560_v12 = vpop.xlane.xlu1 %5559 }
0x2346   : > { %v5561_v24 = vmul.f32 %v5560_v12, %v9182_v25 }
0x2348   : > { %v5562_v18 = vadd.f32 1e-05, %v5561_v24 }
0x234a   : > { %8396 = vrsqrt.f32 %v5562_v18  ;;  %vm5569_vm7 = vweird.f32 %v5562_v18 }
0x2350   : > { %v8397_v27 = vpop.eup %8396 }
0x2351   : > { %v5564_v30 = vmul.f32 %v8397_v27, %v5562_v18  ;;  %vm5570_vm6 = vweird.f32 %v8397_v27 }
0x2352   : > { %vm5571_vm8 = vmor %vm5569_vm7, %vm5570_vm6 }
0x2353   : > { %v5565_v26 = vmul.f32 %v8397_v27, %v5564_v30 }
0x2355   : > { %v5566_v31 = vmul.f32 0.5, %v5565_v26 }
0x2357   : > { %v5567_v33 = vsub.f32 1.5, %v5566_v31 }
0x2359   : > { %v5568_v34 = vmul.f32 %v8397_v27, %v5567_v33 }
0x235b   : > { %v5572_v36 = vsel %vm5571_vm8, %v8397_v27, %v5568_v34 }
0x235c   : > { %v5573_v5 = vmul.f32 %v5572_v36, %v5556_v14 }
0x235e   : > { %v5575_v51 = vmul.f32 %v5574_v6, %v5573_v5 }
0x2360   : > { %v10071_v59 = vadd.f32 %v5576_v37, %v5575_v51 }
0x2362   : > { %7990 = vmatmul.msk.f32.vlgmr.msra.gmra.mxu2 %vm429_vm0, %v10071_v59 }
0x23e5   : > { %v5631_v38 = vpop.f32.mrf.mxu2 }
0x23e6   : > { %v10076_v29 = vadd.f32 %v5631_v38, %v5610_v35 }
0x23e8   : > { %5640 = vrot.lane.b32.xlu0 %v10076_v29, %s8651_s30  ;;  %5646 = vrot.lane.b32.xlu2 %v10076_v29, %s8650_s21  ;;  %v5651_v16 = vrot.slane %v10076_v29, 4 }
0x23e9   : > { %5643 = vrot.lane.b32.xlu1 %v10076_v29, %s8652_s27 }
0x23f1   : > { %5769 = vrot.lane.b32.xlu1 %v10076_v29, %s8653_s7 }
0x2442   : > { %v10086_v40 = vpop.permute.xlu2 %5646 }
0x2443   : > { %v5661_v44 = vrot.slane %v10086_v40, 4 }
0x245a   : > { %v10089_v45 = vpop.permute.xlu0 %5640 }
0x245b   : > { %v5662_v62 = vsel %vm484_vm1, %v5661_v44, %v10089_v45  ;;  %v5663_v23 = vrot.slane %v10089_v45, 4  ;;  %v10095_v8 = vpop.permute.xlu1 %5643  ;;  %5771 = vrot.lane.b32.xlu2 %v10089_v45, %s8653_s7 }
0x245c   : > { %v5668_v47 = vperm.slane %v5662_v62, %v8914_v42  ;;  %v5649_v58 = vrot.slane %v10095_v8, 4  ;;  %v8228_v48 = vpack.i.bf16 %v10086_v40, %v10095_v8  ;;  %v5652_v32 = vsel %vm484_vm1, %v10095_v8, %v5651_v16 }
0x245d   : > { %v5664_v50 = vsel %vm484_vm1, %v10086_v40, %v5663_v23  ;;  %v5660_v56 = vperm.slane %v5652_v32, %v8914_v42 }
0x245e   : > { %v5672_v63 = vperm.slane %v5664_v50, %v8914_v42  ;;  %v5673_v0 = vrot.slane %v5668_v47, 4  ;;  %v5650_v39 = vsel %vm484_vm1, %v5649_v58, %v10076_v29  ;;  %8229 = vrot.lane.b32.xlu0 %v8228_v48, %s8653_s7 }
0x245f   : > { %v5656_v53 = vperm.slane %v5650_v39, %v8914_v42  ;;  %v5687_v17 = vrot.slane %v5660_v56, 4 }
0x2460   : > { %v5685_v3 = vrot.slane %v5672_v63, 4 }
0x2461   : > { %v5674_v4 = vsel %vm484_vm1, %v5673_v0, %v5656_v53  ;;  %v5675_v7 = vrot.slane %v5656_v53, 4  ;;  %v5688_v21 = vsel %vm484_vm1, %v5672_v63, %v5687_v17 }
0x2462   : > { %v5680_v28 = vperm.slane %v5674_v4, %v8931_v61  ;;  %v5686_v55 = vsel %vm484_vm1, %v5685_v3, %v5660_v56  ;;  %v5696_v1 = vperm.slane %v5688_v21, %v8931_v61 }
0x2463   : > { %v5676_v54 = vsel %vm484_vm1, %v5668_v47, %v5675_v7  ;;  %v5692_v60 = vperm.slane %v5686_v55, %v8931_v61  ;;  %v5770_v14 = vpop.permute.xlu1 %5769 }
0x2464   : > { %v5684_v13 = vperm.slane %v5676_v54, %v8931_v61  ;;  %v5697_v15 = vrot.slane %v5680_v28, 4  ;;  %v5703_v19 = vrot.slane %v5696_v1, 4  ;;  %5781 = vxpose.xlu1.b32.start.end [1/1] (short) (narrow) %v5770_v14, 8  ;;  %v5711_v9 = vmul.f32 0.35355338, %v5696_v1 }
0x2465   : > { %v5701_v11 = vrot.slane %v5692_v60, 4  ;;  %v5709_v10 = vmul.f32 0.35355338, %v5692_v60  ;;  %v5705_v27 = vmul.f32 0.35355338, %v5680_v28 }
0x2466   : > { %v5699_v12 = vrot.slane %v5684_v13, 4  ;;  %v5707_v24 = vmul.f32 0.35355338, %v5684_v13  ;;  %v5704_v18 = vsel %vm484_vm1, 0.0, %v5703_v19  ;;  %v5725_v31 = vrot.slane %v5711_v9, 4 }
0x2467   : > { %v5702_v30 = vsel %vm484_vm1, 0.0, %v5701_v11  ;;  %v5712_v26 = vmul.f32 0.35355338, %v5704_v18  ;;  %v5698_v33 = vsel %vm484_vm1, 0.0, %v5697_v15 }
0x2468   : > { %v5700_v34 = vsel %vm484_vm1, 0.0, %v5699_v12  ;;  %v5710_v6 = vmul.f32 0.35355338, %v5702_v30  ;;  %v5713_v36 = vrot.slane %v5707_v24, 4  ;;  %v5726_v51 = vsel %vm484_vm1, %v5725_v31, %v5709_v10 }
0x2469   : > { %v5708_v5 = vmul.f32 0.35355338, %v5700_v34  ;;  %v5731_v37 = vrot.slane %v5712_v26, 4  ;;  %v5730_v38 = vperm.slane %v5726_v51, %v8914_v42  ;;  %v5706_v44 = vmul.f32 0.35355338, %v5698_v33 }
0x246a   : > { %v5714_v35 = vsel %vm484_vm1, %v5713_v36, %v5705_v27 }
0x246b   : > { %v5718_v16 = vperm.slane %v5714_v35, %v8914_v42  ;;  %v5719_v62 = vrot.slane %v5708_v5, 4  ;;  %v5732_v23 = vsel %vm484_vm1, %v5731_v37, %v5710_v6  ;;  %v5751_v58 = vrot.slane %v5730_v38, 4 }
0x246c   : > { %v5736_v47 = vperm.slane %v5732_v23, %v8914_v42 }
0x246d   : > { %v5720_v48 = vsel %vm484_vm1, %v5719_v62, %v5706_v44  ;;  %v5739_v32 = vrot.slane %v5718_v16, 4 }
0x246e   : > { %v5724_v50 = vperm.slane %v5720_v48, %v8914_v42  ;;  %v5749_v56 = vrot.slane %v5736_v47, 4  ;;  %v5752_v63 = vsel %vm484_vm1, %v5736_v47, %v5751_v58 }
0x246f   : > { %v5760_v0 = vperm.slane %v5752_v63, %v8931_v61 }
0x2470   : > { %v5737_v39 = vrot.slane %v5724_v50, 4  ;;  %v5740_v53 = vsel %vm484_vm1, %v5724_v50, %v5739_v32  ;;  %v5750_v7 = vsel %vm484_vm1, %v5749_v56, %v5730_v38 }
0x2471   : > { %v5748_v17 = vperm.slane %v5740_v53, %v8931_v61  ;;  %v5765_v3 = vrot.slane %v5760_v0, 4  ;;  %v5756_v1 = vperm.slane %v5750_v7, %v8931_v61 }
0x2472   : > { %v5738_v4 = vsel %vm484_vm1, %v5737_v39, %v5718_v16 }
0x2473   : > { %v5744_v21 = vperm.slane %v5738_v4, %v8931_v61  ;;  %v5766_v28 = vsel %vm484_vm1, %v5765_v3, %v5748_v17  ;;  %v5767_v55 = vrot.slane %v5748_v17, 4  ;;  %v5761_v19 = vrot.slane %v5756_v1, 4 }
0x2475   : > { %v5763_v54 = vrot.slane %v5744_v21, 4  ;;  %v5768_v60 = vsel %vm484_vm1, %v5760_v0, %v5767_v55  ;;  %v5762_v10 = vsel %vm484_vm1, %v5761_v19, %v5744_v21 }
0x2477   : > { %v5764_v14 = vsel %vm484_vm1, %v5756_v1, %v5763_v54 }
0x24b5   : > { %v5772_v13 = vpop.permute.xlu2 %5771 }
0x24b6   : > { %5813 = vxpose.xlu2.b32.start.end [1/1] (short) (narrow) %v5772_v13, 8 }
0x24be   : > { %6049 = vrot.lane.b32.xlu1 %v10095_v8, %s8654_s6 }
0x24d0   : > { %v8230_v15 = vpop.permute.xlu0 %8229 }
0x24d1   : > { %8234 = vxpose.xlu0.b32.start.end [1/1] (short) (narrow) %v8230_v15, 8 }
0x2508   : > { %v5797_v11 = vpop.trf.xlu1 }
0x2509   : > { %5927 = vmatpush.msra.mxu3 %v5797_v11 }
0x250a   : > { %7995 = vmatmul.msk.f32.vlgmr.msra.gmra.mxu3 %vm876_vm2, %v5762_v10 }
0x2530   : > { %v6050_v36 = vpop.permute.xlu1 %6049 }
0x254f   : > { %v5829_v9 = vpop.trf.xlu2 }
0x2550   : > { %5950 = vmatpush.msra.mxu0 %v5829_v9 }
0x2551   : > { %7996 = vmatmul.msk.f32.vlgmr.msra.gmra.mxu0 %vm876_vm2, %v5764_v14 }
0x2575   : > { %v8235_v12 = vpop.trf.xlu0 }
0x2576   : > { %v8239_v24 = vunpack.i.h.bf16 %v8235_v12  ;;  %v8236_v18 = vunpack.i.l.bf16 %v8235_v12 }
0x2578   : > { %5973 = vmatpush.msrb.mxu2 %v8236_v18  ;;  %5996 = vmatpush.msrb.mxu3 %v8239_v24 }
0x2579   : > { %7997 = vmatmul.msk.f32.vlgmr.msrb.gmra.mxu2 %vm876_vm2, %v5766_v28  ;;  %7998 = vmatmul.msk.f32.vlgmr.msrb.gmra.mxu3 %vm876_vm2, %v5768_v60 }
0x258d   : > { %v5929_v8 = vpop.f32.mrf.mxu3 }
0x258e   : > { %v6001_v27 = vsel %vm876_vm2, %v5929_v8, -inf }
0x258f   : > { %6002 = vmax.xlane.f32.xlu1 %v6001_v27 }
0x25a8   : > { %6047 = vrot.lane.b32.xlu1 %v10089_v45, %s8654_s6 }
0x25ce   : > { %v5952_v30 = vpop.f32.mrf.mxu0 }
0x25cf   : > { %v6004_v26 = vsel %vm876_vm2, %v5952_v30, -inf }
0x25d0   : > { %6005 = vmax.xlane.f32.xlu0 %v6004_v26 }
0x25fc   : > { %v5975_v31 = vpop.f32.mrf.mxu2  ;;  %v5998_v33 = vpop.f32.mrf.mxu3 }
0x25fd   : > { %v6007_v34 = vsel %vm876_vm2, %v5975_v31, -inf  ;;  %v6010_v6 = vsel %vm876_vm2, %v5998_v33, -inf }
0x25fe   : > { %6008 = vmax.xlane.f32.xlu0 %v6007_v34  ;;  %6011 = vmax.xlane.f32.xlu2 %v6010_v6 }
0x2602   : > { %v6003_v45 = vpop.xlane.xlu1 %6002 }
0x2603   : > { %v6013_v5 = vsub.f32 %v5929_v8, %v6003_v45 }
0x2605   : > { %v6017_v37 = vmul.f32 1.442695, %v6013_v5 }
0x2607   : > { %8398 = vpow2.f32 %v6017_v37 }
0x260d   : > { %v8399_v51 = vpop.eup %8398 }
0x260e   : > { %v6025_v35 = vsel %vm876_vm2, %v8399_v51, 0.0 }
0x2612   : > { %6045 = vrot.lane.b32.xlu0 %v10076_v29, %s8654_s6 }
0x2616   : > { %6051 = vrot.lane.b32.xlu2 %v10086_v40, %s8654_s6 }
0x261a   : > { %v6048_v3 = vpop.permute.xlu1 %6047 }
0x263f   : > { %6026 = vadd.xlane.f32.xlu2 %v6025_v35 }
0x2643   : > { %v6006_v38 = vpop.xlane.xlu0 %6005 }
0x2644   : > { %v6014_v44 = vsub.f32 %v5952_v30, %v6006_v38 }
0x2646   : > { %v6019_v16 = vmul.f32 1.442695, %v6014_v44 }
0x2648   : > { %8400 = vpow2.f32 %v6019_v16 }
0x264e   : > { %v8401_v62 = vpop.eup %8400 }
0x264f   : > { %v6028_v23 = vsel %vm876_vm2, %v8401_v62, 0.0 }
0x2650   : > { %6029 = vadd.xlane.f32.xlu1 %v6028_v23 }
0x2671   : > { %v6009_v29 = vpop.xlane.xlu0 %6008  ;;  %v6012_v47 = vpop.xlane.xlu2 %6011 }
0x2672   : > { %v6015_v40 = vsub.f32 %v5975_v31, %v6009_v29  ;;  %v6016_v48 = vsub.f32 %v5998_v33, %v6012_v47 }
0x2674   : > { %v6021_v58 = vmul.f32 1.442695, %v6015_v40  ;;  %v6023_v32 = vmul.f32 1.442695, %v6016_v48 }
0x2676   : > { %8402 = vpow2.f32 %v6021_v58 }
0x2677   : > { %8404 = vpow2.f32 %v6023_v32 }
0x2679   : > { %v6052_v50 = vpop.permute.xlu2 %6051 }
0x267a   : > { %6153 = vxpose.xlu2.b32.start.end [1/1] (short) (narrow) %v6052_v50, 8 }
0x267c   : > { %v8403_v56 = vpop.eup %8402 }
0x267d   : > { %v6031_v63 = vsel %vm876_vm2, %v8403_v56, 0.0  ;;  %v8405_v0 = vpop.eup %8404 }
0x267e   : > { %6032 = vadd.xlane.f32.xlu0 %v6031_v63  ;;  %v6034_v53 = vsel %vm876_vm2, %v8405_v0, 0.0 }
0x2684   : > { %v6046_v39 = vpop.permute.xlu0 %6045 }
0x2686   : > { %6035 = vadd.xlane.f32.xlu0 %v6034_v53 }
0x268a   : > { %6057 = vxpose.xlu1.b32.start.end [1/1] (short) (narrow) %v6046_v39, 8 }
0x26af   : > { %6121 = vxpose.xlu0.b32.start.end [1/1] (short) (narrow) %v6050_v36, 8 }
0x26b2   : > { %v6027_v17 = vpop.xlane.xlu2 %6026 }
0x26b3   : > { %8406 = vrcp.f32 %v6027_v17 }
0x26b7   : > { %6089 = vxpose.xlu0.b32.start.end [1/1] (short) (narrow) %v6048_v3, 8 }
0x26b9   : > { %v8407_v4 = vpop.eup %8406 }
0x26ba   : > { %v6041_v7 = vmul.f32 %v8407_v4, %v8399_v51 }
0x26bc   : > { %7999 = vmatpush.xpose.msk.msrb.mxu0 %vm876_vm2, %v6041_v7 }
0x26c3   : > { %v6030_v21 = vpop.xlane.xlu1 %6029 }
0x26c4   : > { %8408 = vrcp.f32 %v6030_v21 }
0x26ca   : > { %v8409_v28 = vpop.eup %8408 }
0x26cb   : > { %v6042_v55 = vmul.f32 %v8409_v28, %v8401_v62 }
0x26cd   : > { %8001 = vmatpush.xpose.msk.msra.mxu1 %vm876_vm2, %v6042_v55 }
0x26f1   : > { %v6033_v1 = vpop.xlane.xlu0 %6032 }
0x26f2   : > { %8410 = vrcp.f32 %v6033_v1 }
0x26f8   : > { %v8411_v54 = vpop.eup %8410 }
0x26f9   : > { %v6043_v60 = vmul.f32 %v8411_v54, %v8403_v56  ;;  %v6036_v14 = vpop.xlane.xlu0 %6035 }
0x26fa   : > { %8412 = vrcp.f32 %v6036_v14 }
0x26fb   : > { %8003 = vmatpush.xpose.msk.msra.mxu2 %vm876_vm2, %v6043_v60 }
0x2700   : > { %v8413_v13 = vpop.eup %8412 }
0x2701   : > { %v6044_v15 = vmul.f32 %v8413_v13, %v8405_v0 }
0x2703   : > { %8005 = vmatpush.xpose.msk.msra.mxu3 %vm876_vm2, %v6044_v15 }
0x2713   : > { %v6169_v11 = vpop.trf.xlu2 }
0x2714   : > { %8006 = vmatmul.msk.f32.vlgmr.msra.gmra.mxu3 %vm876_vm2, %v6169_v11 }
0x272e   : > { %v6073_v19 = vpop.trf.xlu1 }
0x272f   : > { %8000 = vmatmul.msk.f32.vlgmr.msrb.gmra.mxu0 %vm876_vm2, %v6073_v19 }
0x2753   : > { %v6137_v10 = vpop.trf.xlu0 }
0x2754   : > { %8004 = vmatmul.msk.f32.vlgmr.msra.gmra.mxu2 %vm876_vm2, %v6137_v10 }
0x275b   : > { %v6105_v9 = vpop.trf.xlu0 }
0x275c   : > { %8002 = vmatmul.msk.f32.vlgmr.msra.gmra.mxu1 %vm876_vm2, %v6105_v9 }
0x2797   : > { %v6286_v8 = vpop.f32.mrf.mxu3 }
0x27ac   : > { %v6208_v12 = vpop.f32.mrf.mxu0 }
0x27ad   : > { %6289 = vxpose.xlu0.b32.start.end [1/1] (short) (narrow) %v6208_v12, 8 }
0x27d7   : > { %v6260_v18 = vpop.f32.mrf.mxu2 }
0x27d9   : > { %v6234_v24 = vpop.f32.mrf.mxu1 }
0x27da   : > { %6321 = vxpose.xlu0.b32.start.end [1/1] (short) (narrow) %v6234_v24, 8 }
0x27e2   : > { %6353 = vxpose.xlu0.b32.start.end [1/1] (short) (narrow) %v6260_v18, 8 }
0x27ea   : > { %6385 = vxpose.xlu0.b32.start.end [1/1] (short) (narrow) %v6286_v8, 8 }
0x2851   : > { %v6305_v27 = vpop.trf.xlu0 }
0x2852   : > { %v6419_v31 = vrot.slane %v6305_v27, 4 }
0x287e   : > { %v6337_v30 = vpop.trf.xlu0 }
0x287f   : > { %v6431_v45 = vrot.slane %v6337_v30, 4 }
0x2886   : > { %v6369_v26 = vpop.trf.xlu0 }
0x2887   : > { %v6417_v33 = vrot.slane %v6369_v26, 4  ;;  %v6420_v34 = vsel %vm484_vm1, %v6369_v26, %v6419_v31 }
0x2888   : > { %v6428_v36 = vperm.slane %v6420_v34, %v8914_v42 }
0x2889   : > { %v6418_v6 = vsel %vm484_vm1, %v6417_v33, %v6305_v27 }
0x288a   : > { %v6424_v5 = vperm.slane %v6418_v6, %v8914_v42  ;;  %v6455_v38 = vrot.slane %v6428_v36, 4 }
0x288c   : > { %v6443_v62 = vrot.slane %v6424_v5, 4 }
0x288e   : > { %v6401_v37 = vpop.trf.xlu0 }
0x288f   : > { %v6429_v51 = vrot.slane %v6401_v37, 4  ;;  %v6432_v35 = vsel %vm484_vm1, %v6401_v37, %v6431_v45 }
0x2890   : > { %v6440_v44 = vperm.slane %v6432_v35, %v8914_v42 }
0x2891   : > { %v6430_v16 = vsel %vm484_vm1, %v6429_v51, %v6337_v30 }
0x2892   : > { %v6436_v23 = vperm.slane %v6430_v16, %v8914_v42  ;;  %v6453_v29 = vrot.slane %v6440_v44, 4  ;;  %v6456_v47 = vsel %vm484_vm1, %v6440_v44, %v6455_v38  ;;  %v8240_v16 = vpack.i.bf16 %v9864_v52, %v9797_v20 }
0x2893   : > { %v6464_v40 = vperm.slane %v6456_v47, %v8931_v61  ;;  %v7991_v47 = vld [vmem:[%s10483_s3 + $0x60] sm:$0xff] }
0x2894   : > { %v6441_v58 = vrot.slane %v6436_v23, 4  ;;  %v6444_v48 = vsel %vm484_vm1, %v6436_v23, %v6443_v62  ;;  %v6454_v32 = vsel %vm484_vm1, %v6453_v29, %v6428_v36  ;;  %v7994_v62 = vld [vmem:[%s10483_s3 + $0x78] sm:$0xff]  ;;  %v7993_v23 = vld [vmem:[%s10483_s3 + $0x70] sm:$0xff]  ;;  %v7992_v29 = vld [vmem:[%s10483_s3 + $0x68] sm:$0xff] }
0x2895   : > { %v6452_v50 = vperm.slane %v6444_v48, %v8931_v61  ;;  %v6460_v56 = vperm.slane %v6454_v32, %v8931_v61  ;;  %v6471_v63 = vrot.slane %v6464_v40, 4  ;;  %6558 = vmatpush.msra.mxu0 %v7994_v62 }
0x2896   : > { %v6442_v0 = vsel %vm484_vm1, %v6441_v58, %v6424_v5 }
0x2897   : > { %v6448_v39 = vperm.slane %v6442_v0, %v8931_v61  ;;  %v6467_v53 = vrot.slane %v6452_v50, 4  ;;  %v6469_v17 = vrot.slane %v6460_v56, 4  ;;  %v6472_v3 = vsel %vm484_vm1, 0.0, %v6471_v63  ;;  %6559 = vmatpush.msra.mxu0 %v7993_v23 }
0x2898   : > { %v6484_v4 = vsel %vm484_vm1, %v6471_v63, %v6460_v56  ;;  %v6489_v7 = vrot.slane %v6472_v3, 4  ;;  %v6542_v63 = vperm.slane %v10036_v46, 5  ;;  %v8245_v3 = vpack.i.bf16 %v9870_v2, %v9802_v22 }
0x2899   : > { %v6465_v21 = vrot.slane %v6448_v39, 4  ;;  %v6468_v28 = vsel %vm484_vm1, 0.0, %v6467_v53  ;;  %v6470_v55 = vsel %vm484_vm1, 0.0, %v6469_v17  ;;  %v6488_v1 = vperm.slane %v6484_v4, %v8914_v42  ;;  %6560 = vmatpush.msra.mxu0 %v7992_v29 }
0x289a   : > { %v6478_v54 = vrot.slane %v6468_v28, 4  ;;  %v6490_v60 = vsel %vm484_vm1, %v6489_v7, %v6470_v55  ;;  %v6473_v14 = vsel %vm484_vm1, %v6467_v53, %v6448_v39 }
0x289b   : > { %v6466_v13 = vsel %vm484_vm1, 0.0, %v6465_v21  ;;  %v6477_v15 = vperm.slane %v6473_v14, %v8914_v42  ;;  %v6494_v19 = vperm.slane %v6490_v60, %v8914_v42  ;;  %v6509_v11 = vrot.slane %v6488_v1, 4  ;;  %6561 = vmatpush.msra.mxu0 %v7991_v47 }
0x289c   : > { %v6479_v10 = vsel %vm484_vm1, %v6478_v54, %v6466_v13  ;;  %v8011_v54 = vld [vmem:[%s10483_s3 + $0xf8] sm:$0xff] }
0x289d   : > { %v6483_v9 = vperm.slane %v6479_v10, %v8914_v42  ;;  %v6497_v12 = vrot.slane %v6477_v15, 4  ;;  %v6510_v24 = vsel %vm484_vm1, %v6494_v19, %v6509_v11  ;;  %v6507_v18 = vrot.slane %v6494_v19, 4  ;;  %6614 = vmatpush.msrb.mxu1 %v8011_v54  ;;  %v10269_v10 = vld [vmem:[#allocation9 + $0x20] sm:$0xff] }
0x289e   : > { %v6518_v8 = vperm.slane %v6510_v24, %v8931_v61  ;;  %v6589_v24 = vperm.slane %v10269_v10, 2 }
0x289f   : > { %v6498_v27 = vsel %vm484_vm1, %v6483_v9, %v6497_v12  ;;  %v6495_v30 = vrot.slane %v6483_v9, 4  ;;  %v6508_v26 = vsel %vm484_vm1, %v6507_v18, %v6488_v1  ;;  %v8255_v1 = vpack.i.bf16 %v9841_v57, %v9862_v49 }
0x28a0   : > { %v6506_v31 = vperm.slane %v6498_v27, %v8931_v61  ;;  %v6523_v33 = vrot.slane %v6518_v8, 4  ;;  %v6514_v34 = vperm.slane %v6508_v26, %v8931_v61  ;;  %v6591_v27 = vperm.slane %v10269_v10, 3 }
0x28a1   : > { %v6496_v6 = vsel %vm484_vm1, %v6495_v30, %v6477_v15 }
0x28a2   : > { %v6524_v36 = vsel %vm484_vm1, %v6523_v33, %v6506_v31  ;;  %v6525_v45 = vrot.slane %v6506_v31, 4  ;;  %v6502_v5 = vperm.slane %v6496_v6, %v8931_v61  ;;  %v6519_v37 = vrot.slane %v6514_v34, 4 }
0x28a3   : > { %6532 = vrot.lane.b32.xlu0 %v6524_v36, %s8658_s11  ;;  %v6598_v31 = vperm.slane %v10036_v46, 6  ;;  %v8250_v6 = vpack.i.bf16 %v9835_v41, %v9845_v43 }
0x28a4   : > { %v6526_v51 = vsel %vm484_vm1, %v6518_v8, %v6525_v45  ;;  %v6521_v35 = vrot.slane %v6502_v5, 4  ;;  %v6520_v38 = vsel %vm484_vm1, %v6519_v37, %v6502_v5 }
0x28a5   : > { %6536 = vrot.lane.b32.xlu1 %v6526_v51, %s8657_s18 }
0x28a6   : > { %v6522_v44 = vsel %vm484_vm1, %v6514_v34, %v6521_v35 }
0x28a7   : > { %6528 = vrot.lane.b32.xlu2 %v6522_v44, %s8659_s15 }
0x28ab   : > { %8241 = vrot.lane.b32.xlu0 %v8240_v16, %s8654_s6 }
0x2901   : > { %v6529_v40 = vpop.permute.xlu2 %6528 }
0x2902   : > { %v6539_v58 = vsel %vm876_vm2, %v6520_v38, %v6529_v40 }
0x2915   : > { %v6533_v48 = vpop.permute.xlu0 %6532 }
0x2916   : > { %v6540_v32 = vsel %vm993_vm3, %v6539_v58, %v6533_v48 }
0x2917   : > { %v6537_v50 = vpop.permute.xlu1 %6536 }
0x2918   : > { %v6541_v56 = vsel %vm1726_vm4, %v6540_v32, %v6537_v50 }
0x2919   : > { %8007 = vmatmul.msk.f32.vlgmr.msra.gmra.mxu0 %vm429_vm0, %v6541_v56 }
0x291d   : > { %v8242_v36 = vpop.permute.xlu0 %8241 }
0x2996   : > { %v6563_v0 = vpop.f32.mrf.mxu0 }
0x2997   : > { %v6564_v39 = vadd.f32 %v6563_v0, %v6542_v63 }
0x2999   : > { %v6566_v53 = vadd.f32 %v6564_v39, %v10071_v59 }
0x299b   : > { %v6567_v17 = vsel %vm429_vm0, %v6566_v53, 0.0 }
0x299c   : > { %6568 = vadd.xlane.f32.xlu2 %v6567_v17 }
0x29b4   : > { %8246 = vrot.lane.b32.xlu2 %v8245_v3, %s8654_s6 }
0x2a0f   : > { %v6569_v4 = vpop.xlane.xlu2 %6568 }
0x2a10   : > { %v6570_v7 = vmul.f32 %v6569_v4, %v9182_v25 }
0x2a12   : > { %v6571_v21 = vsub.f32 %v6566_v53, %v6570_v7 }
0x2a14   : > { %v6572_v28 = vmul.f32 %v6571_v21, %v6571_v21 }
0x2a16   : > { %v6573_v55 = vsel %vm429_vm0, %v6572_v28, 0.0 }
0x2a17   : > { %6574 = vadd.xlane.f32.xlu1 %v6573_v55  ;;  %v8247_v45 = vpop.permute.xlu2 %8246 }
0x2a30   : > { %8256 = vrot.lane.b32.xlu1 %v8255_v1, %s8654_s6 }
0x2a38   : > { %7045 = vrot.lane.b32.xlu1 %v9797_v20, %s8661_s17  ;;  %v8010_v20 = vld [vmem:[%s10483_s3 + $0xf0] sm:$0xff] }
0x2a39   : > { %6615 = vmatpush.msrb.mxu1 %v8010_v20 }
0x2a40   : > { %7049 = vrot.lane.b32.xlu1 %v9864_v52, %s8661_s17  ;;  %v8009_v52 = vld [vmem:[%s10483_s3 + $0xe8] sm:$0xff] }
0x2a41   : > { %6616 = vmatpush.msrb.mxu1 %v8009_v52 }
0x2a48   : > { %7047 = vrot.lane.b32.xlu1 %v9802_v22, %s8661_s17  ;;  %v8008_v22 = vld [vmem:[%s10483_s3 + $0xe0] sm:$0xff] }
0x2a49   : > { %6617 = vmatpush.msrb.mxu1 %v8008_v22 }
0x2a50   : > { %7053 = vrot.lane.b32.xlu1 %v9845_v43, %s8661_s17 }
0x2a58   : > { %7051 = vrot.lane.b32.xlu1 %v9870_v2, %s8661_s17 }
0x2a8a   : > { %v6575_v2 = vpop.xlane.xlu1 %6574 }
0x2a8b   : > { %v6576_v60 = vmul.f32 %v6575_v2, %v9182_v25 }
0x2a8d   : > { %v6577_v14 = vadd.f32 1e-05, %v6576_v60 }
0x2a8f   : > { %8414 = vrsqrt.f32 %v6577_v14  ;;  %vm6584_vm10 = vweird.f32 %v6577_v14 }
0x2a95   : > { %v8415_v13 = vpop.eup %8414 }
0x2a96   : > { %v6579_v15 = vmul.f32 %v8415_v13, %v6577_v14  ;;  %vm6585_vm9 = vweird.f32 %v8415_v13 }
0x2a97   : > { %vm6586_vm11 = vmor %vm6584_vm10, %vm6585_vm9 }
0x2a98   : > { %v6580_v19 = vmul.f32 %v8415_v13, %v6579_v15 }
0x2a9a   : > { %v6581_v11 = vmul.f32 0.5, %v6580_v19 }
0x2a9c   : > { %v6582_v9 = vsub.f32 1.5, %v6581_v11 }
0x2a9e   : > { %v6583_v12 = vmul.f32 %v8415_v13, %v6582_v9 }
0x2aa0   : > { %v6587_v18 = vsel %vm6586_vm11, %v8415_v13, %v6583_v12 }
0x2aa1   : > { %v6588_v8 = vmul.f32 %v6587_v18, %v6571_v21 }
0x2aa3   : > { %v6590_v30 = vmul.f32 %v6589_v24, %v6588_v8 }
0x2aa5   : > { %v10273_v26 = vadd.f32 %v6591_v27, %v6590_v30 }
0x2aa7   : > { %8012 = vmatmul.msk.f32.vlgmr.msrb.gmra.mxu1 %vm429_vm0, %v10273_v26 }
0x2b24   : > { %v6619_v33 = vpop.f32.mrf.mxu1 }
0x2b25   : > { %v6620_v34 = vadd.f32 %v6619_v33, %v6598_v31  ;;  %v8257_v33 = vpop.permute.xlu1 %8256 }
0x2b27   : > { %6628 = vrot.lane.b32.xlu0 %v6620_v34, %s8651_s30  ;;  %v6639_v51 = vrot.slane %v6620_v34, 4 }
0x2b2f   : > { %6631 = vrot.lane.b32.xlu0 %v6620_v34, %s8652_s27 }
0x2b37   : > { %6634 = vrot.lane.b32.xlu0 %v6620_v34, %s8650_s21 }
0x2b3f   : > { %8251 = vrot.lane.b32.xlu0 %v8250_v6, %s8654_s6  ;;  %s8044_s6 = sshll.u32 %s10510_s9, 4 }
0x2b61   : > { %8261 = vxpose.xlu0.b32.start [1/2] (short) (narrow) %v8242_v36, 8 }
0x2b69   : > { %8263 = vxpose.xlu0.b32.end [2/2] (short) (narrow) %v8247_v45, 8 }
0x2b99   : > { %v6629_v5 = vpop.permute.xlu0 %6628 }
0x2b9a   : > { %v6651_v16 = vrot.slane %v6629_v5, 4 }
0x2ba1   : > { %v6632_v37 = vpop.permute.xlu0 %6631 }
0x2ba2   : > { %v6637_v46 = vrot.slane %v6632_v37, 4  ;;  %v6640_v35 = vsel %vm484_vm1, %v6632_v37, %v6639_v51 }
0x2ba3   : > { %v6648_v44 = vperm.slane %v6640_v35, %v8914_v42 }
0x2ba4   : > { %v6638_v38 = vsel %vm484_vm1, %v6637_v46, %v6620_v34 }
0x2ba5   : > { %v6644_v62 = vperm.slane %v6638_v38, %v8914_v42  ;;  %v6675_v47 = vrot.slane %v6648_v44, 4 }
0x2ba7   : > { %v6663_v48 = vrot.slane %v6644_v62, 4 }
0x2ba9   : > { %v6635_v43 = vpop.permute.xlu0 %6634 }
0x2baa   : > { %v6649_v23 = vrot.slane %v6635_v43, 4  ;;  %v6652_v29 = vsel %vm484_vm1, %v6635_v43, %v6651_v16 }
0x2bab   : > { %v6660_v40 = vperm.slane %v6652_v29, %v8914_v42 }
0x2bac   : > { %v6650_v58 = vsel %vm484_vm1, %v6649_v23, %v6629_v5 }
0x2bad   : > { %v6656_v32 = vperm.slane %v6650_v58, %v8914_v42  ;;  %v6673_v50 = vrot.slane %v6660_v40, 4  ;;  %v6676_v56 = vsel %vm484_vm1, %v6660_v40, %v6675_v47 }
0x2bae   : > { %v6684_v63 = vperm.slane %v6676_v56, %v8931_v61 }
0x2baf   : > { %v6661_v0 = vrot.slane %v6656_v32, 4  ;;  %v6664_v39 = vsel %vm484_vm1, %v6656_v32, %v6663_v48  ;;  %v6674_v53 = vsel %vm484_vm1, %v6673_v50, %v6648_v44 }
0x2bb0   : > { %v6672_v17 = vperm.slane %v6664_v39, %v8931_v61  ;;  %v6680_v3 = vperm.slane %v6674_v53, %v8931_v61  ;;  %v6691_v4 = vrot.slane %v6684_v63, 4  ;;  %v6699_v21 = vmul.f32 0.35355338, %v6684_v63 }
0x2bb1   : > { %v6662_v7 = vsel %vm484_vm1, %v6661_v0, %v6644_v62  ;;  %v8252_v28 = vpop.permute.xlu0 %8251 }
0x2bb2   : > { %v6668_v55 = vperm.slane %v6662_v7, %v8931_v61  ;;  %v6687_v1 = vrot.slane %v6672_v17, 4  ;;  %v6689_v54 = vrot.slane %v6680_v3, 4  ;;  %v6692_v20 = vsel %vm484_vm1, 0.0, %v6691_v4  ;;  %8270 = vxpose.xlu2.b32.start [1/2] (short) (narrow) %v8252_v28, 8 }
0x2bb3   : > { %v6695_v52 = vmul.f32 0.35355338, %v6672_v17  ;;  %v6697_v22 = vmul.f32 0.35355338, %v6680_v3  ;;  %v6700_v2 = vmul.f32 0.35355338, %v6692_v20 }
0x2bb4   : > { %v6685_v60 = vrot.slane %v6668_v55, 4  ;;  %v6688_v14 = vsel %vm484_vm1, 0.0, %v6687_v1  ;;  %v6690_v13 = vsel %vm484_vm1, 0.0, %v6689_v54  ;;  %v6693_v15 = vmul.f32 0.35355338, %v6668_v55 }
0x2bb5   : > { %v6696_v19 = vmul.f32 0.35355338, %v6688_v14  ;;  %v6698_v11 = vmul.f32 0.35355338, %v6690_v13  ;;  %v6701_v9 = vrot.slane %v6695_v52, 4  ;;  %v6713_v12 = vrot.slane %v6699_v21, 4 }
0x2bb6   : > { %v6686_v24 = vsel %vm484_vm1, 0.0, %v6685_v60  ;;  %v6719_v18 = vrot.slane %v6700_v2, 4  ;;  %v7046_v2 = vpop.permute.xlu1 %7045 }
0x2bb7   : > { %v6694_v8 = vmul.f32 0.35355338, %v6686_v24  ;;  %v6707_v27 = vrot.slane %v6696_v19, 4  ;;  %v6714_v30 = vsel %vm484_vm1, %v6713_v12, %v6697_v22  ;;  %v6702_v31 = vsel %vm484_vm1, %v6701_v9, %v6693_v15 }
0x2bb8   : > { %v6718_v34 = vperm.slane %v6714_v30, %v8914_v42  ;;  %v6720_v6 = vsel %vm484_vm1, %v6719_v18, %v6698_v11  ;;  %v6706_v36 = vperm.slane %v6702_v31, %v8914_v42 }
0x2bb9   : > { %v6724_v45 = vperm.slane %v6720_v6, %v8914_v42  ;;  %v6708_v5 = vsel %vm484_vm1, %v6707_v27, %v6694_v8 }
0x2bba   : > { %v6712_v37 = vperm.slane %v6708_v5, %v8914_v42  ;;  %v6727_v46 = vrot.slane %v6706_v36, 4  ;;  %v6739_v51 = vrot.slane %v6718_v34, 4  ;;  %8272 = vxpose.xlu2.b32.end [2/2] (short) (narrow) %v8257_v33, 8 }
0x2bbb   : > { %v6737_v35 = vrot.slane %v6724_v45, 4 }
0x2bbc   : > { %v6725_v38 = vrot.slane %v6712_v37, 4  ;;  %v6728_v44 = vsel %vm484_vm1, %v6712_v37, %v6727_v46  ;;  %v6740_v16 = vsel %vm484_vm1, %v6724_v45, %v6739_v51 }
0x2bbd   : > { %v6738_v62 = vsel %vm484_vm1, %v6737_v35, %v6718_v34  ;;  %v6736_v43 = vperm.slane %v6728_v44, %v8931_v61  ;;  %v6748_v23 = vperm.slane %v6740_v16, %v8931_v61 }
0x2bbe   : > { %v6726_v29 = vsel %vm484_vm1, %v6725_v38, %v6706_v36  ;;  %v6744_v47 = vperm.slane %v6738_v62, %v8931_v61  ;;  %v7050_v60 = vpop.permute.xlu1 %7049 }
0x2bbf   : > { %v6732_v40 = vperm.slane %v6726_v29, %v8931_v61  ;;  %v6753_v58 = vrot.slane %v6748_v23, 4  ;;  %v6755_v48 = vrot.slane %v6736_v43, 4 }
0x2bc0   : > { %v6749_v32 = vrot.slane %v6744_v47, 4 }
0x2bc1   : > { %v6751_v50 = vrot.slane %v6732_v40, 4  ;;  %v6754_v56 = vsel %vm484_vm1, %v6753_v58, %v6736_v43  ;;  %v6756_v63 = vsel %vm484_vm1, %v6748_v23, %v6755_v48 }
0x2bc2   : > { %v6750_v0 = vsel %vm484_vm1, %v6749_v32, %v6732_v40 }
0x2bc3   : > { %v6752_v39 = vsel %vm484_vm1, %v6744_v47, %v6751_v50 }
0x2bc6   : > { %v7048_v14 = vpop.permute.xlu1 %7047 }
0x2bd7   : > { %7057 = vrot.lane.b32.xlu0 %v9835_v41, %s8661_s17 }
0x2c05   : > { %v8264_v53 = vpop.trf.xlu0 }
0x2c06   : > { %v8268_v17 = vunpack.i.h.bf16 %v8264_v53  ;;  %v8265_v3 = vunpack.i.l.bf16 %v8264_v53 }
0x2c08   : > { %6927 = vmatpush.msrb.mxu2 %v8265_v3  ;;  %6950 = vmatpush.msrb.mxu3 %v8268_v17 }
0x2c09   : > { %8017 = vmatmul.msk.f32.vlgmr.msrb.gmra.mxu2 %vm876_vm2, %v6750_v0  ;;  %8018 = vmatmul.msk.f32.vlgmr.msrb.gmra.mxu3 %vm876_vm2, %v6752_v39 }
0x2c49   : > { %v7058_v30 = vpop.permute.xlu0 %7057 }
0x2c4b   : > { %v8273_v4 = vpop.trf.xlu2 }
0x2c4c   : > { %v8277_v7 = vunpack.i.h.bf16 %v8273_v4  ;;  %v8274_v21 = vunpack.i.l.bf16 %v8273_v4 }
0x2c4e   : > { %6973 = vmatpush.msrb.mxu0 %v8274_v21  ;;  %6996 = vmatpush.msra.mxu1 %v8277_v7 }
0x2c4f   : > { %8019 = vmatmul.msk.f32.vlgmr.msrb.gmra.mxu0 %vm876_vm2, %v6754_v56  ;;  %8020 = vmatmul.msk.f32.vlgmr.msra.gmra.mxu1 %vm876_vm2, %v6756_v63 }
0x2c8c   : > { %v6952_v28 = vpop.f32.mrf.mxu3  ;;  %v6929_v52 = vpop.f32.mrf.mxu2 }
0x2c8d   : > { %v7004_v41 = vsel %vm993_vm3, %v6952_v28, -inf  ;;  %v7001_v22 = vsel %vm993_vm3, %v6929_v52, -inf }
0x2c8e   : > { %7005 = vmax.xlane.f32.xlu0 %v7004_v41 }
0x2ca2   : > { %7059 = vrot.lane.b32.xlu0 %v9841_v57, %s8661_s17  ;;  %v7054_v57 = vpop.permute.xlu1 %7053 }
0x2caa   : > { %v7052_v13 = vpop.permute.xlu1 %7051 }
0x2ccc   : > { %v6975_v55 = vpop.f32.mrf.mxu0  ;;  %v6998_v1 = vpop.f32.mrf.mxu1 }
0x2ccd   : > { %v7010_v54 = vsel %vm993_vm3, %v6998_v1, -inf  ;;  %v7007_v20 = vsel %vm993_vm3, %v6975_v55, -inf }
0x2cce   : > { %7011 = vmax.xlane.f32.xlu1 %v7010_v54  ;;  %7008 = vmax.xlane.f32.xlu2 %v7007_v20 }
0x2cd6   : > { %7002 = vmax.xlane.f32.xlu1 %v7001_v22 }
0x2cef   : > { %7055 = vrot.lane.b32.xlu1 %v9862_v49, %s8661_s17 }
0x2cf7   : > { %7069 = vxpose.xlu2.b32.start [1/2] (short) (narrow) %v7046_v2, 8 }
0x2cff   : > { %7070 = vxpose.xlu2.b32.end [2/2] (short) (narrow) %v7048_v14, 8 }
0x2d01   : > { %v7006_v6 = vpop.xlane.xlu0 %7005 }
0x2d02   : > { %v7014_v36 = vsub.f32 %v6952_v28, %v7006_v6 }
0x2d04   : > { %v7019_v45 = vmul.f32 1.442695, %v7014_v36 }
0x2d14   : > { %v7060_v38 = vpop.permute.xlu0 %7059 }
0x2d41   : > { %v7012_v15 = vpop.xlane.xlu1 %7011  ;;  %v7009_v31 = vpop.xlane.xlu2 %7008 }
0x2d42   : > { %v7016_v19 = vsub.f32 %v6998_v1, %v7012_v15  ;;  %v7015_v33 = vsub.f32 %v6975_v55, %v7009_v31 }
0x2d44   : > { %v7023_v11 = vmul.f32 1.442695, %v7016_v19  ;;  %v7021_v34 = vmul.f32 1.442695, %v7015_v33 }
0x2d46   : > { %8416 = vpow2.f32 %v7023_v11 }
0x2d49   : > { %v7003_v9 = vpop.xlane.xlu1 %7002 }
0x2d4a   : > { %v7013_v12 = vsub.f32 %v6929_v52, %v7003_v9 }
0x2d4c   : > { %v8417_v24 = vpop.eup %8416  ;;  %v7017_v18 = vmul.f32 1.442695, %v7013_v12 }
0x2d4d   : > { %v7034_v8 = vsel %vm993_vm3, %v8417_v24, 0.0 }
0x2d4e   : > { %8418 = vpow2.f32 %v7017_v18  ;;  %7035 = vadd.xlane.f32.xlu0 %v7034_v8 }
0x2d4f   : > { %8420 = vpow2.f32 %v7021_v34 }
0x2d50   : > { %8422 = vpow2.f32 %v7019_v45 }
0x2d54   : > { %v8419_v27 = vpop.eup %8418 }
0x2d55   : > { %v7025_v49 = vsel %vm993_vm3, %v8419_v27, 0.0  ;;  %v8421_v5 = vpop.eup %8420 }
0x2d56   : > { %7026 = vadd.xlane.f32.xlu1 %v7025_v49  ;;  %v7031_v37 = vsel %vm993_vm3, %v8421_v5, 0.0  ;;  %v8423_v46 = vpop.eup %8422 }
0x2d57   : > { %v7028_v51 = vsel %vm993_vm3, %v8423_v46, 0.0 }
0x2d61   : > { %v7056_v35 = vpop.permute.xlu1 %7055 }
0x2d70   : > { %7032 = vadd.xlane.f32.xlu2 %v7031_v37 }
0x2d77   : > { %7133 = vxpose.xlu0.b32.start [1/2] (short) (narrow) %v7054_v57, 8 }
0x2d78   : > { %7029 = vadd.xlane.f32.xlu2 %v7028_v51 }
0x2d7f   : > { %7134 = vxpose.xlu0.b32.end [2/2] (short) (narrow) %v7056_v35, 8 }
0x2d90   : > { %7101 = vxpose.xlu1.b32.start [1/2] (short) (narrow) %v7050_v60, 8  ;;  %v7085_v47 = vpop.trf.xlu2 }
0x2d98   : > { %7102 = vxpose.xlu1.b32.end [2/2] (short) (narrow) %v7052_v13, 8 }
0x2da1   : > { %7165 = vxpose.xlu2.b32.start [1/2] (short) (narrow) %v7058_v30, 8 }
0x2da9   : > { %7166 = vxpose.xlu2.b32.end [2/2] (short) (narrow) %v7060_v38, 8 }
0x2dc1   : > { %v7036_v44 = vpop.xlane.xlu0 %7035 }
0x2dc2   : > { %8424 = vrcp.f32 %v7036_v44 }
0x2dc8   : > { %v8425_v16 = vpop.eup %8424 }
0x2dc9   : > { %v7044_v62 = vmul.f32 %v8425_v16, %v8417_v24  ;;  %v7027_v43 = vpop.xlane.xlu1 %7026 }
0x2dca   : > { %8426 = vrcp.f32 %v7027_v43 }
0x2dcb   : > { %8027 = vmatpush.xpose.msk.msrb.mxu1 %vm993_vm3, %v7044_v62 }
0x2dd0   : > { %v8427_v23 = vpop.eup %8426 }
0x2dd1   : > { %v7041_v29 = vmul.f32 %v8427_v23, %v8419_v27 }
0x2dd3   : > { %8021 = vmatpush.xpose.msk.msra.mxu2 %vm993_vm3, %v7041_v29 }
0x2dd6   : > { %8022 = vmatmul.msk.f32.vlgmr.msra.gmra.mxu2 %vm993_vm3, %v7085_v47 }
0x2de3   : > { %v7033_v40 = vpop.xlane.xlu2 %7032 }
0x2de4   : > { %8428 = vrcp.f32 %v7033_v40 }
0x2dea   : > { %v8429_v58 = vpop.eup %8428 }
0x2deb   : > { %v7043_v48 = vmul.f32 %v8429_v58, %v8421_v5  ;;  %v7030_v32 = vpop.xlane.xlu2 %7029 }
0x2dec   : > { %8430 = vrcp.f32 %v7030_v32 }
0x2ded   : > { %8025 = vmatpush.xpose.msk.msra.mxu0 %vm993_vm3, %v7043_v48 }
0x2df2   : > { %v8431_v50 = vpop.eup %8430 }
0x2df3   : > { %v7042_v56 = vmul.f32 %v8431_v50, %v8423_v46 }
0x2df5   : > { %8023 = vmatpush.xpose.msk.msra.mxu3 %vm993_vm3, %v7042_v56 }
0x2e1b   : > { %v7149_v63 = vpop.trf.xlu0 }
0x2e1c   : > { %8026 = vmatmul.msk.f32.vlgmr.msra.gmra.mxu0 %vm993_vm3, %v7149_v63 }
0x2e34   : > { %v7117_v0 = vpop.trf.xlu1 }
0x2e35   : > { %8024 = vmatmul.msk.f32.vlgmr.msra.gmra.mxu3 %vm993_vm3, %v7117_v0 }
0x2e3a   : > { %v7181_v39 = vpop.trf.xlu2 }
0x2e3b   : > { %8028 = vmatmul.msk.f32.vlgmr.msrb.gmra.mxu1 %vm993_vm3, %v7181_v39 }
0x2e59   : > { %v7220_v53 = vpop.f32.mrf.mxu2 }
0x2e5a   : > { %7301 = vxpose.xlu1.b32.start.end [1/1] (short) (narrow) %v7220_v53, 8 }
0x2e99   : > { %v7272_v17 = vpop.f32.mrf.mxu0 }
0x2e9a   : > { %7365 = vxpose.xlu2.b32.start.end [1/1] (short) (narrow) %v7272_v17, 8 }
0x2eb8   : > { %v7246_v3 = vpop.f32.mrf.mxu3  ;;  %v7298_v4 = vpop.f32.mrf.mxu1 }
0x2eb9   : > { %7333 = vxpose.xlu1.b32.start.end [1/1] (short) (narrow) %v7246_v3, 8  ;;  %7397 = vxpose.xlu2.b32.start.end [1/1] (short) (narrow) %v7298_v4, 8 }
0x2efe   : > { %v7317_v21 = vpop.trf.xlu1 }
0x2eff   : > { %v7431_v41 = vrot.slane %v7317_v21, 4 }
0x2f33   : > { %v7381_v7 = vpop.trf.xlu2 }
0x2f34   : > { %v7429_v28 = vrot.slane %v7381_v7, 4  ;;  %v7432_v54 = vsel %vm484_vm1, %v7381_v7, %v7431_v41 }
0x2f35   : > { %v7440_v22 = vperm.slane %v7432_v54, %v8914_v42 }
0x2f36   : > { %v7430_v1 = vsel %vm484_vm1, %v7429_v28, %v7317_v21 }
0x2f37   : > { %v7436_v52 = vperm.slane %v7430_v1, %v8914_v42  ;;  %v7467_v19 = vrot.slane %v7440_v22, 4 }
0x2f39   : > { %v7455_v57 = vrot.slane %v7436_v52, 4 }
0x2f52   : > { %v7413_v55 = vpop.trf.xlu2 }
0x2f53   : > { %v7441_v20 = vrot.slane %v7413_v55, 4 }
0x2f5d   : > { %v7349_v2 = vpop.trf.xlu1 }
0x2f5e   : > { %v7442_v60 = vsel %vm484_vm1, %v7441_v20, %v7349_v2  ;;  %v7443_v14 = vrot.slane %v7349_v2, 4  ;;  %v8015_v20 = vld [vmem:[%s10483_s3 + $0xb0] sm:$0xff] }
0x2f5f   : > { %v7448_v13 = vperm.slane %v7442_v60, %v8914_v42 }
0x2f60   : > { %v7444_v15 = vsel %vm484_vm1, %v7413_v55, %v7443_v14 }
0x2f61   : > { %v7452_v11 = vperm.slane %v7444_v15, %v8914_v42  ;;  %v7453_v9 = vrot.slane %v7448_v13, 4  ;;  %v7456_v12 = vsel %vm484_vm1, %v7448_v13, %v7455_v57 }
0x2f62   : > { %v7464_v24 = vperm.slane %v7456_v12, %v8931_v61 }
0x2f63   : > { %v7454_v18 = vsel %vm484_vm1, %v7453_v9, %v7436_v52  ;;  %v7465_v8 = vrot.slane %v7452_v11, 4  ;;  %v7468_v27 = vsel %vm484_vm1, %v7452_v11, %v7467_v19  ;;  %v8014_v52 = vld [vmem:[%s10483_s3 + $0xa8] sm:$0xff] }
0x2f64   : > { %v7460_v49 = vperm.slane %v7454_v18, %v8931_v61  ;;  %v7476_v30 = vperm.slane %v7468_v27, %v8931_v61  ;;  %v7479_v31 = vrot.slane %v7464_v24, 4  ;;  %v8445_v19 = vld [vmem:[#allocation9 + $0x18] sm:$0xff] }
0x2f65   : > { %v7466_v33 = vsel %vm484_vm1, %v7465_v8, %v7440_v22  ;;  %v8013_v22 = vld [vmem:[%s10483_s3 + $0xa0] sm:$0xff]  ;;  %v7554_v11 = vperm.slane %v8445_v19, 7 }
0x2f66   : > { %v7472_v34 = vperm.slane %v7466_v33, %v8931_v61  ;;  %v7477_v6 = vrot.slane %v7460_v49, 4  ;;  %v7480_v36 = vsel %vm484_vm1, 0.0, %v7479_v31  ;;  %v7483_v45 = vrot.slane %v7476_v30, 4  ;;  %v7609_v33 = vld [vmem:[#allocation6 + $0x78] sm:$0xff] }
0x2f67   : > { %v7485_v5 = vsel %vm484_vm1, %v7479_v31, %v7460_v49  ;;  %v7490_v37 = vrot.slane %v7480_v36, 4  ;;  %7635 = vmatpush.msrb.mxu3 %v7609_v33  ;;  %v7606_v36 = vld [vmem:[#allocation6 + $0x60] sm:$0xff] }
0x2f68   : > { %v7478_v46 = vsel %vm484_vm1, 0.0, %v7477_v6  ;;  %v7481_v51 = vrot.slane %v7472_v34, 4  ;;  %v7484_v35 = vsel %vm484_vm1, 0.0, %v7483_v45  ;;  %v7489_v38 = vperm.slane %v7485_v5, %v8914_v42  ;;  %v7607_v6 = vld [vmem:[#allocation6 + $0x68] sm:$0xff]  ;;  %v8035_v5 = vld [vmem:[%s10485_s5 + $0xe8] sm:$0xff] }
0x2f69   : > { %v7496_v44 = vsel %vm484_vm1, %v7483_v45, %v7472_v34  ;;  %v7501_v16 = vrot.slane %v7484_v35, 4  ;;  %v7491_v62 = vsel %vm484_vm1, %v7490_v37, %v7478_v46  ;;  %v7608_v34 = vld [vmem:[#allocation6 + $0x70] sm:$0xff]  ;;  %v8036_v45 = vld [vmem:[%s10485_s5 + $0xf0] sm:$0xff] }
0x2f6a   : > { %v7482_v43 = vsel %vm484_vm1, 0.0, %v7481_v51  ;;  %v7495_v23 = vperm.slane %v7491_v62, %v8914_v42  ;;  %v7500_v29 = vperm.slane %v7496_v44, %v8914_v42  ;;  %v7509_v47 = vrot.slane %v7489_v38, 4  ;;  %7636 = vmatpush.msrb.mxu3 %v7608_v34  ;;  %v8034_v51 = vld [vmem:[%s10485_s5 + $0xe0] sm:$0xff] }
0x2f6b   : > { %v7502_v40 = vsel %vm484_vm1, %v7501_v16, %v7482_v43 }
0x2f6c   : > { %v7506_v58 = vperm.slane %v7502_v40, %v8914_v42  ;;  %v7510_v48 = vsel %vm484_vm1, %v7495_v23, %v7509_v47  ;;  %v7521_v32 = vrot.slane %v7500_v29, 4  ;;  %v7507_v50 = vrot.slane %v7495_v23, 4  ;;  %7637 = vmatpush.msrb.mxu3 %v7607_v6 }
0x2f6d   : > { %v7518_v56 = vperm.slane %v7510_v48, %v8931_v61  ;;  %v7601_v47 = vperm.slane %v10269_v10, 4  ;;  %v7603_v48 = vperm.slane %v10269_v10, 5 }
0x2f6e   : > { %v7522_v63 = vsel %vm484_vm1, %v7506_v58, %v7521_v32  ;;  %v7508_v0 = vsel %vm484_vm1, %v7507_v50, %v7489_v38  ;;  %v7519_v39 = vrot.slane %v7506_v58, 4  ;;  %7638 = vmatpush.msrb.mxu3 %v7606_v36  ;;  %v8033_v38 = vld [vmem:[%s10485_s5 + $0xd8] sm:$0xff] }
0x2f6f   : > { %v7530_v53 = vperm.slane %v7522_v63, %v8931_v61  ;;  %v7514_v17 = vperm.slane %v7508_v0, %v8931_v61  ;;  %v7537_v3 = vrot.slane %v7518_v56, 4  ;;  %v8031_v63 = vld [vmem:[%s10485_s5 + $0xc8] sm:$0xff]  ;;  %v8030_v0 = vld [vmem:[%s10485_s5 + $0xc0] sm:$0xff] }
0x2f70   : > { %v7520_v4 = vsel %vm484_vm1, %v7519_v39, %v7500_v29  ;;  %v7619_v39 = vperm.slane %v10269_v10, 0 }
0x2f71   : > { %v7535_v7 = vrot.slane %v7530_v53, 4  ;;  %v7526_v42 = vperm.slane %v7520_v4, %v8931_v61  ;;  %v7533_v21 = vrot.slane %v7514_v17, 4  ;;  %v7538_v28 = vsel %vm484_vm1, %v7530_v53, %v7537_v3  ;;  %v8016_v61 = vld [vmem:[%s10483_s3 + $0xb8] sm:$0xff] }
0x2f72   : > { %7548 = vrot.lane.b32.xlu1 %v7538_v28, %s8657_s18  ;;  %7570 = vmatpush.msrb.mxu2 %v8016_v61  ;;  %v7644_v4 = vperm.slane %v10269_v10, 1 }
0x2f73   : > { %v7536_v41 = vsel %vm484_vm1, %v7535_v7, %v7518_v56  ;;  %v7534_v55 = vsel %vm484_vm1, %v7526_v42, %v7533_v21  ;;  %v7531_v1 = vrot.slane %v7526_v42, 4  ;;  %v8032_v56 = vld [vmem:[%s10485_s5 + $0xd0] sm:$0xff] }
0x2f74   : > { %7544 = vrot.lane.b32.xlu0 %v7536_v41, %s8658_s11  ;;  %7540 = vrot.lane.b32.xlu2 %v7534_v55, %s8659_s15  ;;  %s415_s11 = scalar_lea.vmem %s10488_s8, %s8044_s6 }
0x2f75   : > { %v7532_v54 = vsel %vm484_vm1, %v7531_v1, %v7514_v17  ;;  %7571 = vmatpush.msrb.mxu2 %v8015_v20  ;;  %v5578_v20 = vsel %vm429_vm0, %v10071_v59, 0.0 }
0x2f77   : > { %7572 = vmatpush.msrb.mxu2 %v8014_v52 }
0x2f79   : > { %7573 = vmatpush.msrb.mxu2 %v8013_v22 }
0x2fce   : > { %v7541_v2 = vpop.permute.xlu2 %7540 }
0x2fcf   : > { %v7551_v60 = vsel %vm876_vm2, %v7532_v54, %v7541_v2 }
0x2fe4   : > { %v7549_v13 = vpop.permute.xlu1 %7548 }
0x2fe6   : > { %v7545_v14 = vpop.permute.xlu0 %7544 }
0x2fe7   : > { %v7552_v57 = vsel %vm993_vm3, %v7551_v60, %v7545_v14 }
0x2fe8   : > { %v7553_v15 = vsel %vm1726_vm4, %v7552_v57, %v7549_v13 }
0x2fe9   : > { %8029 = vmatmul.msk.f32.vlgmr.msrb.gmra.mxu2 %vm429_vm0, %v7553_v15 }
0x306c   : > { %v7575_v9 = vpop.f32.mrf.mxu2 }
0x306d   : > { %v7576_v12 = vadd.f32 %v7575_v9, %v7554_v11 }
0x306f   : > { %v7578_v24 = vadd.f32 %v7576_v12, %v10273_v26  ;;  %v8037_v26 = vld [vmem:[%s10485_s5 + $0xf8] sm:$0xff] }
0x3070   : > { %7656 = vmatpush.msrb.mxu0 %v8037_v26 }
0x3071   : > { %v7579_v18 = vsel %vm429_vm0, %v7578_v24, 0.0 }
0x3072   : > { %7580 = vadd.xlane.f32.xlu1 %v7579_v18  ;;  %7657 = vmatpush.msrb.mxu0 %v8036_v45 }
0x3074   : > { %7658 = vmatpush.msrb.mxu0 %v8035_v5 }
0x3076   : > { %7659 = vmatpush.msrb.mxu0 %v8034_v51 }
0x3078   : > { %7660 = vmatpush.msrb.mxu0 %v8033_v38 }
0x307a   : > { %7661 = vmatpush.msrb.mxu0 %v8032_v56 }
0x307c   : > { %7662 = vmatpush.msrb.mxu0 %v8031_v63 }
0x307e   : > { %7663 = vmatpush.msrb.mxu0 %v8030_v0 }
0x30e5   : > { %v7581_v8 = vpop.xlane.xlu1 %7580 }
0x30e6   : > { %v7582_v27 = vmul.f32 %v7581_v8, %v9182_v25  ;;  %v7691_v8 = vperm.slane %v10269_v10, 6 }
0x30e8   : > { %v7583_v49 = vsub.f32 %v7578_v24, %v7582_v27 }
0x30ea   : > { %v7584_v30 = vmul.f32 %v7583_v49, %v7583_v49 }
0x30ec   : > { %v7585_v31 = vsel %vm429_vm0, %v7584_v30, 0.0  ;;  %v7693_v30 = vperm.slane %v10269_v10, 7 }
0x30ed   : > { %7586 = vadd.xlane.f32.xlu2 %v7585_v31 }
0x3160   : > { %v7587_v37 = vpop.xlane.xlu2 %7586 }
0x3161   : > { %v7588_v46 = vmul.f32 %v7587_v37, %v9182_v25 }
0x3163   : > { %v7589_v35 = vadd.f32 1e-05, %v7588_v46 }
0x3165   : > { %8432 = vrsqrt.f32 %v7589_v35  ;;  %vm7596_vm2 = vweird.f32 %v7589_v35 }
0x316b   : > { %v8433_v44 = vpop.eup %8432 }
0x316c   : > { %v7591_v16 = vmul.f32 %v8433_v44, %v7589_v35  ;;  %vm7597_vm1 = vweird.f32 %v8433_v44 }
0x316d   : > { %vm7598_vm3 = vmor %vm7596_vm2, %vm7597_vm1 }
0x316e   : > { %v7592_v62 = vmul.f32 %v8433_v44, %v7591_v16  ;;  %v8446_v16 = vld [vmem:[#allocation9 + $0x28] sm:$0x7] }
0x3170   : > { %v7593_v43 = vmul.f32 0.5, %v7592_v62  ;;  %v5600_v62 = vperm.slane %v8446_v16, 1 }
0x3172   : > { %v7594_v23 = vsub.f32 1.5, %v7593_v43 }
0x3174   : > { %v7595_v29 = vmul.f32 %v8433_v44, %v7594_v23 }
0x3176   : > { %v7599_v40 = vsel %vm7598_vm3, %v8433_v44, %v7595_v29  ;;  %v5602_v29 = vperm.slane %v8446_v16, 2 }
0x3177   : > { %v7600_v58 = vmul.f32 %v7599_v40, %v7583_v49 }
0x3179   : > { %v7602_v32 = vmul.f32 %v7601_v47, %v7600_v58 }
0x317b   : > { %v7604_v50 = vadd.f32 %v7603_v48, %v7602_v32 }
0x317d   : > { %8038 = vmatmul.msk.f32.vlgmr.msrb.gmra.mxu3 %vm429_vm0, %v7604_v50 }
0x3200   : > { %v7640_v53 = vpop.f32.mrf.mxu3 }
0x3201   : > { %v7641_v17 = vadd.f32 %v7640_v53, %v7619_v39 }
0x3203   : > { %v7643_v3 = vmax.f32 %v7641_v17, 0.0 }
0x3205   : > { %8039 = vmatmul.msk.f32.vlgmr.msrb.gmra.mxu0 %vm1863_vm12, %v7643_v3 }
0x3282   : > { %v7665_v7 = vpop.f32.mrf.mxu0 }
0x3283   : > { %v7666_v42 = vadd.f32 %v7665_v7, %v7644_v4 }
0x3285   : > { %v7668_v21 = vadd.f32 %v7666_v42, %v7604_v50 }
0x3287   : > { %v7669_v28 = vsel %vm429_vm0, %v7668_v21, 0.0 }
0x3288   : > { %7670 = vadd.xlane.f32.xlu0 %v7669_v28 }
0x32fb   : > { %v7671_v41 = vpop.xlane.xlu0 %7670 }
0x32fc   : > { %v7672_v55 = vmul.f32 %v7671_v41, %v9182_v25 }
0x32fe   : > { %v7673_v1 = vsub.f32 %v7668_v21, %v7672_v55 }
0x3300   : > { %v7674_v54 = vmul.f32 %v7673_v1, %v7673_v1 }
0x3302   : > { %v7675_v61 = vsel %vm429_vm0, %v7674_v54, 0.0 }
0x3303   : > { %7676 = vadd.xlane.f32.xlu1 %v7675_v61 }
0x330b   : > { %5579 = vadd.xlane.f32.xlu1 %v5578_v20 }
0x3376   : > { %v7677_v52 = vpop.xlane.xlu1 %7676 }
0x3377   : > { %v7678_v22 = vmul.f32 %v7677_v52, %v9182_v25 }
0x3379   : > { %v7679_v2 = vadd.f32 1e-05, %v7678_v22 }
0x337b   : > { %8434 = vrsqrt.f32 %v7679_v2  ;;  %vm7686_vm12 = vweird.f32 %v7679_v2 }
0x337e   : > { %v5580_v60 = vpop.xlane.xlu1 %5579 }
0x337f   : > { %v5581_v14 = vmul.f32 %v5580_v60, %v9182_v25 }
0x3381   : > { %v8435_v57 = vpop.eup %8434  ;;  %v5582_v13 = vsub.f32 %v10071_v59, %v5581_v14 }
0x3382   : > { %v7681_v15 = vmul.f32 %v8435_v57, %v7679_v2  ;;  %vm7687_vm4 = vweird.f32 %v8435_v57 }
0x3383   : > { %v5583_v19 = vmul.f32 %v5582_v13, %v5582_v13  ;;  %vm7688_vm13 = vmor %vm7686_vm12, %vm7687_vm4 }
0x3384   : > { %v7682_v11 = vmul.f32 %v8435_v57, %v7681_v15 }
0x3385   : > { %v5584_v9 = vsel %vm429_vm0, %v5583_v19, 0.0 }
0x3386   : > { %v7683_v12 = vmul.f32 0.5, %v7682_v11  ;;  %5585 = vadd.xlane.f32.xlu1 %v5584_v9 }
0x3388   : > { %v7684_v24 = vsub.f32 1.5, %v7683_v12 }
0x338a   : > { %v7685_v18 = vmul.f32 %v8435_v57, %v7684_v24 }
0x338c   : > { %v7689_v27 = vsel %vm7688_vm13, %v8435_v57, %v7685_v18 }
0x338d   : > { %v7690_v49 = vmul.f32 %v7689_v27, %v7673_v1 }
0x338f   : > { %v7692_v59 = vmul.f32 %v7691_v8, %v7690_v49 }
0x3391   : > { %v7694_v31 = vadd.f32 %v7693_v30, %v7692_v59 }
0x3393   : > { %v7695_v33 = vsel %vm429_vm0, %v7694_v31, 0.0 }
0x3394   : > { %7696 = vadd.xlane.f32.xlu2 %v7695_v33 }
0x33f9   : > { %v5586_v34 = vpop.xlane.xlu1 %5585 }
0x33fa   : > { %v5587_v6 = vmul.f32 %v5586_v34, %v9182_v25 }
0x33fc   : > { %v5588_v36 = vadd.f32 1e-05, %v5587_v6 }
0x33fe   : > { %8436 = vrsqrt.f32 %v5588_v36  ;;  %vm5595_vm15 = vweird.f32 %v5588_v36 }
0x3404   : > { %v8437_v26 = vpop.eup %8436 }
0x3405   : > { %v5590_v45 = vmul.f32 %v8437_v26, %v5588_v36  ;;  %vm5596_vm14 = vweird.f32 %v8437_v26 }
0x3406   : > { %vm5597_vm5 = vmor %vm5595_vm15, %vm5596_vm14 }
0x3407   : > { %v5591_v5 = vmul.f32 %v8437_v26, %v5590_v45  ;;  %v7697_v37 = vpop.xlane.xlu2 %7696 }
0x3408   : > { %v7698_v46 = vmul.f32 %v7697_v37, %v9182_v25 }
0x3409   : > { %v5592_v51 = vmul.f32 0.5, %v5591_v5 }
0x340a   : > { %v7699_v10 = vsub.f32 %v7694_v31, %v7698_v46 }
0x340b   : > { %v5593_v35 = vsub.f32 1.5, %v5592_v51 }
0x340c   : > { %v7700_v38 = vmul.f32 %v7699_v10, %v7699_v10 }
0x340d   : > { %v5594_v44 = vmul.f32 %v8437_v26, %v5593_v35 }
0x340e   : > { %v7701_v43 = vsel %vm429_vm0, %v7700_v38, 0.0 }
0x340f   : > { %v5598_v23 = vsel %vm5597_vm5, %v8437_v26, %v5594_v44  ;;  %7702 = vadd.xlane.f32.xlu2 %v7701_v43 }
0x3410   : > { %v5599_v47 = vmul.f32 %v5598_v23, %v5582_v13 }
0x3412   : > { %v5601_v40 = vmul.f32 %v5600_v62, %v5599_v47 }
0x3414   : > { %v5603_v58 = vadd.f32 %v5602_v29, %v5601_v40 }
0x3416   : > { %5604 = vst.msk [vmem:[%s415_s11] sm:$0xff] %vm429_vm0, %v5603_v58 }
0x3482   : > { %v7703_v48 = vpop.xlane.xlu2 %7702 }
0x3483   : > { %v7704_v32 = vmul.f32 %v7703_v48, %v9182_v25 }
0x3485   : > { %v7705_v50 = vadd.f32 1e-05, %v7704_v32 }
0x3487   : > { %8438 = vrsqrt.f32 %v7705_v50  ;;  %vm7712_vm7 = vweird.f32 %v7705_v50 }
0x348d   : > { %v8439_v56 = vpop.eup %8438 }
0x348e   : > { %v7707_v63 = vmul.f32 %v8439_v56, %v7705_v50  ;;  %vm7713_vm6 = vweird.f32 %v8439_v56 }
0x348f   : > { %vm7714_vm8 = vmor %vm7712_vm7, %vm7713_vm6 }
0x3490   : > { %v7708_v0 = vmul.f32 %v8439_v56, %v7707_v63 }
0x3492   : > { %v7709_v39 = vmul.f32 0.5, %v7708_v0 }
0x3494   : > { %v7710_v53 = vsub.f32 1.5, %v7709_v39 }
0x3496   : > { %v7711_v17 = vmul.f32 %v8439_v56, %v7710_v53 }
0x3498   : > { %v7715_v3 = vsel %vm7714_vm8, %v8439_v56, %v7711_v17 }
0x3499   : > { %v7716_v4 = vmul.f32 %v7715_v3, %v7699_v10 }
0x349b   : > { %v7717_v7 = vmul.f32 %v7716_v4, %v5600_v62 }
0x349d   : > { %v7718_v42 = vadd.f32 %v7717_v7, %v5602_v29 }
0x349f   : > { %8040 = vst.msk [vmem:[%s415_s11 + $0x8] sm:$0xff] %vm429_vm0, %v7718_v42 }
0x34a0 PF: > { %s10504_s9 = sld [smem:[#allocation14_spill]]  ;;  %p22_p4 = scmp.ge.s32.totalorder %s8770_s13, 4  }
0x34a1   : > { %s10505_s27 = smov %s8635_s28  ;;  %s10506_s28 = smov %s8639_s29 }
0x34a2   : > { %s10508_s30 = smov %s8770_s13  ;;  %24 = sbr.rel (!%p22_p4) target bundleno = 10 (0xa), region = 134 }
0x34a6   : > { %s10507_s29 = smov %s10504_s9 }
0x34a7   :  { %7742 = vsyncpa [#allocation3], 1 }
0x34a8   :  { %7744 = vsyncpa [#allocation3 + $0x1], 1 }
0x34a9   :  { %7745 = vsyncpa [#allocation5], 1 }
0x34aa   :  { %7747 = vsyncpa [#allocation5 + $0x1], 1 }
0x34ab   :  { %7748 = vsyncpa [#allocation8], 1 }

</bundles_post_ra>
